<compile_context>
chip_gen: v7x
topology: tpu7x:2x2x1
jax: 0.10.0
libtpu: 0.0.40
codegen_flags: <defaults>
</compile_context>

<pallas_src>
import numpy as np
import jax
import jax.numpy as jnp
from jax.experimental import pallas as pl
from jax.experimental.pallas import tpu as pltpu

_B = 8                    # samples per grid step (16-32 also fine on v6e/v7x)
_OPD = jnp.bfloat16       # MXU operand dtype (accumulation stays float32)


# ----------------------------------------------------------------------------
# Fused forward kernel (one grid step == _B batch samples)
# ----------------------------------------------------------------------------
def _convnet_kernel(x_ref, w1_ref, b1_ref, w2_ref, b2_ref,
                    wf1_ref, bf1_ref, wf2_ref, bf2_ref, wf3_ref, bf3_ref,
                    o_ref, slab1, pw1, slab2, pw2, fcs):
    B = _B

    # ---- conv1: build K-merged banded im2row slab (5 row-window copies),
    #      then ONE (B*32, 640) x (640, 256) matmul -----------------------------
    # slab1[b, r, dh*128 + (w*3+cin)] = x[b, r+dh, w*3+cin], r in [0,28)
    zpad = jnp.zeros((B, 32, 32), slab1.dtype)
    for dh in range(5):
        slab1[:, 0:28, dh * 128:dh * 128 + 96] = x_ref[:, dh:dh + 28, :]
        # zero the 32-lane pad strip of this tap every step (stale VMEM there
        # multiplies zero weight rows, but 0 * NaN would still be NaN).
        slab1[:, :, dh * 128 + 96:(dh + 1) * 128] = zpad
    a1 = jnp.dot(slab1[...].reshape(B * 32, 640), w1_ref[...],
                 preferred_element_type=jnp.float32)
    a1 = jnp.maximum(a1 + b1_ref[...], 0.0)                     # (B*32, 256) f32

    # ---- pool1: W = max of the two 128-lane halves,
    #             H = stride-2 sublane max via VMEM scratch ----------------------
    pw1[...] = jnp.maximum(a1[:, 0:128], a1[:, 128:256])        # (B*32, 128)
    hp1 = jnp.maximum(pw1[pl.ds(0, B * 16, stride=2), :],
                      pw1[pl.ds(1, B * 16, stride=2), :]).reshape(B, 16, 128)
    # per sample: rows 0..13 valid, 14..15 junk (never read below)

    # ---- conv2: same K-merged slab trick, ONE (B*16, 640) x (640, 256) matmul --
    for dh in range(5):
        slab2[:, 0:10, dh * 128:(dh + 1) * 128] = (
            hp1[:, dh:dh + 10, :].astype(slab2.dtype))
    a2 = jnp.dot(slab2[...].reshape(B * 16, 640), w2_ref[...],
                 preferred_element_type=jnp.float32)
    a2 = jnp.maximum(a2 + b2_ref[...], 0.0)                     # (B*16, 256) f32

    # ---- pool2 ------------------------------------------------------------------
    pw2[...] = jnp.maximum(a2[:, 0:128], a2[:, 128:256])        # (B*16, 128)
    hp2 = jnp.maximum(pw2[pl.ds(0, B * 8, stride=2), :],
                      pw2[pl.ds(1, B * 8, stride=2), :]).reshape(B, 8, 128)
    # per sample: rows 0..4 valid, 5..7 junk (never read below)

    # ---- fc1 (+ReLU): flatten the 5 pooled rows to 640 lanes, single matmul ----
    for hpi in range(5):
        fcs[:, hpi * 128:(hpi + 1) * 128] = hp2[:, hpi, :].astype(fcs.dtype)
    h = jnp.dot(fcs[...], wf1_ref[...], preferred_element_type=jnp.float32)
    h = jnp.maximum(h + bf1_ref[...], 0.0)                      # (B, 128) f32

    # ---- fc2 (+ReLU), fc3 (no activation) ---------------------------------------
    h = jnp.maximum(jnp.dot(h.astype(wf2_ref.dtype), wf2_ref[...],
                            preferred_element_type=jnp.float32) + bf2_ref[...],
                    0.0)
    h = jnp.dot(h.astype(wf3_ref.dtype), wf3_ref[...],
                preferred_element_type=jnp.float32) + bf3_ref[...]

    # lane-dense store; real logits live in lanes 0..9, lanes 10..127 are 0.
    o_ref[...] = h


def _whole(shape):
    zero = (0,) * len(shape)
    return pl.BlockSpec(shape, lambda n, _z=zero: _z)


def convnet_forward(x_nchw, packed):
    """x: (N, 3, 32, 32) float32 -> logits (N, 10) float32."""
    N = x_nchw.shape[0]
    n_pad = (-N) % _B
    # Tiny XLA glue (12 KiB/sample): NCHW -> (N, 32, W*Cin) rows, cast to the
    # MXU operand dtype, pad the batch to a multiple of the per-step block.
    x2 = jnp.transpose(x_nchw, (0, 2, 3, 1)).reshape(N, 32, 96).astype(_OPD)
    if n_pad:
        x2 = jnp.pad(x2, ((0, n_pad), (0, 0), (0, 0)))
    Np = N + n_pad

    out = pl.pallas_call(
        _convnet_kernel,
        out_shape=jax.ShapeDtypeStruct((Np, 128), jnp.float32),
        grid=(Np // _B,),
        in_specs=[
            pl.BlockSpec((_B, 32, 96), lambda n: (n, 0, 0)),   # per-step samples
            _whole((640, 256)), _whole((1, 256)),              # conv1 W / b
            _whole((640, 256)), _whole((1, 256)),              # conv2 W / b
            _whole((640, 128)), _whole((1, 128)),              # fc1  W / b
            _whole((128, 128)), _whole((1, 128)),              # fc2  W / b
            _whole((128, 128)), _whole((1, 128)),              # fc3  W / b
        ],
        out_specs=pl.BlockSpec((_B, 128), lambda n: (n, 0)),
        scratch_shapes=[
            pltpu.VMEM((_B, 32, 640), _OPD),           # conv1 im2row slab
            pltpu.VMEM((_B * 32, 128), jnp.float32),   # conv1 out, W-pooled
            pltpu.VMEM((_B, 16, 640), _OPD),           # conv2 im2row slab
            pltpu.VMEM((_B * 16, 128), jnp.float32),   # conv2 out, W-pooled
            pltpu.VMEM((_B, 640), _OPD),               # fc1 flattened features
        ],
        compiler_params=pltpu.CompilerParams(
            dimension_semantics=("parallel",)),
    )(x2, packed["W1"], packed["b1"], packed["W2"], packed["b2"],
      packed["Wf1"], packed["bf1"], packed["Wf2"], packed["bf2"],
      packed["Wf3"], packed["bf3"])
    return out[:N, 0:10]


# ----------------------------------------------------------------------------
# Parameters (PyTorch-style init) and one-time host-side repacking
# ----------------------------------------------------------------------------
def init_params(key):
    def uni(k, shape, fan_in):
        bound = 1.0 / jnp.sqrt(fan_in)
        return jax.random.uniform(k, shape, jnp.float32, -bound, bound)

    ks = jax.random.split(key, 10)
    return {
        "conv1_w": uni(ks[0], (6, 3, 5, 5), 3 * 5 * 5),
        "conv1_b": uni(ks[1], (6,), 3 * 5 * 5),
        "conv2_w": uni(ks[2], (16, 6, 5, 5), 6 * 5 * 5),
        "conv2_b": uni(ks[3], (16,), 6 * 5 * 5),
        "fc1_w": uni(ks[4], (100, 400), 400),
        "fc1_b": uni(ks[5], (100,), 400),
        # TODO(synk): reference declares fc2 = nn.Linear(120, 84), which is
        # incompatible with fc1's 100-dim output (PyTorch forward would raise);
        # fc2 input is set to 100 to keep the forward runnable.
        "fc2_w": uni(ks[6], (84, 100), 100),
        "fc2_b": uni(ks[7], (84,), 100),
        "fc3_w": uni(ks[8], (10, 84), 84),
        "fc3_b": uni(ks[9], (10,), 84),
    }


def pack_params(params, operand_dtype=_OPD):
    """Repack PyTorch-layout weights into K-merged banded / lane-padded layouts."""
    w1 = np.asarray(params["conv1_w"], np.float32)   # (6, 3, 5, 5)
    b1 = np.asarray(params["conv1_b"], np.float32)
    w2 = np.asarray(params["conv2_w"], np.float32)   # (16, 6, 5, 5)
    b2 = np.asarray(params["conv2_b"], np.float32)
    f1w = np.asarray(params["fc1_w"], np.float32)    # (100, 400)
    f1b = np.asarray(params["fc1_b"], np.float32)
    f2w = np.asarray(params["fc2_w"], np.float32)    # (84, 100)
    f2b = np.asarray(params["fc2_b"], np.float32)
    f3w = np.asarray(params["fc3_w"], np.float32)    # (10, 84)
    f3b = np.asarray(params["fc3_b"], np.float32)

    # conv1: tap dh occupies K rows [dh*128, dh*128+96); input lane = w*3+cin.
    # Output column m = (wo%2)*128 + (wo//2)*6 + cout so 2x2 max-pool is
    # max(cols[0:128], cols[128:256]) followed by a stride-2 row max.
    W1 = np.zeros((5 * 128, 256), np.float32)
    for dh in range(5):
        for dw in range(5):
            for wo in range(28):
                j = dh * 128 + (wo + dw) * 3
                m = (wo % 2) * 128 + (wo // 2) * 6
                W1[j:j + 3, m:m + 6] = w1[:, :, dh, dw].T      # (cin, cout)
    b1r = np.zeros((1, 256), np.float32)
    for wo in range(28):
        m = (wo % 2) * 128 + (wo // 2) * 6
        b1r[0, m:m + 6] = b1
    # NOTE: padded output lanes keep zero bias so ReLU/pool keep them at 0.

    # conv2: input lane = wp*6 + cin (== pool1 layout); same K-merge/ordering.
    W2 = np.zeros((5 * 128, 256), np.float32)
    for dh in range(5):
        for dw in range(5):
            for wo in range(10):
                j = dh * 128 + (wo + dw) * 6
                m = (wo % 2) * 128 + (wo // 2) * 16
                W2[j:j + 6, m:m + 16] = w2[:, :, dh, dw].T
    b2r = np.zeros((1, 256), np.float32)
    for wo in range(10):
        m = (wo % 2) * 128 + (wo // 2) * 16
        b2r[0, m:m + 16] = b2

    # fc1: kernel feature index = hp*128 + wp*16 + c; PyTorch flattens (c,hp,wp).
    Wf1 = np.zeros((5 * 128, 128), np.float32)
    for hp in range(5):
        for wp in range(5):
            for c in range(16):
                Wf1[hp * 128 + wp * 16 + c, :100] = f1w[:, c * 25 + hp * 5 + wp]
    bf1 = np.zeros((1, 128), np.float32)
    bf1[0, :100] = f1b

    Wf2 = np.zeros((128, 128), np.float32)
    Wf2[:100, :84] = f2w.T
    bf2 = np.zeros((1, 128), np.float32)
    bf2[0, :84] = f2b

    Wf3 = np.zeros((128, 128), np.float32)
    Wf3[:84, :10] = f3w.T
    bf3 = np.zeros((1, 128), np.float32)
    bf3[0, :10] = f3b

    weights = dict(W1=W1, W2=W2, Wf1=Wf1, Wf2=Wf2, Wf3=Wf3)
    biases = dict(b1=b1r, b2=b2r, bf1=bf1, bf2=bf2, bf3=bf3)
    packed = {k: jnp.asarray(v, operand_dtype) for k, v in weights.items()}
    packed.update({k: jnp.asarray(v, jnp.float32) for k, v in biases.items()})
    return packed


if __name__ == "__main__":
    key = jax.random.PRNGKey(0)
    k_param, k_x = jax.random.split(key)
    params = init_params(k_param)
    packed = pack_params(params)          # one-time host-side weight repack

    # conv1(k5) -> pool -> conv2(k5) -> pool -> 16*5*5 requires 3x32x32 input.
    # N=16 -> two grid steps of 8 samples (keeps both v7x TensorCores busy).
    x = jax.random.normal(k_x, (16, 3, 32, 32), dtype=jnp.float32)

    fwd = jax.jit(convnet_forward)
    out = jax.block_until_ready(fwd(x, packed))

    assert out.shape == (16, 10), out.shape
    assert out.dtype == jnp.float32
    assert bool(jnp.isfinite(out).all())
    print("KERNEL_OK")
</pallas_src>

<mosaic_0001>
module attributes {stable_mosaic.version = 11 : i64} {
  func.func @_convnet_kernel(%arg0: i32, %arg1: memref<8x32x96xbf16, #tpu.memory_space<vmem>>, %arg2: memref<640x256xbf16, #tpu.memory_space<vmem>>, %arg3: memref<1x256xf32, #tpu.memory_space<vmem>>, %arg4: memref<640x256xbf16, #tpu.memory_space<vmem>>, %arg5: memref<1x256xf32, #tpu.memory_space<vmem>>, %arg6: memref<640x128xbf16, #tpu.memory_space<vmem>>, %arg7: memref<1x128xf32, #tpu.memory_space<vmem>>, %arg8: memref<128x128xbf16, #tpu.memory_space<vmem>>, %arg9: memref<1x128xf32, #tpu.memory_space<vmem>>, %arg10: memref<128x128xbf16, #tpu.memory_space<vmem>>, %arg11: memref<1x128xf32, #tpu.memory_space<vmem>>, %arg12: memref<8x128xf32, #tpu.memory_space<vmem>>, %arg13: memref<8x32x640xbf16, #tpu.memory_space<vmem>>, %arg14: memref<256x128xf32, #tpu.memory_space<vmem>>, %arg15: memref<8x16x640xbf16, #tpu.memory_space<vmem>>, %arg16: memref<128x128xf32, #tpu.memory_space<vmem>>, %arg17: memref<8x640xbf16, #tpu.memory_space<vmem>>) attributes {dimension_semantics = [#tpu.dimension_semantics<parallel>], iteration_bounds = array<i64: 2>, scalar_prefetch = 0 : i64, scratch_operands = 5 : i64, tpu.core_type = #tpu.core_type<tc>, window_params = [{transform_indices = @transform_0, window_bounds = array<i64: 8, 32, 96>}, {pipeline_mode = #tpu.pipeline_mode<synchronous>, transform_indices = @transform_1, window_bounds = array<i64: 640, 256>}, {pipeline_mode = #tpu.pipeline_mode<synchronous>, transform_indices = @transform_2, window_bounds = array<i64: 1, 256>}, {pipeline_mode = #tpu.pipeline_mode<synchronous>, transform_indices = @transform_3, window_bounds = array<i64: 640, 256>}, {pipeline_mode = #tpu.pipeline_mode<synchronous>, transform_indices = @transform_4, window_bounds = array<i64: 1, 256>}, {pipeline_mode = #tpu.pipeline_mode<synchronous>, transform_indices = @transform_5, window_bounds = array<i64: 640, 128>}, {pipeline_mode = #tpu.pipeline_mode<synchronous>, transform_indices = @transform_6, window_bounds = array<i64: 1, 128>}, {pipeline_mode = #tpu.pipeline_mode<synchronous>, transform_indices = @transform_7, window_bounds = array<i64: 128, 128>}, {pipeline_mode = #tpu.pipeline_mode<synchronous>, transform_indices = @transform_8, window_bounds = array<i64: 1, 128>}, {pipeline_mode = #tpu.pipeline_mode<synchronous>, transform_indices = @transform_9, window_bounds = array<i64: 128, 128>}, {pipeline_mode = #tpu.pipeline_mode<synchronous>, transform_indices = @transform_10, window_bounds = array<i64: 1, 128>}, {transform_indices = @transform_11, window_bounds = array<i64: 8, 128>}]} {
    %cst = arith.constant 0.000000e+00 : bf16
    %0 = vector.broadcast %cst : bf16 to vector<8x32x32xbf16>
    %c0 = arith.constant 0 : index
    %c0_0 = arith.constant 0 : index
    %c0_1 = arith.constant 0 : index
    %1 = vector.load %arg1[%c0, %c0_0, %c0_1] : memref<8x32x96xbf16, #tpu.memory_space<vmem>>, vector<8x28x96xbf16>
    %c0_2 = arith.constant 0 : index
    %c0_3 = arith.constant 0 : index
    %c0_4 = arith.constant 0 : index
    %2 = vector.load %arg13[%c0_2, %c0_3, %c0_4] : memref<8x32x640xbf16, #tpu.memory_space<vmem>>, vector<8x28x96xbf16>
    tpu.vector_store %arg13[%c0_2, %c0_3, %c0_4], %1 {strides = array<i32>} : memref<8x32x640xbf16, #tpu.memory_space<vmem>>, vector<8x28x96xbf16>,
    %c0_5 = arith.constant 0 : index
    %c0_6 = arith.constant 0 : index
    %c96 = arith.constant 96 : index
    %3 = vector.load %arg13[%c0_5, %c0_6, %c96] : memref<8x32x640xbf16, #tpu.memory_space<vmem>>, vector<8x32x32xbf16>
    tpu.vector_store %arg13[%c0_5, %c0_6, %c96], %0 {strides = array<i32>} : memref<8x32x640xbf16, #tpu.memory_space<vmem>>, vector<8x32x32xbf16>,
    %c0_7 = arith.constant 0 : index
    %c1 = arith.constant 1 : index
    %c0_8 = arith.constant 0 : index
    %4 = vector.load %arg1[%c0_7, %c1, %c0_8] : memref<8x32x96xbf16, #tpu.memory_space<vmem>>, vector<8x28x96xbf16>
    %c0_9 = arith.constant 0 : index
    %c0_10 = arith.constant 0 : index
    %c128 = arith.constant 128 : index
    %5 = vector.load %arg13[%c0_9, %c0_10, %c128] : memref<8x32x640xbf16, #tpu.memory_space<vmem>>, vector<8x28x96xbf16>
    tpu.vector_store %arg13[%c0_9, %c0_10, %c128], %4 {strides = array<i32>} : memref<8x32x640xbf16, #tpu.memory_space<vmem>>, vector<8x28x96xbf16>,
    %c0_11 = arith.constant 0 : index
    %c0_12 = arith.constant 0 : index
    %c224 = arith.constant 224 : index
    %6 = vector.load %arg13[%c0_11, %c0_12, %c224] : memref<8x32x640xbf16, #tpu.memory_space<vmem>>, vector<8x32x32xbf16>
    tpu.vector_store %arg13[%c0_11, %c0_12, %c224], %0 {strides = array<i32>} : memref<8x32x640xbf16, #tpu.memory_space<vmem>>, vector<8x32x32xbf16>,
    %c0_13 = arith.constant 0 : index
    %c2 = arith.constant 2 : index
    %c0_14 = arith.constant 0 : index
    %7 = vector.load %arg1[%c0_13, %c2, %c0_14] : memref<8x32x96xbf16, #tpu.memory_space<vmem>>, vector<8x28x96xbf16>
    %c0_15 = arith.constant 0 : index
    %c0_16 = arith.constant 0 : index
    %c256 = arith.constant 256 : index
    %8 = vector.load %arg13[%c0_15, %c0_16, %c256] : memref<8x32x640xbf16, #tpu.memory_space<vmem>>, vector<8x28x96xbf16>
    tpu.vector_store %arg13[%c0_15, %c0_16, %c256], %7 {strides = array<i32>} : memref<8x32x640xbf16, #tpu.memory_space<vmem>>, vector<8x28x96xbf16>,
    %c0_17 = arith.constant 0 : index
    %c0_18 = arith.constant 0 : index
    %c352 = arith.constant 352 : index
    %9 = vector.load %arg13[%c0_17, %c0_18, %c352] : memref<8x32x640xbf16, #tpu.memory_space<vmem>>, vector<8x32x32xbf16>
    tpu.vector_store %arg13[%c0_17, %c0_18, %c352], %0 {strides = array<i32>} : memref<8x32x640xbf16, #tpu.memory_space<vmem>>, vector<8x32x32xbf16>,
    %c0_19 = arith.constant 0 : index
    %c3 = arith.constant 3 : index
    %c0_20 = arith.constant 0 : index
    %10 = vector.load %arg1[%c0_19, %c3, %c0_20] : memref<8x32x96xbf16, #tpu.memory_space<vmem>>, vector<8x28x96xbf16>
    %c0_21 = arith.constant 0 : index
    %c0_22 = arith.constant 0 : index
    %c384 = arith.constant 384 : index
    %11 = vector.load %arg13[%c0_21, %c0_22, %c384] : memref<8x32x640xbf16, #tpu.memory_space<vmem>>, vector<8x28x96xbf16>
    tpu.vector_store %arg13[%c0_21, %c0_22, %c384], %10 {strides = array<i32>} : memref<8x32x640xbf16, #tpu.memory_space<vmem>>, vector<8x28x96xbf16>,
    %c0_23 = arith.constant 0 : index
    %c0_24 = arith.constant 0 : index
    %c480 = arith.constant 480 : index
    %12 = vector.load %arg13[%c0_23, %c0_24, %c480] : memref<8x32x640xbf16, #tpu.memory_space<vmem>>, vector<8x32x32xbf16>
    tpu.vector_store %arg13[%c0_23, %c0_24, %c480], %0 {strides = array<i32>} : memref<8x32x640xbf16, #tpu.memory_space<vmem>>, vector<8x32x32xbf16>,
    %c0_25 = arith.constant 0 : index
    %c4 = arith.constant 4 : index
    %c0_26 = arith.constant 0 : index
    %13 = vector.load %arg1[%c0_25, %c4, %c0_26] : memref<8x32x96xbf16, #tpu.memory_space<vmem>>, vector<8x28x96xbf16>
    %c0_27 = arith.constant 0 : index
    %c0_28 = arith.constant 0 : index
    %c512 = arith.constant 512 : index
    %14 = vector.load %arg13[%c0_27, %c0_28, %c512] : memref<8x32x640xbf16, #tpu.memory_space<vmem>>, vector<8x28x96xbf16>
    tpu.vector_store %arg13[%c0_27, %c0_28, %c512], %13 {strides = array<i32>} : memref<8x32x640xbf16, #tpu.memory_space<vmem>>, vector<8x28x96xbf16>,
    %c0_29 = arith.constant 0 : index
    %c0_30 = arith.constant 0 : index
    %c608 = arith.constant 608 : index
    %15 = vector.load %arg13[%c0_29, %c0_30, %c608] : memref<8x32x640xbf16, #tpu.memory_space<vmem>>, vector<8x32x32xbf16>
    tpu.vector_store %arg13[%c0_29, %c0_30, %c608], %0 {strides = array<i32>} : memref<8x32x640xbf16, #tpu.memory_space<vmem>>, vector<8x32x32xbf16>,
    %c0_31 = arith.constant 0 : index
    %c0_32 = arith.constant 0 : index
    %c0_33 = arith.constant 0 : index
    %16 = vector.load %arg13[%c0_31, %c0_32, %c0_33] : memref<8x32x640xbf16, #tpu.memory_space<vmem>>, vector<8x32x640xbf16>
    %17 = vector.shape_cast %16 : vector<8x32x640xbf16> to vector<256x640xbf16>
    %c0_34 = arith.constant 0 : index
    %c0_35 = arith.constant 0 : index
    %18 = vector.load %arg2[%c0_34, %c0_35] : memref<640x256xbf16, #tpu.memory_space<vmem>>, vector<640x256xbf16>
    %cst_36 = arith.constant dense<0.000000e+00> : vector<256x256xf32>
    %19 = tpu.matmul %17, %18, %cst_36 {dimension_numbers = #tpu.dot_dimension_numbers<[1], [0], [0], [1], [0, 0, 1, 1], [], []>} : vector<256x640xbf16>, vector<640x256xbf16>, vector<256x256xf32> -> vector<256x256xf32>
    %c0_37 = arith.constant 0 : index
    %c0_38 = arith.constant 0 : index
    %20 = vector.load %arg3[%c0_37, %c0_38] : memref<1x256xf32, #tpu.memory_space<vmem>>, vector<1x256xf32>
    %21 = vector.broadcast %20 : vector<1x256xf32> to vector<256x256xf32>
    %22 = arith.addf %19, %21 : vector<256x256xf32>
    %cst_39 = arith.constant 0.000000e+00 : f32
    %23 = vector.broadcast %cst_39 : f32 to vector<256x256xf32>
    %24 = arith.maximumf %22, %23 : vector<256x256xf32>
    %25 = vector.extract_strided_slice %24 {offsets = [0, 0], sizes = [256, 128], strides = [1, 1]} : vector<256x256xf32> to vector<256x128xf32>
    %26 = vector.extract_strided_slice %24 {offsets = [0, 128], sizes = [256, 128], strides = [1, 1]} : vector<256x256xf32> to vector<256x128xf32>
    %27 = arith.maximumf %25, %26 : vector<256x128xf32>
    %c0_40 = arith.constant 0 : index
    %c0_41 = arith.constant 0 : index
    %28 = vector.load %arg14[%c0_40, %c0_41] : memref<256x128xf32, #tpu.memory_space<vmem>>, vector<256x128xf32>
    tpu.vector_store %arg14[%c0_40, %c0_41], %27 {strides = array<i32>} : memref<256x128xf32, #tpu.memory_space<vmem>>, vector<256x128xf32>,
    %c0_42 = arith.constant 0 : index
    %c0_43 = arith.constant 0 : index
    %29 = tpu.strided_load %arg14[%c0_42, %c0_43] {strides = array<i32: 2, 1>} : memref<256x128xf32, #tpu.memory_space<vmem>>, vector<128x128xf32>
    %c1_44 = arith.constant 1 : index
    %c0_45 = arith.constant 0 : index
    %30 = tpu.strided_load %arg14[%c1_44, %c0_45] {strides = array<i32: 2, 1>} : memref<256x128xf32, #tpu.memory_space<vmem>>, vector<128x128xf32>
    %31 = arith.maximumf %29, %30 : vector<128x128xf32>
    %32 = vector.shape_cast %31 : vector<128x128xf32> to vector<8x16x128xf32>
    %33 = vector.extract_strided_slice %32 {offsets = [0, 0, 0], sizes = [8, 10, 128], strides = [1, 1, 1]} : vector<8x16x128xf32> to vector<8x10x128xf32>
    %34 = arith.truncf %33 : vector<8x10x128xf32> to vector<8x10x128xbf16>
    %c0_46 = arith.constant 0 : index
    %c0_47 = arith.constant 0 : index
    %c0_48 = arith.constant 0 : index
    %35 = vector.load %arg15[%c0_46, %c0_47, %c0_48] : memref<8x16x640xbf16, #tpu.memory_space<vmem>>, vector<8x10x128xbf16>
    tpu.vector_store %arg15[%c0_46, %c0_47, %c0_48], %34 {strides = array<i32>} : memref<8x16x640xbf16, #tpu.memory_space<vmem>>, vector<8x10x128xbf16>,
    %36 = vector.extract_strided_slice %32 {offsets = [0, 1, 0], sizes = [8, 10, 128], strides = [1, 1, 1]} : vector<8x16x128xf32> to vector<8x10x128xf32>
    %37 = arith.truncf %36 : vector<8x10x128xf32> to vector<8x10x128xbf16>
    %c0_49 = arith.constant 0 : index
    %c0_50 = arith.constant 0 : index
    %c128_51 = arith.constant 128 : index
    %38 = vector.load %arg15[%c0_49, %c0_50, %c128_51] : memref<8x16x640xbf16, #tpu.memory_space<vmem>>, vector<8x10x128xbf16>
    tpu.vector_store %arg15[%c0_49, %c0_50, %c128_51], %37 {strides = array<i32>} : memref<8x16x640xbf16, #tpu.memory_space<vmem>>, vector<8x10x128xbf16>,
    %39 = vector.extract_strided_slice %32 {offsets = [0, 2, 0], sizes = [8, 10, 128], strides = [1, 1, 1]} : vector<8x16x128xf32> to vector<8x10x128xf32>
    %40 = arith.truncf %39 : vector<8x10x128xf32> to vector<8x10x128xbf16>
    %c0_52 = arith.constant 0 : index
    %c0_53 = arith.constant 0 : index
    %c256_54 = arith.constant 256 : index
    %41 = vector.load %arg15[%c0_52, %c0_53, %c256_54] : memref<8x16x640xbf16, #tpu.memory_space<vmem>>, vector<8x10x128xbf16>
    tpu.vector_store %arg15[%c0_52, %c0_53, %c256_54], %40 {strides = array<i32>} : memref<8x16x640xbf16, #tpu.memory_space<vmem>>, vector<8x10x128xbf16>,
    %42 = vector.extract_strided_slice %32 {offsets = [0, 3, 0], sizes = [8, 10, 128], strides = [1, 1, 1]} : vector<8x16x128xf32> to vector<8x10x128xf32>
    %43 = arith.truncf %42 : vector<8x10x128xf32> to vector<8x10x128xbf16>
    %c0_55 = arith.constant 0 : index
    %c0_56 = arith.constant 0 : index
    %c384_57 = arith.constant 384 : index
    %44 = vector.load %arg15[%c0_55, %c0_56, %c384_57] : memref<8x16x640xbf16, #tpu.memory_space<vmem>>, vector<8x10x128xbf16>
    tpu.vector_store %arg15[%c0_55, %c0_56, %c384_57], %43 {strides = array<i32>} : memref<8x16x640xbf16, #tpu.memory_space<vmem>>, vector<8x10x128xbf16>,
    %45 = vector.extract_strided_slice %32 {offsets = [0, 4, 0], sizes = [8, 10, 128], strides = [1, 1, 1]} : vector<8x16x128xf32> to vector<8x10x128xf32>
    %46 = arith.truncf %45 : vector<8x10x128xf32> to vector<8x10x128xbf16>
    %c0_58 = arith.constant 0 : index
    %c0_59 = arith.constant 0 : index
    %c512_60 = arith.constant 512 : index
    %47 = vector.load %arg15[%c0_58, %c0_59, %c512_60] : memref<8x16x640xbf16, #tpu.memory_space<vmem>>, vector<8x10x128xbf16>
    tpu.vector_store %arg15[%c0_58, %c0_59, %c512_60], %46 {strides = array<i32>} : memref<8x16x640xbf16, #tpu.memory_space<vmem>>, vector<8x10x128xbf16>,
    %c0_61 = arith.constant 0 : index
    %c0_62 = arith.constant 0 : index
    %c0_63 = arith.constant 0 : index
    %48 = vector.load %arg15[%c0_61, %c0_62, %c0_63] : memref<8x16x640xbf16, #tpu.memory_space<vmem>>, vector<8x16x640xbf16>
    %49 = vector.shape_cast %48 : vector<8x16x640xbf16> to vector<128x640xbf16>
    %c0_64 = arith.constant 0 : index
    %c0_65 = arith.constant 0 : index
    %50 = vector.load %arg4[%c0_64, %c0_65] : memref<640x256xbf16, #tpu.memory_space<vmem>>, vector<640x256xbf16>
    %cst_66 = arith.constant dense<0.000000e+00> : vector<128x256xf32>
    %51 = tpu.matmul %49, %50, %cst_66 {dimension_numbers = #tpu.dot_dimension_numbers<[1], [0], [0], [1], [0, 0, 1, 1], [], []>} : vector<128x640xbf16>, vector<640x256xbf16>, vector<128x256xf32> -> vector<128x256xf32>
    %c0_67 = arith.constant 0 : index
    %c0_68 = arith.constant 0 : index
    %52 = vector.load %arg5[%c0_67, %c0_68] : memref<1x256xf32, #tpu.memory_space<vmem>>, vector<1x256xf32>
    %53 = vector.broadcast %52 : vector<1x256xf32> to vector<128x256xf32>
    %54 = arith.addf %51, %53 : vector<128x256xf32>
    %cst_69 = arith.constant 0.000000e+00 : f32
    %55 = vector.broadcast %cst_69 : f32 to vector<128x256xf32>
    %56 = arith.maximumf %54, %55 : vector<128x256xf32>
    %57 = vector.extract_strided_slice %56 {offsets = [0, 0], sizes = [128, 128], strides = [1, 1]} : vector<128x256xf32> to vector<128x128xf32>
    %58 = vector.extract_strided_slice %56 {offsets = [0, 128], sizes = [128, 128], strides = [1, 1]} : vector<128x256xf32> to vector<128x128xf32>
    %59 = arith.maximumf %57, %58 : vector<128x128xf32>
    %c0_70 = arith.constant 0 : index
    %c0_71 = arith.constant 0 : index
    %60 = vector.load %arg16[%c0_70, %c0_71] : memref<128x128xf32, #tpu.memory_space<vmem>>, vector<128x128xf32>
    tpu.vector_store %arg16[%c0_70, %c0_71], %59 {strides = array<i32>} : memref<128x128xf32, #tpu.memory_space<vmem>>, vector<128x128xf32>,
    %c0_72 = arith.constant 0 : index
    %c0_73 = arith.constant 0 : index
    %61 = tpu.strided_load %arg16[%c0_72, %c0_73] {strides = array<i32: 2, 1>} : memref<128x128xf32, #tpu.memory_space<vmem>>, vector<64x128xf32>
    %c1_74 = arith.constant 1 : index
    %c0_75 = arith.constant 0 : index
    %62 = tpu.strided_load %arg16[%c1_74, %c0_75] {strides = array<i32: 2, 1>} : memref<128x128xf32, #tpu.memory_space<vmem>>, vector<64x128xf32>
    %63 = arith.maximumf %61, %62 : vector<64x128xf32>
    %64 = vector.shape_cast %63 : vector<64x128xf32> to vector<8x8x128xf32>
    %65 = vector.extract_strided_slice %64 {offsets = [0, 0, 0], sizes = [8, 1, 128], strides = [1, 1, 1]} : vector<8x8x128xf32> to vector<8x1x128xf32>
    %66 = vector.shape_cast %65 : vector<8x1x128xf32> to vector<8x128xf32>
    %67 = arith.truncf %66 : vector<8x128xf32> to vector<8x128xbf16>
    %c0_76 = arith.constant 0 : index
    %c0_77 = arith.constant 0 : index
    %68 = vector.load %arg17[%c0_76, %c0_77] : memref<8x640xbf16, #tpu.memory_space<vmem>>, vector<8x128xbf16>
    tpu.vector_store %arg17[%c0_76, %c0_77], %67 {strides = array<i32>} : memref<8x640xbf16, #tpu.memory_space<vmem>>, vector<8x128xbf16>,
    %69 = vector.extract_strided_slice %64 {offsets = [0, 1, 0], sizes = [8, 1, 128], strides = [1, 1, 1]} : vector<8x8x128xf32> to vector<8x1x128xf32>
    %70 = vector.shape_cast %69 : vector<8x1x128xf32> to vector<8x128xf32>
    %71 = arith.truncf %70 : vector<8x128xf32> to vector<8x128xbf16>
    %c0_78 = arith.constant 0 : index
    %c128_79 = arith.constant 128 : index
    %72 = vector.load %arg17[%c0_78, %c128_79] : memref<8x640xbf16, #tpu.memory_space<vmem>>, vector<8x128xbf16>
    tpu.vector_store %arg17[%c0_78, %c128_79], %71 {strides = array<i32>} : memref<8x640xbf16, #tpu.memory_space<vmem>>, vector<8x128xbf16>,
    %73 = vector.extract_strided_slice %64 {offsets = [0, 2, 0], sizes = [8, 1, 128], strides = [1, 1, 1]} : vector<8x8x128xf32> to vector<8x1x128xf32>
    %74 = vector.shape_cast %73 : vector<8x1x128xf32> to vector<8x128xf32>
    %75 = arith.truncf %74 : vector<8x128xf32> to vector<8x128xbf16>
    %c0_80 = arith.constant 0 : index
    %c256_81 = arith.constant 256 : index
    %76 = vector.load %arg17[%c0_80, %c256_81] : memref<8x640xbf16, #tpu.memory_space<vmem>>, vector<8x128xbf16>
    tpu.vector_store %arg17[%c0_80, %c256_81], %75 {strides = array<i32>} : memref<8x640xbf16, #tpu.memory_space<vmem>>, vector<8x128xbf16>,
    %77 = vector.extract_strided_slice %64 {offsets = [0, 3, 0], sizes = [8, 1, 128], strides = [1, 1, 1]} : vector<8x8x128xf32> to vector<8x1x128xf32>
    %78 = vector.shape_cast %77 : vector<8x1x128xf32> to vector<8x128xf32>
    %79 = arith.truncf %78 : vector<8x128xf32> to vector<8x128xbf16>
    %c0_82 = arith.constant 0 : index
    %c384_83 = arith.constant 384 : index
    %80 = vector.load %arg17[%c0_82, %c384_83] : memref<8x640xbf16, #tpu.memory_space<vmem>>, vector<8x128xbf16>
    tpu.vector_store %arg17[%c0_82, %c384_83], %79 {strides = array<i32>} : memref<8x640xbf16, #tpu.memory_space<vmem>>, vector<8x128xbf16>,
    %81 = vector.extract_strided_slice %64 {offsets = [0, 4, 0], sizes = [8, 1, 128], strides = [1, 1, 1]} : vector<8x8x128xf32> to vector<8x1x128xf32>
    %82 = vector.shape_cast %81 : vector<8x1x128xf32> to vector<8x128xf32>
    %83 = arith.truncf %82 : vector<8x128xf32> to vector<8x128xbf16>
    %c0_84 = arith.constant 0 : index
    %c512_85 = arith.constant 512 : index
    %84 = vector.load %arg17[%c0_84, %c512_85] : memref<8x640xbf16, #tpu.memory_space<vmem>>, vector<8x128xbf16>
    tpu.vector_store %arg17[%c0_84, %c512_85], %83 {strides = array<i32>} : memref<8x640xbf16, #tpu.memory_space<vmem>>, vector<8x128xbf16>,
    %c0_86 = arith.constant 0 : index
    %c0_87 = arith.constant 0 : index
    %85 = vector.load %arg17[%c0_86, %c0_87] : memref<8x640xbf16, #tpu.memory_space<vmem>>, vector<8x640xbf16>
    %c0_88 = arith.constant 0 : index
    %c0_89 = arith.constant 0 : index
    %86 = vector.load %arg6[%c0_88, %c0_89] : memref<640x128xbf16, #tpu.memory_space<vmem>>, vector<640x128xbf16>
    %cst_90 = arith.constant dense<0.000000e+00> : vector<8x128xf32>
    %87 = tpu.matmul %85, %86, %cst_90 {dimension_numbers = #tpu.dot_dimension_numbers<[1], [0], [0], [1], [0, 0, 1, 1], [], []>} : vector<8x640xbf16>, vector<640x128xbf16>, vector<8x128xf32> -> vector<8x128xf32>
    %c0_91 = arith.constant 0 : index
    %c0_92 = arith.constant 0 : index
    %88 = vector.load %arg7[%c0_91, %c0_92] : memref<1x128xf32, #tpu.memory_space<vmem>>, vector<1x128xf32>
    %89 = vector.broadcast %88 : vector<1x128xf32> to vector<8x128xf32>
    %90 = arith.addf %87, %89 : vector<8x128xf32>
    %cst_93 = arith.constant 0.000000e+00 : f32
    %91 = vector.broadcast %cst_93 : f32 to vector<8x128xf32>
    %92 = arith.maximumf %90, %91 : vector<8x128xf32>
    %93 = arith.truncf %92 : vector<8x128xf32> to vector<8x128xbf16>
    %c0_94 = arith.constant 0 : index
    %c0_95 = arith.constant 0 : index
    %94 = vector.load %arg8[%c0_94, %c0_95] : memref<128x128xbf16, #tpu.memory_space<vmem>>, vector<128x128xbf16>
    %cst_96 = arith.constant dense<0.000000e+00> : vector<8x128xf32>
    %95 = tpu.matmul %93, %94, %cst_96 {dimension_numbers = #tpu.dot_dimension_numbers<[1], [0], [0], [1], [0, 0, 1, 1], [], []>} : vector<8x128xbf16>, vector<128x128xbf16>, vector<8x128xf32> -> vector<8x128xf32>
    %c0_97 = arith.constant 0 : index
    %c0_98 = arith.constant 0 : index
    %96 = vector.load %arg9[%c0_97, %c0_98] : memref<1x128xf32, #tpu.memory_space<vmem>>, vector<1x128xf32>
    %97 = vector.broadcast %96 : vector<1x128xf32> to vector<8x128xf32>
    %98 = arith.addf %95, %97 : vector<8x128xf32>
    %cst_99 = arith.constant 0.000000e+00 : f32
    %99 = vector.broadcast %cst_99 : f32 to vector<8x128xf32>
    %100 = arith.maximumf %98, %99 : vector<8x128xf32>
    %101 = arith.truncf %100 : vector<8x128xf32> to vector<8x128xbf16>
    %c0_100 = arith.constant 0 : index
    %c0_101 = arith.constant 0 : index
    %102 = vector.load %arg10[%c0_100, %c0_101] : memref<128x128xbf16, #tpu.memory_space<vmem>>, vector<128x128xbf16>
    %cst_102 = arith.constant dense<0.000000e+00> : vector<8x128xf32>
    %103 = tpu.matmul %101, %102, %cst_102 {dimension_numbers = #tpu.dot_dimension_numbers<[1], [0], [0], [1], [0, 0, 1, 1], [], []>} : vector<8x128xbf16>, vector<128x128xbf16>, vector<8x128xf32> -> vector<8x128xf32>
    %c0_103 = arith.constant 0 : index
    %c0_104 = arith.constant 0 : index
    %104 = vector.load %arg11[%c0_103, %c0_104] : memref<1x128xf32, #tpu.memory_space<vmem>>, vector<1x128xf32>
    %105 = vector.broadcast %104 : vector<1x128xf32> to vector<8x128xf32>
    %106 = arith.addf %103, %105 : vector<8x128xf32>
    %c0_105 = arith.constant 0 : index
    %c0_106 = arith.constant 0 : index
    %107 = vector.load %arg12[%c0_105, %c0_106] : memref<8x128xf32, #tpu.memory_space<vmem>>, vector<8x128xf32>
    tpu.vector_store %arg12[%c0_105, %c0_106], %106 {strides = array<i32>} : memref<8x128xf32, #tpu.memory_space<vmem>>, vector<8x128xf32>,
    return
  }
  func.func @transform_0(%arg0: i32) -> (i32, i32, i32) {
    %c0_i32 = arith.constant 0 : i32
    %c0_i32_0 = arith.constant 0 : i32
    %c0_i32_1 = arith.constant 0 : i32
    return %arg0, %c0_i32, %c0_i32_0 : i32, i32, i32
  }
  func.func @transform_1(%arg0: i32) -> (i32, i32) {
    %c0_i32 = arith.constant 0 : i32
    %c0_i32_0 = arith.constant 0 : i32
    %c0_i32_1 = arith.constant 0 : i32
    return %c0_i32, %c0_i32_0 : i32, i32
  }
  func.func @transform_2(%arg0: i32) -> (i32, i32) {
    %c0_i32 = arith.constant 0 : i32
    %c0_i32_0 = arith.constant 0 : i32
    %c0_i32_1 = arith.constant 0 : i32
    return %c0_i32, %c0_i32_0 : i32, i32
  }
  func.func @transform_3(%arg0: i32) -> (i32, i32) {
    %c0_i32 = arith.constant 0 : i32
    %c0_i32_0 = arith.constant 0 : i32
    %c0_i32_1 = arith.constant 0 : i32
    return %c0_i32, %c0_i32_0 : i32, i32
  }
  func.func @transform_4(%arg0: i32) -> (i32, i32) {
    %c0_i32 = arith.constant 0 : i32
    %c0_i32_0 = arith.constant 0 : i32
    %c0_i32_1 = arith.constant 0 : i32
    return %c0_i32, %c0_i32_0 : i32, i32
  }
  func.func @transform_5(%arg0: i32) -> (i32, i32) {
    %c0_i32 = arith.constant 0 : i32
    %c0_i32_0 = arith.constant 0 : i32
    %c0_i32_1 = arith.constant 0 : i32
    return %c0_i32, %c0_i32_0 : i32, i32
  }
  func.func @transform_6(%arg0: i32) -> (i32, i32) {
    %c0_i32 = arith.constant 0 : i32
    %c0_i32_0 = arith.constant 0 : i32
    %c0_i32_1 = arith.constant 0 : i32
    return %c0_i32, %c0_i32_0 : i32, i32
  }
  func.func @transform_7(%arg0: i32) -> (i32, i32) {
    %c0_i32 = arith.constant 0 : i32
    %c0_i32_0 = arith.constant 0 : i32
    %c0_i32_1 = arith.constant 0 : i32
    return %c0_i32, %c0_i32_0 : i32, i32
  }
  func.func @transform_8(%arg0: i32) -> (i32, i32) {
    %c0_i32 = arith.constant 0 : i32
    %c0_i32_0 = arith.constant 0 : i32
    %c0_i32_1 = arith.constant 0 : i32
    return %c0_i32, %c0_i32_0 : i32, i32
  }
  func.func @transform_9(%arg0: i32) -> (i32, i32) {
    %c0_i32 = arith.constant 0 : i32
    %c0_i32_0 = arith.constant 0 : i32
    %c0_i32_1 = arith.constant 0 : i32
    return %c0_i32, %c0_i32_0 : i32, i32
  }
  func.func @transform_10(%arg0: i32) -> (i32, i32) {
    %c0_i32 = arith.constant 0 : i32
    %c0_i32_0 = arith.constant 0 : i32
    %c0_i32_1 = arith.constant 0 : i32
    return %c0_i32, %c0_i32_0 : i32, i32
  }
  func.func @transform_11(%arg0: i32) -> (i32, i32) {
    %c0_i32 = arith.constant 0 : i32
    %c0_i32_0 = arith.constant 0 : i32
    return %arg0, %c0_i32 : i32, i32
  }
}

</mosaic_0001>

<bundles_post_ra>
// kernel: convnet_forward.1
= control target key start
LH: loop header
LB: loop body
LE: loop exit
PB: predicated region body
PF: predicated region fallthrough
CT: control target
= control target key end

     0   :  { %16 = vsyncpa [#allocation8], 0  ;;  %s7542_s0 = inlined_call_operand.vmem [shape: bf16[16,32,96], index: 0, kind: input, shape index: {}]   ;;  %s7543_s1 = inlined_call_operand.vmem [shape: bf16[640,256], index: 1, kind: input, shape index: {}]   ;;  %s7544_s2 = inlined_call_operand.vmem [shape: f32[1,256], index: 2, kind: input, shape index: {}]   ;;  %s7545_s3 = inlined_call_operand.vmem [shape: bf16[640,256], index: 3, kind: input, shape index: {}]   ;;  %s7546_s4 = inlined_call_operand.vmem [shape: f32[1,256], index: 4, kind: input, shape index: {}]   ;;  %s7547_s5 = inlined_call_operand.vmem [shape: bf16[640,128], index: 5, kind: input, shape index: {}]   ;;  %s7548_s6 = inlined_call_operand.vmem [shape: f32[1,128], index: 6, kind: input, shape index: {}]   ;;  %s7549_s7 = inlined_call_operand.vmem [shape: bf16[128,128], index: 7, kind: input, shape index: {}]   ;;  %s7550_s8 = inlined_call_operand.vmem [shape: f32[1,128], index: 8, kind: input, shape index: {}]   ;;  %s7551_s9 = inlined_call_operand.vmem [shape: bf16[128,128], index: 9, kind: input, shape index: {}]   ;;  %s7552_s10 = inlined_call_operand.vmem [shape: f32[1,128], index: 10, kind: input, shape index: {}]   ;;  %s7553_s11 = inlined_call_operand.hbm [shape: f32[16,128], index: 11, kind: output, shape index: {}]  }
   0x1   :  { %18 = vsyncpa [#allocation8 + $0x1], 0  ;;  %s6221_s17 = smov 0   ;;  %s6223_s18 = smov 0  }
   0x2   :  { %s6225_s19 = smov 0   ;;  %s6227_s20 = smov 0  }
   0x3 LB: > { %s6242_s21 = sadd.s32 4294967295, %s6155_s20   ;;  %s4918_s22 = sadd.s32 4294967294, %s6155_s20   ;;  %s6155_s20 = sphi %s6227_s20, %s7561_s20   ;;  %s6151_s19 = sphi %s6225_s19, %s7560_s19   ;;  %s6147_s18 = sphi %s6223_s18, %s7559_s18   ;;  %s6143_s17 = sphi %s6221_s17, %s7558_s17  }
   0x4   : > { %s6246_s23 = sadd.s32 1, %s6155_s20   ;;  %s267_s24 = sadd.s32 1, %s6151_s19 }
   0x5   : > { %s264_s25 = ssub.s32 %s6155_s20, %s6246_s23  ;;  %p277_p0 = scmp.ne.s32.totalorder %s6151_s19, %s6147_s18 }
   0x6   : > { %p265_p1 = scmp.eq.s32.totalorder %s264_s25, 0  ;;  %p278_p2 = scmp.eq.s32.totalorder %s6242_s21, 1 }
   0x7   : > { %p283_p3 = scmp.ne.s32.totalorder %s6147_s18, %s6143_s17  ;;  %p284_p4 = scmp.eq.s32.totalorder %s4918_s22, 1 }
   0x8   : > { %s6257_s26 = scalar_select %p265_p1, %s6151_s19, %s267_s24  }
   0x9   : > { %p6259_p5 = por %p278_p2, %p277_p0  ;;  %p6263_p6 = por %p284_p4, %p283_p3 }
   0xa   : > { %7554 = sst [smem:[#allocation10_spill]] %s6257_s26  ;;  %p4921_p7 = scmp.ge.s32.totalorder %s6155_s20, 1 }
   0xb   : > { %p342_p8 = scmp.lt.s32.totalorder %s6155_s20, 3 }
   0xd   : > { %p343_p9 = pnand %p4921_p7, %p342_p8 }
   0xe   : > { %v5712_v0 = vld [vmem:[%s7543_s1 + $0x4] ss:$8 sps:$4 sm:$0xff] (!%p343_p9)   ;;  %v5714_v1 = vld [vmem:[%s7543_s1] ss:$8 sps:$4 sm:$0xff] (!%p343_p9)   ;;  %v5715_v2 = vld [vmem:[%s7543_s1 + $0x14] ss:$8 sps:$4 sm:$0xff] (!%p343_p9)  }
   0xf   : > { %346 = sbr.rel (%p343_p9) target bundleno = 1810 (0x712), region = 64  ;;  %2074 = vmatprep.subr.bf16.mxu0 (!%p343_p9), %v5712_v0  ;;  %v5717_v3 = vld [vmem:[%s7543_s1 + $0x10] ss:$8 sps:$4 sm:$0xff] (!%p343_p9)   ;;  %v5718_v4 = vld [vmem:[%s7543_s1 + $0x24] ss:$8 sps:$4 sm:$0xff] (!%p343_p9)   ;;  %s4923_s29 = sshll.u32 (!%p343_p9), %s6242_s21, 3 }
  0x10   : > { %2075 = vmatpush1.bf16.msra.mxu0 (!%p343_p9), %v5714_v1  ;;  %v5720_v5 = vld [vmem:[%s7543_s1 + $0x20] ss:$8 sps:$4 sm:$0xff] (!%p343_p9)   ;;  %v5721_v6 = vld [vmem:[%s7543_s1 + $0x34] ss:$8 sps:$4 sm:$0xff] (!%p343_p9)   ;;  %p384_p10 = scmp.lt.s32.totalorder (!%p343_p9), %s4923_s29, 15  ;;  %vm519_vm0 = vcmask (!%p343_p9), 785408  }
  0x11   : > { %2076 = vmatprep.subr.bf16.mxu0 (!%p343_p9), %v5715_v2  ;;  %v5723_v7 = vld [vmem:[%s7543_s1 + $0x30] ss:$8 sps:$4 sm:$0xff] (!%p343_p9)   ;;  %v5724_v8 = vld [vmem:[%s7543_s1 + $0x44] ss:$8 sps:$4 sm:$0xff] (!%p343_p9)   ;;  %v5726_v9 = vld [vmem:[%s7543_s1 + $0x40] ss:$8 sps:$4 sm:$0xff] (!%p343_p9)  }
  0x12   : > { %v5727_v10 = vld [vmem:[%s7543_s1 + $0x54] ss:$8 sps:$4 sm:$0xff] (!%p343_p9)   ;;  %v5729_v11 = vld [vmem:[%s7543_s1 + $0x50] ss:$8 sps:$4 sm:$0xff] (!%p343_p9)   ;;  %v5730_v12 = vld [vmem:[%s7543_s1 + $0x64] ss:$8 sps:$4 sm:$0xff] (!%p343_p9)  }
  0x13   : > { %v5732_v13 = vld [vmem:[%s7543_s1 + $0x60] ss:$8 sps:$4 sm:$0xff] (!%p343_p9)   ;;  %v5733_v14 = vld [vmem:[%s7543_s1 + $0x74] ss:$8 sps:$4 sm:$0xff] (!%p343_p9)   ;;  %vm537_vm1 = vcmask (!%p343_p9), 1048320   ;;  %vm521_vm3 = vcmask (!%p343_p9), 783360  }
  0x14   : > { %2077 = vmatpush1.bf16.msra.mxu0 (!%p343_p9), %v5717_v3  ;;  %vm666_vm2 = vsmask.f32 (!%p343_p9), 7424  ;;  %v5735_v23 = vld [vmem:[%s7543_s1 + $0x70] ss:$8 sps:$4 sm:$0xff] (!%p343_p9)   ;;  %v6157_v25 = vmov (!%p343_p9), 0   ;;  %vm947_vm5 = vcmask (!%p343_p9), 1046528  }
  0x15   : > { %2078 = vmatprep.subr.bf16.mxu0 (!%p343_p9), %v5718_v4  ;;  %v5736_v27 = vld [vmem:[%s7543_s1 + $0x84] ss:$8 sps:$4 sm:$0xff] (!%p343_p9)   ;;  %v5738_v29 = vld [vmem:[%s7543_s1 + $0x80] ss:$8 sps:$4 sm:$0xff] (!%p343_p9)   ;;  %v5739_v37 = vld [vmem:[%s7543_s1 + $0x94] ss:$8 sps:$4 sm:$0xff] (!%p343_p9)  }
  0x16   : > { %s7563_s29 = smov (!%p384_p10, %s4923_s29), 15  ;;  %v5741_v43 = vld [vmem:[%s7543_s1 + $0x90] ss:$8 sps:$4 sm:$0xff]   ;;  %v5742_v44 = vld [vmem:[%s7543_s1 + $0xa4] ss:$8 sps:$4 sm:$0xff]   ;;  %vm1429_vm6 = vcmask 1045504  }
  0x17   : > { %s5242_s14 = sshll.u32 %s7563_s29, 4  ;;  %v5744_v47 = vld [vmem:[%s7543_s1 + $0xa0] ss:$8 sps:$4 sm:$0xff]   ;;  %v5745_v56 = vld [vmem:[%s7543_s1 + $0xb4] ss:$8 sps:$4 sm:$0xff]   ;;  %vm4059_vm7 = vcmask 1041409  }
  0x18   : > { %2079 = vmatpush1.bf16.msra.mxu0 %v5720_v5  ;;  %s6309_s24 = scalar_lea.vmem %s7542_s0, %s5242_s14  ;;  %v5747_v61 = vld [vmem:[%s7543_s1 + $0xb0] ss:$8 sps:$4 sm:$0xff]   ;;  %v5748_v0 = vld [vmem:[%s7543_s1 + $0xc4] ss:$8 sps:$4 sm:$0xff]   ;;  %v5750_v4 = vld [vmem:[%s7543_s1 + $0xc0] ss:$8 sps:$4 sm:$0xff]  }
  0x19   : > { %2080 = vmatprep.subr.bf16.mxu0 %v5721_v6  ;;  %v5760_v15 = vld [vmem:[%s6309_s24] sm:$0xff]   ;;  %v5761_v16 = vld [vmem:[%s6309_s24 + $0x8] sm:$0x7f]   ;;  %v5770_v31 = vld [vmem:[%s6309_s24 + $0x10] sm:$0xff]   ;;  %vm1132_vm4 = vsmask.f32 6400 }
  0x1a   : > { %v668_v17 = vshrl.u32 %v5760_v15, 16  ;;  %v670_v18 = vshll.u32 %v5760_v15, 16  ;;  %v5762_v19 = vld [vmem:[%s6309_s24] sm:$0xff]   ;;  %v675_v20 = vshll.u32 %v5761_v16, 16  ;;  %v679_v21 = vshrl.u32 %v5761_v16, 16  ;;  %v5772_v36 = vld [vmem:[%s6309_s24 + $0x10] sm:$0xff]  }
  0x1b   : > { %520 = vst.msk [vmem:[#allocation2] sm:$0xff] %vm519_vm0, %v5762_v19  ;;  %v5766_v26 = vld [vmem:[%s6309_s24 + $0x8] sm:$0x3f]   ;;  %v5771_v33 = vld [vmem:[%s6309_s24 + $0x18] sm:$0x7f]   ;;  %v683_v34 = vshrl.u32 %v5770_v31, 16 }
  0x1c   : > { %2081 = vmatpush1.bf16.msra.mxu0 %v5723_v7  ;;  %v672_v22 = vrot.slane %v670_v18, 1  ;;  %v677_v24 = vrot.slane %v675_v20, 1  ;;  %538 = vst.msk [vmem:[#allocation2] sm:$0xff] %vm537_vm1, %v6157_v25  ;;  %v685_v35 = vshll.u32 %v5770_v31, 16  ;;  %v690_v38 = vshll.u32 %v5771_v33, 16  ;;  %v5780_v49 = vld [vmem:[%s6309_s24 + $0x20] sm:$0xff]  }
  0x1d   : > { %2082 = vmatprep.subr.bf16.mxu0 %v5724_v8  ;;  %522 = vst.msk [vmem:[#allocation2 + $0x28] sm:$0x3f] %vm521_vm3, %v5766_v26  ;;  %v694_v39 = vshrl.u32 %v5771_v33, 16  ;;  %v5776_v42 = vld [vmem:[%s6309_s24 + $0x18] sm:$0x3f]   ;;  %v5782_v51 = vld [vmem:[%s6309_s24 + $0x20] sm:$0xff]  }
  0x1e   : > { %v673_v28 = vor.u32 %v672_v22, %v668_v17  ;;  %v681_v30 = vor.u32 %v679_v21, %v677_v24  ;;  %539 = vst.msk [vmem:[#allocation2 + $0x28] sm:$0xff] %vm537_vm1, %v6157_v25  ;;  %v687_v40 = vrot.slane %v685_v35, 1  ;;  %v692_v41 = vrot.slane %v690_v38, 1  ;;  %v5781_v50 = vld [vmem:[%s6309_s24 + $0x28] sm:$0x7f]   ;;  %v5790_v2 = vld [vmem:[%s6309_s24 + $0x30] sm:$0xff]  }
  0x1f   : > { %523 = vst.msk [vmem:[#allocation2 + $0x50] sm:$0xff] %vm519_vm0, %v5772_v36  ;;  %v698_v53 = vshrl.u32 %v5780_v49, 16  ;;  %v700_v54 = vshll.u32 %v5780_v49, 16  ;;  %v705_v55 = vshll.u32 %v5781_v50, 16  ;;  %525 = vst.msk [vmem:[#allocation2 + $0xa0] sm:$0xff] %vm519_vm0, %v5782_v51  ;;  %v709_v57 = vshrl.u32 %v5781_v50, 16 }
  0x20   : > { %2083 = vmatpush1.bf16.msra.mxu0 %v5726_v9  ;;  %v678_v32 = vsel %vm666_vm2, %v673_v28, %v677_v24  ;;  %804 = vst.msk [vmem:[#allocation2 + $0x30] sm:$0x3f] %vm521_vm3, %v681_v30  ;;  %v688_v45 = vor.u32 %v687_v40, %v683_v34  ;;  %v696_v46 = vor.u32 %v694_v39, %v692_v41  ;;  %524 = vst.msk [vmem:[#allocation2 + $0x78] sm:$0x3f] %vm521_vm3, %v5776_v42  ;;  %v5786_v60 = vld [vmem:[%s6309_s24 + $0x28] sm:$0x3f]  }
  0x21   : > { %2084 = vmatprep.subr.bf16.mxu0 %v5727_v10  ;;  %803 = vst.msk [vmem:[#allocation2 + $0x8] sm:$0xff] %vm519_vm0, %v678_v32  ;;  %v702_v58 = vrot.slane %v700_v54, 1  ;;  %v707_v59 = vrot.slane %v705_v55, 1  ;;  %v5791_v3 = vld [vmem:[%s6309_s24 + $0x38] sm:$0x7f]   ;;  %v713_v5 = vshrl.u32 %v5790_v2, 16 }
  0x22   : > { %819 = vst.msk [vmem:[#allocation2 + $0x8] sm:$0xff] %vm537_vm1, %v6157_v25  ;;  %820 = vst.msk [vmem:[#allocation2 + $0x30] sm:$0xff] %vm537_vm1, %v6157_v25  ;;  %v693_v48 = vsel %vm666_vm2, %v688_v45, %v692_v41  ;;  %v715_v6 = vshll.u32 %v5790_v2, 16  ;;  %v720_v7 = vshll.u32 %v5791_v3, 16  ;;  %v5792_v8 = vld [vmem:[%s6309_s24 + $0x30] sm:$0xff]   ;;  %v724_v10 = vshrl.u32 %v5791_v3, 16 }
  0x23   : > { %540 = vst.msk [vmem:[#allocation2 + $0x50] sm:$0xff] %vm537_vm1, %v6157_v25  ;;  %541 = vst.msk [vmem:[#allocation2 + $0x78] sm:$0xff] %vm537_vm1, %v6157_v25  ;;  %v703_v62 = vor.u32 %v702_v58, %v698_v53  ;;  %v711_v63 = vor.u32 %v709_v57, %v707_v59  ;;  %v5751_v9 = vld [vmem:[%s7543_s1 + $0xd4] ss:$8 sps:$4 sm:$0xff]   ;;  %v5754_v17 = vld [vmem:[%s7543_s1 + $0xe4] ss:$8 sps:$4 sm:$0xff]  }
  0x24   : > { %2085 = vmatpush1.bf16.msra.mxu0 %v5729_v11  ;;  %805 = vst.msk [vmem:[#allocation2 + $0x58] sm:$0xff] %vm519_vm0, %v693_v48  ;;  %v717_v11 = vrot.slane %v715_v6, 1  ;;  %527 = vst.msk [vmem:[#allocation2 + $0xf0] sm:$0xff] %vm519_vm0, %v5792_v8  ;;  %v5756_v18 = vld [vmem:[%s7543_s1 + $0xe0] ss:$8 sps:$4 sm:$0xff]   ;;  %v5810_v41 = vld [vmem:[%s6309_s24 + $0x50] sm:$0xff]  }
  0x25   : > { %2086 = vmatprep.subr.bf16.mxu0 %v5730_v12  ;;  %806 = vst.msk [vmem:[#allocation2 + $0x80] sm:$0x3f] %vm521_vm3, %v696_v46  ;;  %526 = vst.msk [vmem:[#allocation2 + $0xc8] sm:$0x3f] %vm521_vm3, %v5786_v60  ;;  %v708_v1 = vsel %vm666_vm2, %v703_v62, %v707_v59  ;;  %v722_v12 = vrot.slane %v720_v7, 1  ;;  %v5800_v21 = vld [vmem:[%s6309_s24 + $0x40] sm:$0xff]  }
  0x26   : > { %821 = vst.msk [vmem:[#allocation2 + $0x58] sm:$0xff] %vm537_vm1, %v6157_v25  ;;  %822 = vst.msk [vmem:[#allocation2 + $0x80] sm:$0xff] %vm537_vm1, %v6157_v25  ;;  %v718_v15 = vor.u32 %v717_v11, %v713_v5  ;;  %v5757_v20 = vld [vmem:[%s7543_s1 + $0xf4] ss:$8 sps:$4 sm:$0xff]   ;;  %v5801_v22 = vld [vmem:[%s6309_s24 + $0x48] sm:$0x7f]  }
  0x27   : > { %542 = vst.msk [vmem:[#allocation2 + $0xa0] sm:$0xff] %vm537_vm1, %v6157_v25  ;;  %543 = vst.msk [vmem:[#allocation2 + $0xc8] sm:$0xff] %vm537_vm1, %v6157_v25  ;;  %v726_v16 = vor.u32 %v724_v10, %v722_v12  ;;  %v730_v24 = vshll.u32 %v5800_v21, 16  ;;  %v5802_v26 = vld [vmem:[%s6309_s24 + $0x40] sm:$0xff]   ;;  %v735_v28 = vshll.u32 %v5801_v22, 16  ;;  %v739_v30 = vshrl.u32 %v5801_v22, 16 }
  0x28   : > { %2087 = vmatpush1.bf16.msra.mxu0 %v5732_v13  ;;  %808 = vst.msk [vmem:[#allocation2 + $0xd0] sm:$0x3f] %vm521_vm3, %v711_v63  ;;  %v5796_v13 = vld [vmem:[%s6309_s24 + $0x38] sm:$0x3f]   ;;  %v723_v19 = vsel %vm666_vm2, %v718_v15, %v722_v12  ;;  %v5806_v32 = vld [vmem:[%s6309_s24 + $0x48] sm:$0x3f]  }
  0x29   : > { %2088 = vmatprep.subr.bf16.mxu0 %v5733_v14  ;;  %v1503_v52 = vld [vmem:[#allocation2 + $0x8] sm:$0xff]  ;;  %807 = vst.msk [vmem:[#allocation2 + $0xa8] sm:$0xff] %vm519_vm0, %v708_v1  ;;  %v5753_v14 = vld [vmem:[%s7543_s1 + $0xd0] ss:$8 sps:$4 sm:$0xff]   ;;  %809 = vst.msk [vmem:[#allocation2 + $0xf8] sm:$0xff] %vm519_vm0, %v723_v19  ;;  %v737_v31 = vrot.slane %v735_v28, 1 }
  0x2a   : > { %2106 = vmatprep.mubr.bf16.mxu0 %v1503_v52  ;;  %824 = vst.msk [vmem:[#allocation2 + $0xd0] sm:$0xff] %vm537_vm1, %v6157_v25  ;;  %823 = vst.msk [vmem:[#allocation2 + $0xa8] sm:$0xff] %vm537_vm1, %v6157_v25  ;;  %v5765_v33 = vld [vmem:[%s7543_s1 + $0x104] ss:$8 sps:$4 sm:$0xff]   ;;  %v5763_v36 = vld [vmem:[%s7543_s1 + $0x100] ss:$8 sps:$4 sm:$0xff]  }
  0x2b   : > { %544 = vst.msk [vmem:[#allocation2 + $0xf0] sm:$0xff] %vm537_vm1, %v6157_v25  ;;  %825 = vst.msk [vmem:[#allocation2 + $0xf8] sm:$0xff] %vm537_vm1, %v6157_v25  ;;  %v1502_v35 = vld [vmem:[#allocation2] sm:$0xff]  ;;  %v1508_v38 = vld [vmem:[#allocation2 + $0x30] sm:$0xff]  ;;  %v745_v45 = vshll.u32 %v5810_v41, 16  ;;  %vm4062_vm8 = vcmask 1042434  }
  0x2c   : > { %2089 = vmatpush1.bf16.msra.mxu0 %v5735_v23  ;;  %528 = vst.msk [vmem:[#allocation2 + $0x118] sm:$0x3f] %vm521_vm3, %v5796_v13  ;;  %810 = vst.msk [vmem:[#allocation2 + $0x120] sm:$0x3f] %vm521_vm3, %v726_v16  ;;  %v728_v23 = vshrl.u32 %v5800_v21, 16  ;;  %v1507_v57 = vld [vmem:[#allocation2 + $0x28] sm:$0xff] }
  0x2d   : > { %2090 = vmatprep.subr.bf16.mxu0 %v5736_v27  ;;  %545 = vst.msk [vmem:[#allocation2 + $0x118] sm:$0xff] %vm537_vm1, %v6157_v25  ;;  %826 = vst.msk [vmem:[#allocation2 + $0x120] sm:$0xff] %vm537_vm1, %v6157_v25  ;;  %v5759_v27 = vld [vmem:[%s7543_s1 + $0xf0] ss:$8 sps:$4 sm:$0xff]   ;;  %v5769_v39 = vld [vmem:[%s7543_s1 + $0x114] ss:$8 sps:$4 sm:$0xff]  }
  0x2e   : > { %529 = vst.msk [vmem:[#allocation2 + $0x140] sm:$0xff] %vm519_vm0, %v5802_v26  ;;  %v5811_v42 = vld [vmem:[%s6309_s24 + $0x58] sm:$0x7f]   ;;  %v747_v49 = vrot.slane %v745_v45, 1  ;;  %v5775_v52 = vld [vmem:[%s7543_s1 + $0x124] ss:$8 sps:$4 sm:$0xff]  }
  0x2f   : > { %546 = vst.msk [vmem:[#allocation2 + $0x140] sm:$0xff] %vm537_vm1, %v6157_v25  ;;  %v750_v46 = vshll.u32 %v5811_v42, 16  ;;  %v754_v48 = vshrl.u32 %v5811_v42, 16  ;;  %v5816_v51 = vld [vmem:[%s6309_s24 + $0x58] sm:$0x3f]   ;;  %v5820_v60 = vld [vmem:[%s6309_s24 + $0x60] sm:$0xff]  }
  0x30   : > { %2091 = vmatpush1.bf16.msra.mxu0 %v5738_v29  ;;  %v732_v29 = vrot.slane %v730_v24, 1  ;;  %530 = vst.msk [vmem:[#allocation2 + $0x168] sm:$0x3f] %vm521_vm3, %v5806_v32  ;;  %v5773_v53 = vld [vmem:[%s7543_s1 + $0x120] ss:$8 sps:$4 sm:$0xff]   ;;  %v1513_v58 = vld [vmem:[#allocation2 + $0x58] sm:$0xff] }
  0x31   : > { %2092 = vmatprep.subr.bf16.mxu0 %v5739_v37  ;;  %v741_v37 = vor.u32 %v739_v30, %v737_v31  ;;  %547 = vst.msk [vmem:[#allocation2 + $0x168] sm:$0xff] %vm537_vm1, %v6157_v25  ;;  %v752_v50 = vrot.slane %v750_v46, 1  ;;  %v758_v62 = vshrl.u32 %v5820_v60, 16  ;;  %v760_v63 = vshll.u32 %v5820_v60, 16  ;;  %v5777_v1 = vld [vmem:[%s7543_s1 + $0x130] ss:$8 sps:$4 sm:$0xff]  }
  0x32   : > { %v733_v34 = vor.u32 %v732_v29, %v728_v23  ;;  %532 = vst.msk [vmem:[#allocation2 + $0x1b8] sm:$0x3f] %vm521_vm3, %v5816_v51  ;;  %v5785_v2 = vld [vmem:[%s7543_s1 + $0x144] ss:$8 sps:$4 sm:$0xff]   ;;  %v1512_v8 = vld [vmem:[#allocation2 + $0x50] sm:$0xff]  ;;  %v1517_v28 = vld [vmem:[#allocation2 + $0x78] sm:$0xff] }
  0x33   : > { %812 = vst.msk [vmem:[#allocation2 + $0x170] sm:$0x3f] %vm521_vm3, %v741_v37  ;;  %v756_v55 = vor.u32 %v754_v48, %v752_v50  ;;  %v5826_v7 = vld [vmem:[%s6309_s24 + $0x68] sm:$0x3f]   ;;  %v5789_v12 = vld [vmem:[%s7543_s1 + $0x154] ss:$8 sps:$4 sm:$0xff]  }
  0x34   : > { %2093 = vmatpush1.bf16.msra.mxu0 %v5741_v43  ;;  %v738_v40 = vsel %vm666_vm2, %v733_v34, %v737_v31  ;;  %828 = vst.msk [vmem:[#allocation2 + $0x170] sm:$0xff] %vm537_vm1, %v6157_v25  ;;  %v5812_v43 = vld [vmem:[%s6309_s24 + $0x50] sm:$0xff]   ;;  %549 = vst.msk [vmem:[#allocation2 + $0x1b8] sm:$0xff] %vm537_vm1, %v6157_v25  ;;  %v1518_v15 = vld [vmem:[#allocation2 + $0x80] sm:$0xff]  ;;  %vm4065_vm9 = vcmask 1043459   ;;  %vm4068_vm10 = vcmask 1044484  }
  0x35   : > { %2094 = vmatprep.subr.bf16.mxu0 %v5742_v44  ;;  %811 = vst.msk [vmem:[#allocation2 + $0x148] sm:$0xff] %vm519_vm0, %v738_v40  ;;  %v743_v44 = vshrl.u32 %v5810_v41, 16  ;;  %531 = vst.msk [vmem:[#allocation2 + $0x190] sm:$0xff] %vm519_vm0, %v5812_v43  ;;  %v5831_v16 = vld [vmem:[%s6309_s24 + $0x78] sm:$0x7f]   ;;  %v5832_v19 = vld [vmem:[%s6309_s24 + $0x70] sm:$0xff]  }
  0x36   : > { %827 = vst.msk [vmem:[#allocation2 + $0x148] sm:$0xff] %vm537_vm1, %v6157_v25  ;;  %548 = vst.msk [vmem:[#allocation2 + $0x190] sm:$0xff] %vm537_vm1, %v6157_v25  ;;  %v5795_v21 = vld [vmem:[%s7543_s1 + $0x164] ss:$8 sps:$4 sm:$0xff]   ;;  %v780_v22 = vshll.u32 %v5831_v16, 16  ;;  %v784_v24 = vshrl.u32 %v5831_v16, 16 }
  0x37   : > { %v748_v54 = vor.u32 %v747_v49, %v743_v44  ;;  %814 = vst.msk [vmem:[#allocation2 + $0x1c0] sm:$0x3f] %vm521_vm3, %v756_v55  ;;  %534 = vst.msk [vmem:[#allocation2 + $0x208] sm:$0x3f] %vm521_vm3, %v5826_v7  ;;  %v5793_v29 = vld [vmem:[%s7543_s1 + $0x160] ss:$8 sps:$4 sm:$0xff]  }
  0x38   : > { %2095 = vmatpush1.bf16.msra.mxu0 %v5744_v47  ;;  %v5767_v47 = vld [vmem:[%s7543_s1 + $0x110] ss:$8 sps:$4 sm:$0xff]   ;;  %830 = vst.msk [vmem:[#allocation2 + $0x1c0] sm:$0xff] %vm537_vm1, %v6157_v25  ;;  %551 = vst.msk [vmem:[#allocation2 + $0x208] sm:$0xff] %vm537_vm1, %v6157_v25  ;;  %v782_v26 = vrot.slane %v780_v22, 1  ;;  %vm4071_vm11 = vcmask 1045509  }
  0x39   : > { %2096 = vmatprep.subr.bf16.mxu0 %v5745_v56  ;;  %v5779_v56 = vld [vmem:[%s7543_s1 + $0x134] ss:$8 sps:$4 sm:$0xff]   ;;  %v753_v59 = vsel %vm666_vm2, %v748_v54, %v752_v50  ;;  %535 = vst.msk [vmem:[#allocation2 + $0x230] sm:$0xff] %vm519_vm0, %v5832_v19  ;;  %v5840_v34 = vld [vmem:[%s6309_s24] sm:$0xfe]   ;;  %vm4074_vm12 = vcmask 1046534  }
  0x3a   : > { %813 = vst.msk [vmem:[#allocation2 + $0x198] sm:$0xff] %vm519_vm0, %v753_v59  ;;  %v5799_v31 = vld [vmem:[%s7543_s1 + $0x174] ss:$8 sps:$4 sm:$0xff]   ;;  %v786_v32 = vor.u32 %v784_v24, %v782_v26  ;;  %v5797_v37 = vld [vmem:[%s7543_s1 + $0x170] ss:$8 sps:$4 sm:$0xff]   ;;  %vm4077_vm13 = vcmask 1047559  }
  0x3b   : > { %829 = vst.msk [vmem:[#allocation2 + $0x198] sm:$0xff] %vm537_vm1, %v6157_v25  ;;  %552 = vst.msk [vmem:[#allocation2 + $0x230] sm:$0xff] %vm537_vm1, %v6157_v25  ;;  %v5842_v42 = vld [vmem:[%s6309_s24] sm:$0xfe]   ;;  %v5843_v48 = vld [vmem:[%s6309_s24 + $0x8] sm:$0x7f]  }
  0x3c   : > { %2097 = vmatpush1.bf16.msra.mxu0 %v5747_v61  ;;  %v5821_v61 = vld [vmem:[%s6309_s24 + $0x68] sm:$0x7f]   ;;  %818 = vst.msk [vmem:[#allocation2 + $0x260] sm:$0x3f] %vm521_vm3, %v786_v32  ;;  %v948_v49 = vrot.slane %v5842_v42, 1  ;;  %v949_v54 = vrot.slane %v5843_v48, 1 }
  0x3d   : > { %2098 = vmatprep.subr.bf16.mxu0 %v5748_v0  ;;  %v5822_v0 = vld [vmem:[%s6309_s24 + $0x60] sm:$0xff]   ;;  %v765_v3 = vshll.u32 %v5821_v61, 16  ;;  %v769_v5 = vshrl.u32 %v5821_v61, 16  ;;  %834 = vst.msk [vmem:[#allocation2 + $0x260] sm:$0xff] %vm537_vm1, %v6157_v25  ;;  %v5809_v59 = vld [vmem:[%s7543_s1 + $0x194] ss:$8 sps:$4 sm:$0xff]  }
  0x3e   : > { %533 = vst.msk [vmem:[#allocation2 + $0x1e0] sm:$0xff] %vm519_vm0, %v5822_v0  ;;  %v5803_v50 = vld [vmem:[%s7543_s1 + $0x180] ss:$8 sps:$4 sm:$0xff]   ;;  %v950_v60 = vsel %vm947_vm5, %v948_v49, %v949_v54  ;;  %v5807_v61 = vld [vmem:[%s7543_s1 + $0x190] ss:$8 sps:$4 sm:$0xff]   ;;  %vm6159_vm14 = vmmov 0  }
  0x3f   : > { %v767_v6 = vrot.slane %v765_v3, 1  ;;  %550 = vst.msk [vmem:[#allocation2 + $0x1e0] sm:$0xff] %vm537_vm1, %v6157_v25  ;;  %v5850_v3 = vld [vmem:[%s6309_s24 + $0x18] sm:$0x7f]   ;;  %v5854_v16 = vld [vmem:[%s6309_s24 + $0x20] sm:$0xfe]  }
  0x40   : > { %2099 = vmatpush1.bf16.msra.mxu0 %v5750_v4  ;;  %v762_v4 = vrot.slane %v760_v63, 1  ;;  %989 = vst.msk [vmem:[#allocation2 + $0x38] sm:$0x3f] %vm521_vm3, %v949_v54  ;;  %v1171_v22 = vshll.u32 %v5854_v16, 16  ;;  %v5857_v32 = vld [vmem:[%s6309_s24 + $0x28] sm:$0x7f]  }
  0x41   : > { %2100 = vmatprep.subr.bf16.mxu0 %v5751_v9  ;;  %v5783_v9 = vld [vmem:[%s7543_s1 + $0x140] ss:$8 sps:$4 sm:$0xff]   ;;  %v771_v11 = vor.u32 %v769_v5, %v767_v6  ;;  %988 = vst.msk [vmem:[#allocation2 + $0x10] sm:$0xff] %vm519_vm0, %v950_v60  ;;  %v1532_v42 = vld [vmem:[#allocation2 + $0xf0] sm:$0xff]  ;;  %s380_s25 = sand.u32 1, %s6147_s18   ;;  %s5239_s13 = sshll.u32 %s6242_s21, 7 }
  0x42   : > { %v763_v10 = vor.u32 %v762_v4, %v758_v62  ;;  %1005 = vst.msk [vmem:[#allocation2 + $0x38] sm:$0xff] %vm537_vm1, %v6157_v25  ;;  %1004 = vst.msk [vmem:[#allocation2 + $0x10] sm:$0xff] %vm537_vm1, %v6157_v25  ;;  %v5827_v54 = vld [vmem:[%s7543_s1 + $0x1d0] ss:$8 sps:$4 sm:$0xff]   ;;  %s4922_s30 = sshll.u32 %s380_s25, 3  ;;  %s7500_s16 = scalar_lea.hbm %s7553_s11, %s5239_s13 }
  0x43   : > { %816 = vst.msk [vmem:[#allocation2 + $0x210] sm:$0x3f] %vm521_vm3, %v771_v11  ;;  %v1527_v11 = vld [vmem:[#allocation2 + $0xc8] sm:$0xff]  ;;  %s382_s15 = scalar_lea.vmem [#allocation7], %s4922_s30  ;;  %s4846_s22 = scalar_lea.sflag [#allocation8], %s380_s25 }
  0x44   : > { %2101 = vmatpush1.bf16.msra.mxu0 %v5753_v14  ;;  %v768_v13 = vsel %vm666_vm2, %v763_v10, %v767_v6  ;;  %v5830_v14 = vld [vmem:[%s6309_s24 + $0x70] sm:$0xff]   ;;  %832 = vst.msk [vmem:[#allocation2 + $0x210] sm:$0xff] %vm537_vm1, %v6157_v25  ;;  %v952_v10 = vrot.slane %v5850_v3, 1  ;;  %s6160_s30 = smov [#allocation7]  }
  0x45   : > { %2102 = vmatprep.subr.bf16.mxu0 %v5754_v17  ;;  %815 = vst.msk [vmem:[#allocation2 + $0x1e8] sm:$0xff] %vm519_vm0, %v768_v13  ;;  %v773_v17 = vshrl.u32 %v5830_v14, 16  ;;  %v5839_v3 = vld [vmem:[%s7543_s1 + $0x1f4] ss:$8 sps:$4 sm:$0xff]   ;;  %s6097_s29 = sshll.u32 %s6160_s30, 4  ;;  %s6098_s29 = int_to_ptr.vmem [resolvable:$false] %s6097_s29 }
  0x46   : > { %831 = vst.msk [vmem:[#allocation2 + $0x1e8] sm:$0xff] %vm537_vm1, %v6157_v25  ;;  %s6099_s12 = scalar_lea.vmem %s6098_s29, 256 }
  0x47   : > { %991 = vst.msk [vmem:[#allocation2 + $0x88] sm:$0x3f] %vm521_vm3, %v952_v10 }
  0x48   : > { %2103 = vmatpush1.bf16.msra.mxu0 %v5756_v18  ;;  %v775_v18 = vshll.u32 %v5830_v14, 16  ;;  %v1533_v14 = vld [vmem:[#allocation2 + $0xf8] sm:$0xff]  ;;  %1007 = vst.msk [vmem:[#allocation2 + $0x88] sm:$0xff] %vm537_vm1, %v6157_v25 }
  0x49   : > { %2104 = vmatprep.subr.bf16.mxu0 %v5757_v20  ;;  %v5787_v20 = vld [vmem:[%s7543_s1 + $0x150] ss:$8 sps:$4 sm:$0xff]  }
  0x4a   : > { %v777_v23 = vrot.slane %v775_v18, 1  ;;  %v5813_v18 = vld [vmem:[%s7543_s1 + $0x1a0] ss:$8 sps:$4 sm:$0xff]  }
  0x4c   : > { %2105 = vmatpush1.bf16.msra.mxu0 %v5759_v27  ;;  %v5836_v27 = vld [vmem:[%s6309_s24 + $0x78] sm:$0x3f]   ;;  %v778_v30 = vor.u32 %v777_v23, %v773_v17  ;;  %v5855_v17 = vld [vmem:[%s6309_s24 + $0x28] sm:$0xff]  }
  0x4d   : > { %2267 = vmatprep.subr.bf16.mxu0 %v5765_v33  ;;  %536 = vst.msk [vmem:[#allocation2 + $0x258] sm:$0x3f] %vm521_vm3, %v5836_v27  ;;  %v1176_v23 = vshrl.u32 %v5855_v17, 16  ;;  %v1179_v24 = vshll.u32 %v5855_v17, 16  ;;  %v5871_v17 = vld [vmem:[%s6309_s24 + $0x48] sm:$0x7f]  }
  0x4e   : > { %v783_v33 = vsel %vm666_vm2, %v778_v30, %v782_v26  ;;  %553 = vst.msk [vmem:[#allocation2 + $0x258] sm:$0xff] %vm537_vm1, %v6157_v25  ;;  %v5817_v26 = vld [vmem:[%s7543_s1 + $0x1b0] ss:$8 sps:$4 sm:$0xff]  }
  0x4f   : > { %2107 = vmatmul.mubr.bf16.vlgmr.msra.gmra.mrb[0].mxu0 %v1502_v35  ;;  %v5841_v35 = vld [vmem:[%s6309_s24 + $0x8] sm:$0xff]   ;;  %817 = vst.msk [vmem:[#allocation2 + $0x238] sm:$0xff] %vm519_vm0, %v783_v33  ;;  %v1181_v30 = vrot.slane %v1179_v24, 2  ;;  %v1542_v24 = vld [vmem:[#allocation2 + $0x140] sm:$0xff] }
  0x50   : > { %2268 = vmatpush1.bf16.msra.mxu0 %v5763_v36  ;;  %2116 = vmatprep.mubr.bf16.mxu0 %v1508_v38  ;;  %v1523_v36 = vld [vmem:[#allocation2 + $0xa8] sm:$0xff]  ;;  %833 = vst.msk [vmem:[#allocation2 + $0x238] sm:$0xff] %vm537_vm1, %v6157_v25  ;;  %v1134_v38 = vshrl.u32 %v5840_v34, 16  ;;  %v1142_v40 = vshrl.u32 %v5841_v35, 16  ;;  %v1145_v41 = vshll.u32 %v5841_v35, 16 }
  0x51   : > { %2269 = vmatprep.subr.bf16.mxu0 %v5769_v39  ;;  %v1137_v39 = vshll.u32 %v5840_v34, 16  ;;  %v5825_v33 = vld [vmem:[%s7543_s1 + $0x1c4] ss:$8 sps:$4 sm:$0xff]  }
  0x52   : > { %v1136_v43 = vrot.slane %v1134_v38, 1  ;;  %v1144_v45 = vrot.slane %v1142_v40, 1  ;;  %v1147_v46 = vrot.slane %v1145_v41, 2  ;;  %v5823_v38 = vld [vmem:[%s7543_s1 + $0x1c0] ss:$8 sps:$4 sm:$0xff]  }
  0x53   : > { %v1139_v44 = vrot.slane %v1137_v39, 2  ;;  %v955_v39 = vrot.slane %v5857_v32, 1 }
  0x54   : > { %2270 = vmatpush1.bf16.msra.mxu0 %v5767_v47  ;;  %v5805_v47 = vld [vmem:[%s7543_s1 + $0x184] ss:$8 sps:$4 sm:$0xff]  }
  0x55   : > { %2271 = vmatprep.subr.bf16.mxu0 %v5775_v52  ;;  %v1140_v51 = vor.u32 %v1139_v44, %v1136_v43  ;;  %v1148_v52 = vor.u32 %v1147_v46, %v1144_v45  ;;  %v5829_v43 = vld [vmem:[%s7543_s1 + $0x1d4] ss:$8 sps:$4 sm:$0xff]   ;;  %993 = vst.msk [vmem:[#allocation2 + $0xd8] sm:$0x3f] %vm521_vm3, %v955_v39 }
  0x56   : > { %v5861_v45 = vld [vmem:[%s6309_s24 + $0x30] sm:$0xfe]   ;;  %1009 = vst.msk [vmem:[#allocation2 + $0xd8] sm:$0xff] %vm537_vm1, %v6157_v25 }
  0x57   : > { %2117 = vmatmul.mubr.bf16.gmra.mrb[4].mxu0 %v1507_v57  ;;  %v1149_v55 = vsel %vm1132_vm4, %v1140_v51, %v1148_v52  ;;  %1286 = vst.msk [vmem:[#allocation2 + $0x40] sm:$0x3f] %vm521_vm3, %v1148_v52  ;;  %v5848_v57 = vld [vmem:[%s6309_s24 + $0x18] sm:$0xff]   ;;  %v1185_v49 = vshrl.u32 %v5861_v45, 16  ;;  %v5863_v52 = vld [vmem:[%s6309_s24 + $0x30] sm:$0xfe]  }
  0x58   : > { %2126 = vmatprep.mubr.bf16.mxu0 %v1513_v58  ;;  %2272 = vmatpush1.bf16.msra.mxu0 %v5773_v53  ;;  %v1522_v53 = vld [vmem:[#allocation2 + $0xa0] sm:$0xff]  ;;  %v1528_v58 = vld [vmem:[#allocation2 + $0xd0] sm:$0xff]  ;;  %1285 = vst.msk [vmem:[#allocation2 + $0x18] sm:$0xff] %vm519_vm0, %v1149_v55  ;;  %v1159_v0 = vshrl.u32 %v5848_v57, 16 }
  0x59   : > { %2273 = vmatprep.subr.bf16.mxu0 %v5779_v56  ;;  %v5847_v56 = vld [vmem:[%s6309_s24 + $0x10] sm:$0xfe]   ;;  %1302 = vst.msk [vmem:[#allocation2 + $0x40] sm:$0xff] %vm537_vm1, %v6157_v25  ;;  %1301 = vst.msk [vmem:[#allocation2 + $0x18] sm:$0xff] %vm537_vm1, %v6157_v25  ;;  %v5835_v55 = vld [vmem:[%s7543_s1 + $0x1e4] ss:$8 sps:$4 sm:$0xff]  }
  0x5a   : > { %v1151_v62 = vshrl.u32 %v5847_v56, 16  ;;  %v1154_v63 = vshll.u32 %v5847_v56, 16  ;;  %v1161_v6 = vrot.slane %v1159_v0, 1  ;;  %v1187_v56 = vrot.slane %v1185_v49, 1  ;;  %v5833_v0 = vld [vmem:[%s7543_s1 + $0x1e0] ss:$8 sps:$4 sm:$0xff]  }
  0x5b   : > { %v5883_v49 = vld [vmem:[%s6309_s24 + $0x68] sm:$0xff]  }
  0x5c   : > { %2274 = vmatpush1.bf16.msra.mxu0 %v5777_v1  ;;  %v1162_v1 = vshll.u32 %v5848_v57, 16  ;;  %v1153_v4 = vrot.slane %v1151_v62, 1  ;;  %v1156_v5 = vrot.slane %v1154_v63, 2  ;;  %v5868_v63 = vld [vmem:[%s6309_s24 + $0x40] sm:$0xfe]  }
  0x5d   : > { %2275 = vmatprep.subr.bf16.mxu0 %v5785_v2  ;;  %v5849_v2 = vld [vmem:[%s6309_s24 + $0x10] sm:$0xfe]  }
  0x5e   : > { %v1164_v7 = vrot.slane %v1162_v1, 2 }
  0x5f   : > { %2127 = vmatmul.mubr.bf16.gmra.mrb[8].mxu0 %v1512_v8  ;;  %v5815_v8 = vld [vmem:[%s7543_s1 + $0x1a4] ss:$8 sps:$4 sm:$0xff]  }
  0x60   : > { %2136 = vmatprep.mubr.bf16.mxu0 %v1518_v15  ;;  %2276 = vmatpush1.bf16.msra.mxu0 %v5783_v9  ;;  %v951_v9 = vrot.slane %v5849_v2, 1  ;;  %v1165_v13 = vor.u32 %v1164_v7, %v1161_v6  ;;  %v5869_v2 = vld [vmem:[%s6309_s24 + $0x48] sm:$0xff]   ;;  %v1205_v6 = vshll.u32 %v5868_v63, 16 }
  0x61   : > { %2277 = vmatprep.subr.bf16.mxu0 %v5789_v12  ;;  %v1157_v12 = vor.u32 %v1156_v5, %v1153_v4  ;;  %v1202_v5 = vshrl.u32 %v5868_v63, 16  ;;  %v1543_v7 = vld [vmem:[#allocation2 + $0x148] sm:$0xff] }
  0x62   : > { %v953_v15 = vsel %vm947_vm5, %v951_v9, %v952_v10  ;;  %1288 = vst.msk [vmem:[#allocation2 + $0x90] sm:$0x3f] %vm521_vm3, %v1165_v13  ;;  %v1213_v9 = vshll.u32 %v5869_v2, 16  ;;  %v5837_v10 = vld [vmem:[%s7543_s1 + $0x1f0] ss:$8 sps:$4 sm:$0xff]  }
  0x63   : > { %v1166_v19 = vsel %vm1132_vm4, %v1157_v12, %v1165_v13  ;;  %990 = vst.msk [vmem:[#allocation2 + $0x60] sm:$0xff] %vm519_vm0, %v953_v15  ;;  %v1207_v12 = vrot.slane %v1205_v6, 2  ;;  %v5870_v13 = vld [vmem:[%s6309_s24 + $0x40] sm:$0xfe]   ;;  %v5889_v6 = vld [vmem:[%s6309_s24 + $0x70] sm:$0xfe]  }
  0x64   : > { %2278 = vmatpush1.bf16.msra.mxu0 %v5787_v20  ;;  %v5819_v20 = vld [vmem:[%s7543_s1 + $0x1b4] ss:$8 sps:$4 sm:$0xff]   ;;  %1287 = vst.msk [vmem:[#allocation2 + $0x68] sm:$0xff] %vm519_vm0, %v1166_v19  ;;  %v960_v19 = vrot.slane %v5870_v13, 1 }
  0x65   : > { %2279 = vmatprep.subr.bf16.mxu0 %v5795_v21  ;;  %1006 = vst.msk [vmem:[#allocation2 + $0x60] sm:$0xff] %vm537_vm1, %v6157_v25  ;;  %1304 = vst.msk [vmem:[#allocation2 + $0x90] sm:$0xff] %vm537_vm1, %v6157_v25  ;;  %v1168_v21 = vshrl.u32 %v5854_v16, 16  ;;  %v1215_v16 = vrot.slane %v1213_v9, 2  ;;  %v1253_v9 = vshrl.u32 %v5889_v6, 16 }
  0x66   : > { %1303 = vst.msk [vmem:[#allocation2 + $0x68] sm:$0xff] %vm537_vm1, %v6157_v25 }
  0x67   : > { %2137 = vmatmul.mubr.bf16.gmra.mrb[12].mxu0 %v1517_v28  ;;  %v1170_v27 = vrot.slane %v1168_v21, 1  ;;  %v1173_v28 = vrot.slane %v1171_v22, 2  ;;  %v961_v21 = vrot.slane %v5871_v17, 1  ;;  %v1255_v13 = vrot.slane %v1253_v9, 1  ;;  %v5891_v17 = vld [vmem:[%s6309_s24 + $0x70] sm:$0xfe]  }
  0x68   : > { %2146 = vmatprep.mubr.bf16.mxu0 %v1523_v36  ;;  %2280 = vmatpush1.bf16.msra.mxu0 %v5793_v29  ;;  %v1178_v29 = vrot.slane %v1176_v23, 1  ;;  %v5903_v9 = vld [vmem:[%s6309_s24 + $0x38] sm:$0xff]  }
  0x69   : > { %2281 = vmatprep.subr.bf16.mxu0 %v5799_v31  ;;  %v5856_v31 = vld [vmem:[%s6309_s24 + $0x20] sm:$0xfe]   ;;  %v1174_v34 = vor.u32 %v1173_v28, %v1170_v27  ;;  %v962_v23 = vsel %vm947_vm5, %v960_v19, %v961_v21  ;;  %997 = vst.msk [vmem:[#allocation2 + $0x178] sm:$0x3f] %vm521_vm3, %v961_v21  ;;  %v5876_v27 = vld [vmem:[%s6309_s24 + $0x58] sm:$0xff]   ;;  %v1548_v28 = vld [vmem:[#allocation2 + $0x170] sm:$0xff] }
  0x6a   : > { %v1182_v35 = vor.u32 %v1181_v30, %v1178_v29  ;;  %v954_v36 = vrot.slane %v5856_v31, 1  ;;  %996 = vst.msk [vmem:[#allocation2 + $0x150] sm:$0xff] %vm519_vm0, %v962_v23  ;;  %v1227_v31 = vshrl.u32 %v5876_v27, 16  ;;  %v1230_v32 = vshll.u32 %v5876_v27, 16  ;;  %v1567_v19 = vld [vmem:[#allocation2 + $0x208] sm:$0xff] }
  0x6b   : > { %1013 = vst.msk [vmem:[#allocation2 + $0x178] sm:$0xff] %vm537_vm1, %v6157_v25  ;;  %1012 = vst.msk [vmem:[#allocation2 + $0x150] sm:$0xff] %vm537_vm1, %v6157_v25  ;;  %v969_v23 = vrot.slane %v5891_v17, 1  ;;  %v5904_v17 = vld [vmem:[%s6309_s24 + $0x40] sm:$0xfc]  }
  0x6c   : > { %2282 = vmatpush1.bf16.msra.mxu0 %v5797_v37  ;;  %v5862_v37 = vld [vmem:[%s6309_s24 + $0x38] sm:$0xff]   ;;  %v1183_v40 = vsel %vm1132_vm4, %v1174_v34, %v1182_v35  ;;  %1290 = vst.msk [vmem:[#allocation2 + $0xe0] sm:$0x3f] %vm521_vm3, %v1182_v35  ;;  %v956_v44 = vsel %vm947_vm5, %v954_v36, %v955_v39  ;;  %v1229_v35 = vrot.slane %v1227_v31, 1  ;;  %v1232_v36 = vrot.slane %v1230_v32, 2  ;;  %v5897_v31 = vld [vmem:[%s6309_s24 + $0x8] sm:$0xff]  }
  0x6d   : > { %2283 = vmatprep.subr.bf16.mxu0 %v5805_v47  ;;  %v1193_v41 = vshrl.u32 %v5862_v37, 16  ;;  %1289 = vst.msk [vmem:[#allocation2 + $0xb8] sm:$0xff] %vm519_vm0, %v1183_v40  ;;  %v1196_v46 = vshll.u32 %v5862_v37, 16  ;;  %v1538_v47 = vld [vmem:[#allocation2 + $0x120] sm:$0xff]  ;;  %992 = vst.msk [vmem:[#allocation2 + $0xb0] sm:$0xff] %vm519_vm0, %v956_v44  ;;  %v1553_v44 = vld [vmem:[#allocation2 + $0x198] sm:$0xff] }
  0x6e   : > { %1306 = vst.msk [vmem:[#allocation2 + $0xe0] sm:$0xff] %vm537_vm1, %v6157_v25  ;;  %1305 = vst.msk [vmem:[#allocation2 + $0xb8] sm:$0xff] %vm537_vm1, %v6157_v25  ;;  %v5877_v37 = vld [vmem:[%s6309_s24 + $0x50] sm:$0xfe]   ;;  %v1233_v40 = vor.u32 %v1232_v36, %v1229_v35  ;;  %v1577_v32 = vld [vmem:[#allocation2 + $0x258] sm:$0xff]  ;;  %v1431_v35 = vrot.slane %v5897_v31, 2 }
  0x6f   : > { %2147 = vmatmul.mubr.bf16.gmra.mrb[16].mxu0 %v1522_v53  ;;  %v1195_v48 = vrot.slane %v1193_v41, 1  ;;  %1008 = vst.msk [vmem:[#allocation2 + $0xb0] sm:$0xff] %vm537_vm1, %v6157_v25  ;;  %v1198_v51 = vrot.slane %v1196_v46, 2  ;;  %v5864_v53 = vld [vmem:[%s6309_s24 + $0x38] sm:$0x7f]   ;;  %v963_v41 = vrot.slane %v5877_v37, 1 }
  0x70   : > { %2156 = vmatprep.mubr.bf16.mxu0 %v1528_v58  ;;  %2284 = vmatpush1.bf16.msra.mxu0 %v5803_v50  ;;  %v1188_v50 = vshll.u32 %v5861_v45, 16  ;;  %v958_v60 = vrot.slane %v5864_v53, 1  ;;  %1296 = vst.msk [vmem:[#allocation2 + $0x1d0] sm:$0x3f] %vm521_vm3, %v1233_v40  ;;  %v1244_v53 = vshrl.u32 %v5883_v49, 16  ;;  %v1504_v37 = vld [vmem:[#allocation2 + $0x10] sm:$0xff] }
  0x71   : > { %2285 = vmatprep.subr.bf16.mxu0 %v5809_v59  ;;  %v1199_v58 = vor.u32 %v1198_v51, %v1195_v48  ;;  %v957_v59 = vrot.slane %v5863_v52, 1  ;;  %1312 = vst.msk [vmem:[#allocation2 + $0x1d0] sm:$0xff] %vm537_vm1, %v6157_v25  ;;  %v5882_v48 = vld [vmem:[%s6309_s24 + $0x60] sm:$0xfe]  }
  0x72   : > { %v1190_v57 = vrot.slane %v1188_v50, 2  ;;  %995 = vst.msk [vmem:[#allocation2 + $0x128] sm:$0x3f] %vm521_vm3, %v958_v60  ;;  %v1558_v50 = vld [vmem:[#allocation2 + $0x1c0] sm:$0xff]  ;;  %v1236_v51 = vshrl.u32 %v5882_v48, 16  ;;  %v1239_v52 = vshll.u32 %v5882_v48, 16 }
  0x73   : > { %1292 = vst.msk [vmem:[#allocation2 + $0x130] sm:$0x3f] %vm521_vm3, %v1199_v58  ;;  %v959_v1 = vsel %vm947_vm5, %v957_v59, %v958_v60  ;;  %v5884_v59 = vld [vmem:[%s6309_s24 + $0x60] sm:$0xfe]   ;;  %v5885_v60 = vld [vmem:[%s6309_s24 + $0x68] sm:$0x7f]  }
  0x74   : > { %2286 = vmatpush1.bf16.msra.mxu0 %v5807_v61  ;;  %v1537_v61 = vld [vmem:[#allocation2 + $0x118] sm:$0xff]  ;;  %v1191_v62 = vor.u32 %v1190_v57, %v1187_v56  ;;  %1308 = vst.msk [vmem:[#allocation2 + $0x130] sm:$0xff] %vm537_vm1, %v6157_v25  ;;  %1011 = vst.msk [vmem:[#allocation2 + $0x128] sm:$0xff] %vm537_vm1, %v6157_v25  ;;  %v1241_v56 = vrot.slane %v1239_v52, 2  ;;  %v1246_v57 = vrot.slane %v1244_v53, 1 }
  0x75   : > { %2287 = vmatprep.subr.bf16.mxu0 %v5815_v8  ;;  %994 = vst.msk [vmem:[#allocation2 + $0x100] sm:$0xff] %vm519_vm0, %v959_v1  ;;  %v1210_v8 = vshrl.u32 %v5869_v2, 16  ;;  %v966_v1 = vrot.slane %v5884_v59, 1  ;;  %v967_v2 = vrot.slane %v5885_v60, 1  ;;  %v5867_v48 = vld [vmem:[%s7543_s1 + $0x234] ss:$8 sps:$4 sm:$0xff]  }
  0x76   : > { %v1200_v4 = vsel %vm1132_vm4, %v1191_v62, %v1199_v58  ;;  %1010 = vst.msk [vmem:[#allocation2 + $0x100] sm:$0xff] %vm537_vm1, %v6157_v25  ;;  %v5865_v52 = vld [vmem:[%s7543_s1 + $0x230] ss:$8 sps:$4 sm:$0xff]   ;;  %v5874_v53 = vld [vmem:[%s7543_s1 + $0x244] ss:$8 sps:$4 sm:$0xff]  }
  0x77   : > { %2157 = vmatmul.mubr.bf16.gmra.mrb[20].mxu0 %v1527_v11  ;;  %1291 = vst.msk [vmem:[#allocation2 + $0x108] sm:$0xff] %vm519_vm0, %v1200_v4  ;;  %v1204_v11 = vrot.slane %v1202_v5, 1  ;;  %v1212_v15 = vrot.slane %v1210_v8, 1  ;;  %v968_v4 = vsel %vm947_vm5, %v966_v1, %v967_v2  ;;  %v1562_v5 = vld [vmem:[#allocation2 + $0x1e0] sm:$0xff]  ;;  %v1568_v8 = vld [vmem:[#allocation2 + $0x210] sm:$0xff]  ;;  %v1549_v31 = vld [vmem:[#allocation2 + $0x178] sm:$0xff] }
  0x78   : > { %2166 = vmatprep.mubr.bf16.mxu0 %v1533_v14  ;;  %2288 = vmatpush1.bf16.msra.mxu0 %v5813_v18  ;;  %1307 = vst.msk [vmem:[#allocation2 + $0x108] sm:$0xff] %vm537_vm1, %v6157_v25  ;;  %v5846_v14 = vld [vmem:[%s7543_s1 + $0x204] ss:$8 sps:$4 sm:$0xff]   ;;  %v5895_v1 = vld [vmem:[%s7543_s1 + $0x274] ss:$8 sps:$4 sm:$0xff]  }
  0x79   : > { %2289 = vmatprep.subr.bf16.mxu0 %v5819_v20  ;;  %v1208_v18 = vor.u32 %v1207_v12, %v1204_v11  ;;  %v1216_v20 = vor.u32 %v1215_v16, %v1212_v15  ;;  %1001 = vst.msk [vmem:[#allocation2 + $0x218] sm:$0x3f] %vm521_vm3, %v967_v2  ;;  %1471 = vst.msk [vmem:[#allocation2 + $0x48] sm:$0x3f] %vm521_vm3, %v1431_v35  ;;  %v5888_v59 = vld [vmem:[%s7543_s1 + $0x264] ss:$8 sps:$4 sm:$0xff]  }
  0x7a   : > { %1000 = vst.msk [vmem:[#allocation2 + $0x1f0] sm:$0xff] %vm519_vm0, %v968_v4  ;;  %v5900_v60 = vld [vmem:[%s6309_s24 + $0x20] sm:$0xfc]  }
  0x7b   : > { %v1217_v22 = vsel %vm1132_vm4, %v1208_v18, %v1216_v20  ;;  %1294 = vst.msk [vmem:[#allocation2 + $0x180] sm:$0x3f] %vm521_vm3, %v1216_v20  ;;  %v5892_v18 = vld [vmem:[%s6309_s24 + $0x78] sm:$0x7f]   ;;  %v1436_v2 = vrot.slane %v5900_v60, 2 }
  0x7c   : > { %2290 = vmatpush1.bf16.msra.mxu0 %v5817_v26  ;;  %1293 = vst.msk [vmem:[#allocation2 + $0x158] sm:$0xff] %vm519_vm0, %v1217_v22  ;;  %v5875_v26 = vld [vmem:[%s6309_s24 + $0x50] sm:$0xfe]   ;;  %v1573_v22 = vld [vmem:[#allocation2 + $0x238] sm:$0xff] }
  0x7d   : > { %2291 = vmatprep.subr.bf16.mxu0 %v5825_v33  ;;  %1310 = vst.msk [vmem:[#allocation2 + $0x180] sm:$0xff] %vm537_vm1, %v6157_v25  ;;  %1309 = vst.msk [vmem:[#allocation2 + $0x158] sm:$0xff] %vm537_vm1, %v6157_v25  ;;  %v1219_v29 = vshrl.u32 %v5875_v26, 16  ;;  %v1222_v30 = vshll.u32 %v5875_v26, 16 }
  0x7e   : > { %1017 = vst.msk [vmem:[#allocation2 + $0x218] sm:$0xff] %vm537_vm1, %v6157_v25  ;;  %1016 = vst.msk [vmem:[#allocation2 + $0x1f0] sm:$0xff] %vm537_vm1, %v6157_v25 }
  0x7f   : > { %2167 = vmatmul.mubr.bf16.gmra.mrb[24].mxu0 %v1532_v42  ;;  %v1221_v33 = vrot.slane %v1219_v29, 1  ;;  %v1224_v34 = vrot.slane %v1222_v30, 2  ;;  %v1578_v29 = vld [vmem:[#allocation2 + $0x260] sm:$0xff]  ;;  %1487 = vst.msk [vmem:[#allocation2 + $0x48] sm:$0xff] %vm537_vm1, %v6157_v25 }
  0x80   : > { %2176 = vmatprep.mubr.bf16.mxu0 %v1538_v47  ;;  %2292 = vmatpush1.bf16.msra.mxu0 %v5823_v38  ;;  %v5878_v38 = vld [vmem:[%s6309_s24 + $0x58] sm:$0x7f]   ;;  %v1552_v47 = vld [vmem:[#allocation2 + $0x190] sm:$0xff]  ;;  %v5896_v30 = vld [vmem:[%s6309_s24] sm:$0xfc]  }
  0x81   : > { %2293 = vmatprep.subr.bf16.mxu0 %v5829_v43  ;;  %v1225_v39 = vor.u32 %v1224_v34, %v1221_v33  ;;  %v964_v42 = vrot.slane %v5878_v38, 1  ;;  %v1547_v43 = vld [vmem:[#allocation2 + $0x168] sm:$0xff]  ;;  %v1505_v33 = vld [vmem:[#allocation2 + $0x18] sm:$0xff]  ;;  %v1430_v34 = vrot.slane %v5896_v30, 2 }
  0x82   : > { %v5844_v38 = vld [vmem:[%s7543_s1 + $0x200] ss:$8 sps:$4 sm:$0xff]  }
  0x83   : > { %v1234_v45 = vsel %vm1132_vm4, %v1225_v39, %v1233_v40  ;;  %v965_v46 = vsel %vm947_vm5, %v963_v41, %v964_v42  ;;  %999 = vst.msk [vmem:[#allocation2 + $0x1c8] sm:$0x3f] %vm521_vm3, %v964_v42  ;;  %v1432_v36 = vsel %vm1429_vm6, %v1430_v34, %v1431_v35  ;;  %v1510_v39 = vld [vmem:[#allocation2 + $0x40] sm:$0xff]  ;;  %v5853_v40 = vld [vmem:[%s7543_s1 + $0x214] ss:$8 sps:$4 sm:$0xff]  }
  0x84   : > { %2294 = vmatpush1.bf16.msra.mxu0 %v5827_v54  ;;  %1295 = vst.msk [vmem:[#allocation2 + $0x1a8] sm:$0xff] %vm519_vm0, %v1234_v45  ;;  %998 = vst.msk [vmem:[#allocation2 + $0x1a0] sm:$0xff] %vm519_vm0, %v965_v46  ;;  %v1247_v54 = vshll.u32 %v5883_v49, 16  ;;  %v5851_v41 = vld [vmem:[%s7543_s1 + $0x210] ss:$8 sps:$4 sm:$0xff]  }
  0x85   : > { %2295 = vmatprep.subr.bf16.mxu0 %v5835_v55  ;;  %1311 = vst.msk [vmem:[#allocation2 + $0x1a8] sm:$0xff] %vm537_vm1, %v6157_v25  ;;  %1015 = vst.msk [vmem:[#allocation2 + $0x1c8] sm:$0xff] %vm537_vm1, %v6157_v25  ;;  %v1238_v55 = vrot.slane %v1236_v51, 1  ;;  %v5860_v42 = vld [vmem:[%s7543_s1 + $0x224] ss:$8 sps:$4 sm:$0xff]   ;;  %v1509_v45 = vld [vmem:[#allocation2 + $0x38] sm:$0xff] }
  0x86   : > { %1014 = vst.msk [vmem:[#allocation2 + $0x1a0] sm:$0xff] %vm537_vm1, %v6157_v25  ;;  %v1249_v58 = vrot.slane %v1247_v54, 2  ;;  %v5858_v46 = vld [vmem:[%s7543_s1 + $0x220] ss:$8 sps:$4 sm:$0xff]   ;;  %v1560_v35 = vld [vmem:[#allocation2 + $0x1d0] sm:$0xff] }
  0x87   : > { %2177 = vmatmul.mubr.bf16.gmra.mrb[28].mxu0 %v1537_v61  ;;  %v1557_v61 = vld [vmem:[#allocation2 + $0x1b8] sm:$0xff]  ;;  %v1242_v62 = vor.u32 %v1241_v56, %v1238_v55  ;;  %1470 = vst.msk [vmem:[#allocation2 + $0x20] sm:$0xff] %vm519_vm0, %v1432_v36  ;;  %v1514_v54 = vld [vmem:[#allocation2 + $0x60] sm:$0xff]  ;;  %v1520_v56 = vld [vmem:[#allocation2 + $0x90] sm:$0xff] }
  0x88   : > { %2186 = vmatprep.mubr.bf16.mxu0 %v1543_v7  ;;  %2296 = vmatpush1.bf16.msra.mxu0 %v5833_v0  ;;  %v1250_v63 = vor.u32 %v1249_v58, %v1246_v57  ;;  %v1563_v0 = vld [vmem:[#allocation2 + $0x1e8] sm:$0xff]  ;;  %v5890_v7 = vld [vmem:[%s6309_s24 + $0x78] sm:$0xff]   ;;  %1486 = vst.msk [vmem:[#allocation2 + $0x20] sm:$0xff] %vm537_vm1, %v6157_v25  ;;  %v5908_v36 = vld [vmem:[%s6309_s24 + $0x60] sm:$0xfc]  }
  0x89   : > { %2297 = vmatprep.subr.bf16.mxu0 %v5839_v3  ;;  %v1261_v11 = vshrl.u32 %v5890_v7, 16  ;;  %v1264_v12 = vshll.u32 %v5890_v7, 16  ;;  %v5872_v55 = vld [vmem:[%s7543_s1 + $0x240] ss:$8 sps:$4 sm:$0xff]   ;;  %v5881_v57 = vld [vmem:[%s7543_s1 + $0x254] ss:$8 sps:$4 sm:$0xff]  }
  0x8a   : > { %v1251_v3 = vsel %vm1132_vm4, %v1242_v62, %v1250_v63  ;;  %1298 = vst.msk [vmem:[#allocation2 + $0x220] sm:$0x3f] %vm521_vm3, %v1250_v63  ;;  %v5879_v58 = vld [vmem:[%s7543_s1 + $0x250] ss:$8 sps:$4 sm:$0xff]   ;;  %v1519_v62 = vld [vmem:[#allocation2 + $0x88] sm:$0xff]  ;;  %v1530_v7 = vld [vmem:[#allocation2 + $0xe0] sm:$0xff] }
  0x8b   : > { %1297 = vst.msk [vmem:[#allocation2 + $0x1f8] sm:$0xff] %vm519_vm0, %v1251_v3  ;;  %v1263_v15 = vrot.slane %v1261_v11, 1  ;;  %v1266_v16 = vrot.slane %v1264_v12, 2  ;;  %v5886_v63 = vld [vmem:[%s7543_s1 + $0x260] ss:$8 sps:$4 sm:$0xff]   ;;  %v1440_v11 = vrot.slane %v5903_v9, 2 }
  0x8c   : > { %2298 = vmatpush1.bf16.msra.mxu0 %v5837_v10  ;;  %1314 = vst.msk [vmem:[#allocation2 + $0x220] sm:$0xff] %vm537_vm1, %v6157_v25  ;;  %1313 = vst.msk [vmem:[#allocation2 + $0x1f8] sm:$0xff] %vm537_vm1, %v6157_v25  ;;  %v1256_v10 = vshll.u32 %v5889_v6, 16  ;;  %v1524_v6 = vld [vmem:[#allocation2 + $0xb0] sm:$0xff]  ;;  %v1529_v12 = vld [vmem:[#allocation2 + $0xd8] sm:$0xff] }
  0x8d   : > { %2460 = vmatprep.subr.bf16.mxu0 %v5846_v14  ;;  %v1267_v21 = vor.u32 %v1266_v16, %v1263_v15  ;;  %1477 = vst.msk [vmem:[#allocation2 + $0x138] sm:$0x3f] %vm521_vm3, %v1440_v11  ;;  %v1534_v15 = vld [vmem:[#allocation2 + $0x100] sm:$0xff]  ;;  %v1540_v16 = vld [vmem:[#allocation2 + $0x130] sm:$0xff] }
  0x8e   : > { %v1258_v14 = vrot.slane %v1256_v10, 2  ;;  %1493 = vst.msk [vmem:[#allocation2 + $0x138] sm:$0xff] %vm537_vm1, %v6157_v25  ;;  %v1554_v34 = vld [vmem:[#allocation2 + $0x1a0] sm:$0xff] }
  0x8f   : > { %2187 = vmatmul.mubr.bf16.gmra.mrb[32].mxu0 %v1542_v24  ;;  %v970_v24 = vrot.slane %v5892_v18, 1  ;;  %1300 = vst.msk [vmem:[#allocation2 + $0x270] sm:$0x3f] %vm521_vm3, %v1267_v21  ;;  %v5905_v18 = vld [vmem:[%s6309_s24 + $0x48] sm:$0xff]   ;;  %v1506_v60 = vld [vmem:[#allocation2 + $0x20] sm:$0xff] }
  0x90   : > { %2196 = vmatprep.mubr.bf16.mxu0 %v1548_v28  ;;  %v1259_v20 = vor.u32 %v1258_v14, %v1255_v13  ;;  %1316 = vst.msk [vmem:[#allocation2 + $0x270] sm:$0xff] %vm537_vm1, %v6157_v25  ;;  %v1572_v28 = vld [vmem:[#allocation2 + $0x230] sm:$0xff]  ;;  %v1535_v13 = vld [vmem:[#allocation2 + $0x108] sm:$0xff] }
  0x91   : > { %v971_v27 = vsel %vm947_vm5, %v969_v23, %v970_v24  ;;  %1003 = vst.msk [vmem:[#allocation2 + $0x268] sm:$0x3f] %vm521_vm3, %v970_v24  ;;  %v1544_v24 = vld [vmem:[#allocation2 + $0x150] sm:$0xff] }
  0x92   : > { %v1268_v26 = vsel %vm1132_vm4, %v1259_v20, %v1267_v21  ;;  %1002 = vst.msk [vmem:[#allocation2 + $0x240] sm:$0xff] %vm519_vm0, %v971_v27  ;;  %v1443_v20 = vrot.slane %v5905_v18, 2  ;;  %v1539_v21 = vld [vmem:[#allocation2 + $0x128] sm:$0xff]  ;;  %v5906_v27 = vld [vmem:[%s6309_s24 + $0x50] sm:$0xfc]  }
  0x93   : > { %1299 = vst.msk [vmem:[#allocation2 + $0x248] sm:$0xff] %vm519_vm0, %v1268_v26  ;;  %v1550_v26 = vld [vmem:[#allocation2 + $0x180] sm:$0xff]  ;;  %v5935_v18 = vld [vmem:[%s7545_s3 + $0x70] ss:$8 sps:$4 sm:$0xff]  }
  0x94   : > { %1315 = vst.msk [vmem:[#allocation2 + $0x248] sm:$0xff] %vm537_vm1, %v6157_v25  ;;  %1019 = vst.msk [vmem:[#allocation2 + $0x268] sm:$0xff] %vm537_vm1, %v6157_v25 }
  0x95   : > { %1018 = vst.msk [vmem:[#allocation2 + $0x240] sm:$0xff] %vm537_vm1, %v6157_v25 }
  0x96   : > { %1479 = vst.msk [vmem:[#allocation2 + $0x188] sm:$0x3f] %vm521_vm3, %v1443_v20 }
  0x97   : > { %2197 = vmatmul.mubr.bf16.gmra.mrb[36].mxu0 %v1547_v43  ;;  %v5898_v43 = vld [vmem:[%s6309_s24 + $0x10] sm:$0xfc]   ;;  %1495 = vst.msk [vmem:[#allocation2 + $0x188] sm:$0xff] %vm537_vm1, %v6157_v25 }
  0x98   : > { %2206 = vmatprep.mubr.bf16.mxu0 %v1553_v44  ;;  %v5899_v44 = vld [vmem:[%s6309_s24 + $0x18] sm:$0xff]   ;;  %v1433_v49 = vrot.slane %v5898_v43, 2  ;;  %v1564_v43 = vld [vmem:[#allocation2 + $0x1f0] sm:$0xff] }
  0x9f   : > { %2207 = vmatmul.mubr.bf16.gmra.mrb[40].mxu0 %v1552_v47  ;;  %v1515_v47 = vld [vmem:[#allocation2 + $0x68] sm:$0xff] }
  0xa0   : > { %2216 = vmatprep.mubr.bf16.mxu0 %v1558_v50  ;;  %v1434_v50 = vrot.slane %v5899_v44, 2  ;;  %v1570_v44 = vld [vmem:[#allocation2 + $0x220] sm:$0xff] }
  0xa2   : > { %v1435_v51 = vsel %vm1429_vm6, %v1433_v49, %v1434_v50  ;;  %1473 = vst.msk [vmem:[#allocation2 + $0x98] sm:$0x3f] %vm521_vm3, %v1434_v50  ;;  %v1569_v49 = vld [vmem:[#allocation2 + $0x218] sm:$0xff]  ;;  %v1575_v50 = vld [vmem:[#allocation2 + $0x248] sm:$0xff] }
  0xa3   : > { %1472 = vst.msk [vmem:[#allocation2 + $0x70] sm:$0xff] %vm519_vm0, %v1435_v51 }
  0xa4   : > { %1489 = vst.msk [vmem:[#allocation2 + $0x98] sm:$0xff] %vm537_vm1, %v6157_v25  ;;  %1488 = vst.msk [vmem:[#allocation2 + $0x70] sm:$0xff] %vm537_vm1, %v6157_v25 }
  0xa7   : > { %2217 = vmatmul.mubr.bf16.gmra.mrb[44].mxu0 %v1557_v61  ;;  %v5901_v61 = vld [vmem:[%s6309_s24 + $0x28] sm:$0xff]  }
  0xa8   : > { %2226 = vmatprep.mubr.bf16.mxu0 %v1563_v0  ;;  %v1525_v0 = vld [vmem:[#allocation2 + $0xb8] sm:$0xff]  ;;  %v1437_v3 = vrot.slane %v5901_v61, 2  ;;  %v5920_v61 = vld [vmem:[%s7545_s3 + $0x20] ss:$8 sps:$4 sm:$0xff]  }
  0xaa   : > { %v1438_v4 = vsel %vm1429_vm6, %v1436_v2, %v1437_v3  ;;  %1475 = vst.msk [vmem:[#allocation2 + $0xe8] sm:$0x3f] %vm521_vm3, %v1437_v3  ;;  %v5926_v2 = vld [vmem:[%s7545_s3 + $0x40] ss:$8 sps:$4 sm:$0xff]  }
  0xab   : > { %1474 = vst.msk [vmem:[#allocation2 + $0xc0] sm:$0xff] %vm519_vm0, %v1438_v4  ;;  %v1516_v3 = vld [vmem:[#allocation2 + $0x70] sm:$0xff]  ;;  %v1521_v4 = vld [vmem:[#allocation2 + $0x98] sm:$0xff] }
  0xac   : > { %1491 = vst.msk [vmem:[#allocation2 + $0xe8] sm:$0xff] %vm537_vm1, %v6157_v25  ;;  %1490 = vst.msk [vmem:[#allocation2 + $0xc0] sm:$0xff] %vm537_vm1, %v6157_v25 }
  0xaf   : > { %2227 = vmatmul.mubr.bf16.gmra.mrb[48].mxu0 %v1562_v5  ;;  %v5893_v5 = vld [vmem:[%s7543_s1 + $0x270] ss:$8 sps:$4 sm:$0xff]  }
  0xb0   : > { %2236 = vmatprep.mubr.bf16.mxu0 %v1568_v8  ;;  %v5902_v8 = vld [vmem:[%s6309_s24 + $0x30] sm:$0xfc]  }
  0xb1   : > { %v1439_v10 = vrot.slane %v5902_v8, 2  ;;  %v1541_v8 = vld [vmem:[#allocation2 + $0x138] sm:$0xff] }
  0xb3   : > { %v1441_v14 = vsel %vm1429_vm6, %v1439_v10, %v1440_v11  ;;  %v1551_v10 = vld [vmem:[#allocation2 + $0x188] sm:$0xff] }
  0xb4   : > { %1476 = vst.msk [vmem:[#allocation2 + $0x110] sm:$0xff] %vm519_vm0, %v1441_v14 }
  0xb5   : > { %1492 = vst.msk [vmem:[#allocation2 + $0x110] sm:$0xff] %vm537_vm1, %v6157_v25 }
  0xb7   : > { %2237 = vmatmul.mubr.bf16.gmra.mrb[52].mxu0 %v1567_v19  ;;  %v1442_v19 = vrot.slane %v5904_v17, 2  ;;  %v5933_v17 = vld [vmem:[%s7545_s3 + $0x74] ss:$8 sps:$4 sm:$0xff]  }
  0xb8   : > { %2246 = vmatprep.mubr.bf16.mxu0 %v1573_v22  ;;  %v1545_v22 = vld [vmem:[#allocation2 + $0x158] sm:$0xff] }
  0xb9   : > { %v1444_v23 = vsel %vm1429_vm6, %v1442_v19, %v1443_v20  ;;  %v5936_v20 = vld [vmem:[%s7545_s3 + $0x84] ss:$8 sps:$4 sm:$0xff]  }
  0xba   : > { %1478 = vst.msk [vmem:[#allocation2 + $0x160] sm:$0xff] %vm519_vm0, %v1444_v23  ;;  %v5941_v23 = vld [vmem:[%s7545_s3 + $0x90] ss:$8 sps:$4 sm:$0xff]  }
  0xbb   : > { %1494 = vst.msk [vmem:[#allocation2 + $0x160] sm:$0xff] %vm537_vm1, %v6157_v25 }
  0xbf   : > { %2247 = vmatmul.mubr.bf16.gmra.mrb[56].mxu0 %v1572_v28  ;;  %v5907_v28 = vld [vmem:[%s6309_s24 + $0x58] sm:$0xff]  }
  0xc0   : > { %2256 = vmatprep.mubr.bf16.mxu0 %v1578_v29  ;;  %v1445_v29 = vrot.slane %v5906_v27, 2  ;;  %v1446_v30 = vrot.slane %v5907_v28, 2  ;;  %v5944_v27 = vld [vmem:[%s7545_s3 + $0xa0] ss:$8 sps:$4 sm:$0xff]   ;;  %v5945_v28 = vld [vmem:[%s7545_s3 + $0xb4] ss:$8 sps:$4 sm:$0xff]  }
  0xc2   : > { %1481 = vst.msk [vmem:[#allocation2 + $0x1d8] sm:$0x3f] %vm521_vm3, %v1446_v30  ;;  %v1546_v9 = vld [vmem:[#allocation2 + $0x160] sm:$0xff] }
  0xc3   : > { %1497 = vst.msk [vmem:[#allocation2 + $0x1d8] sm:$0xff] %vm537_vm1, %v6157_v25 }
  0xc7   : > { %2257 = vmatmul.mubr.bf16.gmra.mrb[60].mxu0 %v1577_v32  ;;  %v1555_v32 = vld [vmem:[#allocation2 + $0x1a8] sm:$0xff] }
  0xc8   : > { %2299 = vmatprep.mubr.bf16.mxu0 %v1505_v33  ;;  %v1447_v33 = vsel %vm1429_vm6, %v1445_v29, %v1446_v30  ;;  %v5947_v29 = vld [vmem:[%s7545_s3 + $0xb0] ss:$8 sps:$4 sm:$0xff]  }
  0xc9   : > { %1480 = vst.msk [vmem:[#allocation2 + $0x1b0] sm:$0xff] %vm519_vm0, %v1447_v33  ;;  %v5951_v33 = vld [vmem:[%s7545_s3 + $0xd4] ss:$8 sps:$4 sm:$0xff]  }
  0xca   : > { %1496 = vst.msk [vmem:[#allocation2 + $0x1b0] sm:$0xff] %vm537_vm1, %v6157_v25  ;;  %v1561_v14 = vld [vmem:[#allocation2 + $0x1d8] sm:$0xff] }
  0xcf   : > { %2300 = vmatmul.mubr.bf16.vlgmr.msra.gmra.mrb[0].mxu0 %v1504_v37  ;;  %v5909_v37 = vld [vmem:[%s6309_s24 + $0x68] sm:$0xff]  }
  0xd0   : > { %2461 = vmatpush1.bf16.msra.mxu0 %v5844_v38  ;;  %2309 = vmatprep.mubr.bf16.mxu0 %v1510_v39  ;;  %v1448_v38 = vrot.slane %v5908_v36, 2  ;;  %v1449_v39 = vrot.slane %v5909_v37, 2  ;;  %v5954_v36 = vld [vmem:[%s7545_s3 + $0xe4] ss:$8 sps:$4 sm:$0xff]   ;;  %v5956_v37 = vld [vmem:[%s7545_s3 + $0xe0] ss:$8 sps:$4 sm:$0xff]  }
  0xd1   : > { %2462 = vmatprep.subr.bf16.mxu0 %v5853_v40  ;;  %v1559_v40 = vld [vmem:[#allocation2 + $0x1c8] sm:$0xff]  ;;  %v1556_v11 = vld [vmem:[#allocation2 + $0x1b0] sm:$0xff] }
  0xd2   : > { %1483 = vst.msk [vmem:[#allocation2 + $0x228] sm:$0x3f] %vm521_vm3, %v1449_v39 }
  0xd3   : > { %1499 = vst.msk [vmem:[#allocation2 + $0x228] sm:$0xff] %vm537_vm1, %v6157_v25 }
  0xd4   : > { %2463 = vmatpush1.bf16.msra.mxu0 %v5851_v41  ;;  %v1565_v41 = vld [vmem:[#allocation2 + $0x1f8] sm:$0xff] }
  0xd5   : > { %2464 = vmatprep.subr.bf16.mxu0 %v5860_v42  ;;  %v1450_v42 = vsel %vm1429_vm6, %v1448_v38, %v1449_v39  ;;  %v5957_v38 = vld [vmem:[%s7545_s3 + $0xf4] ss:$8 sps:$4 sm:$0xff]   ;;  %v5959_v39 = vld [vmem:[%s7545_s3 + $0xf0] ss:$8 sps:$4 sm:$0xff]  }
  0xd6   : > { %1482 = vst.msk [vmem:[#allocation2 + $0x200] sm:$0xff] %vm519_vm0, %v1450_v42 }
  0xd7   : > { %2310 = vmatmul.mubr.bf16.gmra.mrb[4].mxu0 %v1509_v45  ;;  %1498 = vst.msk [vmem:[#allocation2 + $0x200] sm:$0xff] %vm537_vm1, %v6157_v25  ;;  %v5910_v45 = vld [vmem:[%s6309_s24 + $0x70] sm:$0xfc]  }
  0xd8   : > { %2319 = vmatprep.mubr.bf16.mxu0 %v1515_v47  ;;  %2465 = vmatpush1.bf16.msra.mxu0 %v5858_v46  ;;  %v5911_v46 = vld [vmem:[%s6309_s24 + $0x78] sm:$0xff]   ;;  %v1451_v47 = vrot.slane %v5910_v45, 2  ;;  %s4859_s24 = sshll.u32 %s382_s15, 4  ;;  %s7502_s24 = int_to_ptr.vmem [resolvable:$true] %s4859_s24 }
  0xd9   : > { %2466 = vmatprep.subr.bf16.mxu0 %v5867_v48  ;;  %v1452_v48 = vrot.slane %v5911_v46, 2  ;;  %s6093_s21 = scalar_lea.vmem %s7502_s24, 128  ;;  %p6100_p0 = scmp.lt.s32.totalorder %s7502_s24, %s6098_s29 }
  0xda   : > { %p6094_p11 = scmp.ne.s32.totalorder %s7502_s24, %s6093_s21  ;;  %p6101_p1 = scmp.lt.s32.totalorder %s6099_s12, %s6093_s21 }
  0xdb   : > { %v1453_v51 = vsel %vm1429_vm6, %v1451_v47, %v1452_v48  ;;  %1485 = vst.msk [vmem:[#allocation2 + $0x278] sm:$0x3f] %vm521_vm3, %v1452_v48 }
  0xdc   : > { %2467 = vmatpush1.bf16.msra.mxu0 %v5865_v52  ;;  %1484 = vst.msk [vmem:[#allocation2 + $0x250] sm:$0xff] %vm519_vm0, %v1453_v51  ;;  %v1574_v52 = vld [vmem:[#allocation2 + $0x240] sm:$0xff]  ;;  %p6095_p12 = pnand %p6094_p11, %p6259_p5  ;;  %p6102_p2 = por %p6101_p1, %p6100_p0 }
  0xdd   : > { %2468 = vmatprep.subr.bf16.mxu0 %v5874_v53  ;;  %1501 = vst.msk [vmem:[#allocation2 + $0x278] sm:$0xff] %vm537_vm1, %v6157_v25  ;;  %1500 = vst.msk [vmem:[#allocation2 + $0x250] sm:$0xff] %vm537_vm1, %v6157_v25  ;;  %v1580_v53 = vld [vmem:[#allocation2 + $0x270] sm:$0xff] }
  0xde   : > { %v1566_v19 = vld [vmem:[#allocation2 + $0x200] sm:$0xff]  ;;  %p6096_p13 = pneg %p6095_p12 }
  0xdf   : > { %2320 = vmatmul.mubr.bf16.gmra.mrb[8].mxu0 %v1514_v54  ;;  %v1579_v54 = vld [vmem:[#allocation2 + $0x268] sm:$0xff] }
  0xe0   : > { %2329 = vmatprep.mubr.bf16.mxu0 %v1520_v56  ;;  %2469 = vmatpush1.bf16.msra.mxu0 %v5872_v55  ;;  %v5912_v55 = vld [vmem:[%s7545_s3 + $0x4] ss:$8 sps:$4 sm:$0xff]   ;;  %v5914_v56 = vld [vmem:[%s7545_s3] ss:$8 sps:$4 sm:$0xff]   ;;  %p6103_p3 = pnand %p6102_p2, %p6096_p13 }
  0xe1   : > { %2470 = vmatprep.subr.bf16.mxu0 %v5881_v57  ;;  %v5915_v57 = vld [vmem:[%s7545_s3 + $0x14] ss:$8 sps:$4 sm:$0xff]   ;;  %3576 = vmatprep.subr.bf16.mxu1 %v5912_v55 }
  0xe2   : > { %3577 = vmatpush1.bf16.msra.mxu1 %v5914_v56 }
  0xe3   : > { %3578 = vmatprep.subr.bf16.mxu1 %v5915_v57 }
  0xe4   : > { %2471 = vmatpush1.bf16.msra.mxu0 %v5879_v58  ;;  %v5917_v58 = vld [vmem:[%s7545_s3 + $0x10] ss:$8 sps:$4 sm:$0xff]  }
  0xe5   : > { %2472 = vmatprep.subr.bf16.mxu0 %v5888_v59  ;;  %v5918_v59 = vld [vmem:[%s7545_s3 + $0x24] ss:$8 sps:$4 sm:$0xff]   ;;  %v1576_v30 = vld [vmem:[#allocation2 + $0x250] sm:$0xff] }
  0xe6   : > { %3579 = vmatpush1.bf16.msra.mxu1 %v5917_v58 }
  0xe7   : > { %2330 = vmatmul.mubr.bf16.gmra.mrb[12].mxu0 %v1519_v62  ;;  %3580 = vmatprep.subr.bf16.mxu1 %v5918_v59  ;;  %v5921_v62 = vld [vmem:[%s7545_s3 + $0x34] ss:$8 sps:$4 sm:$0xff]  }
  0xe8   : > { %2339 = vmatprep.mubr.bf16.mxu0 %v1525_v0  ;;  %2473 = vmatpush1.bf16.msra.mxu0 %v5886_v63  ;;  %v5923_v63 = vld [vmem:[%s7545_s3 + $0x30] ss:$8 sps:$4 sm:$0xff]   ;;  %v5924_v0 = vld [vmem:[%s7545_s3 + $0x44] ss:$8 sps:$4 sm:$0xff]  }
  0xe9   : > { %2474 = vmatprep.subr.bf16.mxu0 %v5895_v1  ;;  %v1511_v1 = vld [vmem:[#allocation2 + $0x48] sm:$0xff] }
  0xea   : > { %3581 = vmatpush1.bf16.msra.mxu1 %v5920_v61 }
  0xeb   : > { %3582 = vmatprep.subr.bf16.mxu1 %v5921_v62 }
  0xec   : > { %2475 = vmatpush1.bf16.msra.mxu0 %v5893_v5  ;;  %v1526_v5 = vld [vmem:[#allocation2 + $0xc0] sm:$0xff] }
  0xee   : > { %3583 = vmatpush1.bf16.msra.mxu1 %v5923_v63 }
  0xef   : > { %2340 = vmatmul.mubr.bf16.gmra.mrb[16].mxu0 %v1524_v6  ;;  %3584 = vmatprep.subr.bf16.mxu1 %v5924_v0  ;;  %v1531_v6 = vld [vmem:[#allocation2 + $0xe8] sm:$0xff] }
  0xf0   : > { %2349 = vmatprep.mubr.bf16.mxu0 %v1530_v7  ;;  %v1536_v7 = vld [vmem:[#allocation2 + $0x110] sm:$0xff] }
  0xf2   : > { %3585 = vmatpush1.bf16.msra.mxu1 %v5926_v2 }
  0xf7   : > { %2350 = vmatmul.mubr.bf16.gmra.mrb[20].mxu0 %v1529_v12  ;;  %v5927_v12 = vld [vmem:[%s7545_s3 + $0x54] ss:$8 sps:$4 sm:$0xff]  }
  0xf8   : > { %2359 = vmatprep.mubr.bf16.mxu0 %v1535_v13  ;;  %v5929_v13 = vld [vmem:[%s7545_s3 + $0x50] ss:$8 sps:$4 sm:$0xff]   ;;  %3586 = vmatprep.subr.bf16.mxu1 %v5927_v12 }
  0xf9   : > { %3587 = vmatpush1.bf16.msra.mxu1 %v5929_v13 }
  0xff   : > { %2360 = vmatmul.mubr.bf16.gmra.mrb[24].mxu0 %v1534_v15  ;;  %v5930_v15 = vld [vmem:[%s7545_s3 + $0x64] ss:$8 sps:$4 sm:$0xff]  }
 0x100   : > { %2369 = vmatprep.mubr.bf16.mxu0 %v1540_v16  ;;  %v5932_v16 = vld [vmem:[%s7545_s3 + $0x60] ss:$8 sps:$4 sm:$0xff]   ;;  %3588 = vmatprep.subr.bf16.mxu1 %v5930_v15 }
 0x101   : > { %3589 = vmatpush1.bf16.msra.mxu1 %v5932_v16 }
 0x102   : > { %3590 = vmatprep.subr.bf16.mxu1 %v5933_v17 }
 0x105   : > { %3591 = vmatpush1.bf16.msra.mxu1 %v5935_v18 }
 0x106   : > { %3592 = vmatprep.subr.bf16.mxu1 %v5936_v20 }
 0x107   : > { %2370 = vmatmul.mubr.bf16.gmra.mrb[28].mxu0 %v1539_v21  ;;  %v5938_v21 = vld [vmem:[%s7545_s3 + $0x80] ss:$8 sps:$4 sm:$0xff]  }
 0x108   : > { %2379 = vmatprep.mubr.bf16.mxu0 %v1545_v22  ;;  %v5939_v22 = vld [vmem:[%s7545_s3 + $0x94] ss:$8 sps:$4 sm:$0xff]  }
 0x109   : > { %3593 = vmatpush1.bf16.msra.mxu1 %v5938_v21 }
 0x10a   : > { %3594 = vmatprep.subr.bf16.mxu1 %v5939_v22 }
 0x10d   : > { %3595 = vmatpush1.bf16.msra.mxu1 %v5941_v23 }
 0x10f   : > { %2380 = vmatmul.mubr.bf16.gmra.mrb[32].mxu0 %v1544_v24  ;;  %v1571_v24 = vld [vmem:[#allocation2 + $0x228] sm:$0xff] }
 0x110   : > { %2389 = vmatprep.mubr.bf16.mxu0 %v1550_v26  ;;  %v5942_v26 = vld [vmem:[%s7545_s3 + $0xa4] ss:$8 sps:$4 sm:$0xff]  }
 0x111   : > { %3596 = vmatprep.subr.bf16.mxu1 %v5942_v26 }
 0x112   : > { %3597 = vmatpush1.bf16.msra.mxu1 %v5944_v27 }
 0x113   : > { %3598 = vmatprep.subr.bf16.mxu1 %v5945_v28 }
 0x116   : > { %3599 = vmatpush1.bf16.msra.mxu1 %v5947_v29 }
 0x117   : > { %2390 = vmatmul.mubr.bf16.gmra.mrb[36].mxu0 %v1549_v31  ;;  %v5948_v31 = vld [vmem:[%s7545_s3 + $0xc4] ss:$8 sps:$4 sm:$0xff]  }
 0x118   : > { %2399 = vmatprep.mubr.bf16.mxu0 %v1555_v32  ;;  %v5950_v32 = vld [vmem:[%s7545_s3 + $0xc0] ss:$8 sps:$4 sm:$0xff]   ;;  %3600 = vmatprep.subr.bf16.mxu1 %v5948_v31 }
 0x11a   : > { %3601 = vmatpush1.bf16.msra.mxu1 %v5950_v32 }
 0x11b   : > { %3602 = vmatprep.subr.bf16.mxu1 %v5951_v33 }
 0x11f   : > { %2400 = vmatmul.mubr.bf16.gmra.mrb[40].mxu0 %v1554_v34  ;;  %v5953_v34 = vld [vmem:[%s7545_s3 + $0xd0] ss:$8 sps:$4 sm:$0xff]  }
 0x120   : > { %2409 = vmatprep.mubr.bf16.mxu0 %v1560_v35  ;;  %v1581_v35 = vld [vmem:[#allocation2 + $0x278] sm:$0xff]  ;;  %3603 = vmatpush1.bf16.msra.mxu1 %v5953_v34 }
 0x121   : > { %3604 = vmatprep.subr.bf16.mxu1 %v5954_v36 }
 0x124   : > { %3605 = vmatpush1.bf16.msra.mxu1 %v5956_v37 }
 0x125   : > { %3606 = vmatprep.subr.bf16.mxu1 %v5957_v38 }
 0x127   : > { %2410 = vmatmul.mubr.bf16.gmra.mrb[44].mxu0 %v1559_v40  ;;  %v5962_v40 = vld [vmem:[%s7545_s3 + $0x104] ss:$8 sps:$4 sm:$0xff]  }
 0x128   : > { %2419 = vmatprep.mubr.bf16.mxu0 %v1565_v41  ;;  %3607 = vmatpush1.bf16.msra.mxu1 %v5959_v39  ;;  %v1664_v41 = vlaneseq }
 0x129   : > { %3689 = vmatprep.subr.bf16.mxu1 %v5962_v40 }
 0x12a   : > { %v6982_v42 = vshrl.u32 %v1664_v41, 7 }
 0x12c   : > { %v1670_v45 = vsub.s32 1, %v6982_v42 }
 0x12f   : > { %2420 = vmatmul.mubr.bf16.gmra.mrb[48].mxu0 %v1564_v43  ;;  %v1666_v43 = vsub.s32 0, %v6982_v42 }
 0x130   : > { %2429 = vmatprep.mubr.bf16.mxu0 %v1570_v44  ;;  %v1662_v44 = vld [vmem:[%s7544_s2] sm:$0x3] }
 0x131   : > { %v6991_v46 = vrot.slane %v1662_v44, %v1666_v43  ;;  %v6995_v47 = vrot.slane %v1662_v44, %v1670_v45 }
 0x137   : > { %2430 = vmatmul.mubr.bf16.gmra.mrb[52].mxu0 %v1569_v49 }
 0x138   : > { %2439 = vmatprep.mubr.bf16.mxu0 %v1575_v50 }
 0x13f   : > { %2440 = vmatmul.mubr.bf16.gmra.mrb[56].mxu0 %v1574_v52 }
 0x140   : > { %2449 = vmatprep.mubr.bf16.mxu0 %v1580_v53 }
 0x147   : > { %2450 = vmatmul.mubr.bf16.gmra.mrb[60].mxu0 %v1579_v54 }
 0x148   : > { %2492 = vmatprep.mubr.bf16.mxu0 %v6157_v25 }
 0x14f   : > { %2493 = vmatmul.mubr.bf16.vlgmr.msra.gmra.mrb[0].mxu0 %v1506_v60 }
 0x150   : > { %2502 = vmatprep.mubr.bf16.mxu0 %v6157_v25 }
 0x157   : > { %2503 = vmatmul.mubr.bf16.gmra.mrb[4].mxu0 %v1511_v1 }
 0x158   : > { %2512 = vmatprep.mubr.bf16.mxu0 %v6157_v25 }
 0x15f   : > { %2513 = vmatmul.mubr.bf16.gmra.mrb[8].mxu0 %v1516_v3 }
 0x160   : > { %2522 = vmatprep.mubr.bf16.mxu0 %v6157_v25 }
 0x167   : > { %2523 = vmatmul.mubr.bf16.gmra.mrb[12].mxu0 %v1521_v4 }
 0x168   : > { %2532 = vmatprep.mubr.bf16.mxu0 %v6157_v25 }
 0x16f   : > { %2533 = vmatmul.mubr.bf16.gmra.mrb[16].mxu0 %v1526_v5 }
 0x170   : > { %2542 = vmatprep.mubr.bf16.mxu0 %v6157_v25 }
 0x177   : > { %2543 = vmatmul.mubr.bf16.gmra.mrb[20].mxu0 %v1531_v6 }
 0x178   : > { %2552 = vmatprep.mubr.bf16.mxu0 %v6157_v25 }
 0x17f   : > { %2553 = vmatmul.mubr.bf16.gmra.mrb[24].mxu0 %v1536_v7 }
 0x180   : > { %2562 = vmatprep.mubr.bf16.mxu0 %v6157_v25 }
 0x187   : > { %2563 = vmatmul.mubr.bf16.gmra.mrb[28].mxu0 %v1541_v8 }
 0x188   : > { %2572 = vmatprep.mubr.bf16.mxu0 %v6157_v25 }
 0x18f   : > { %2573 = vmatmul.mubr.bf16.gmra.mrb[32].mxu0 %v1546_v9 }
 0x190   : > { %2582 = vmatprep.mubr.bf16.mxu0 %v6157_v25 }
 0x197   : > { %2583 = vmatmul.mubr.bf16.gmra.mrb[36].mxu0 %v1551_v10 }
 0x198   : > { %2592 = vmatprep.mubr.bf16.mxu0 %v6157_v25 }
 0x19f   : > { %2593 = vmatmul.mubr.bf16.gmra.mrb[40].mxu0 %v1556_v11 }
 0x1a0   : > { %2602 = vmatprep.mubr.bf16.mxu0 %v6157_v25 }
 0x1a7   : > { %2603 = vmatmul.mubr.bf16.gmra.mrb[44].mxu0 %v1561_v14 }
 0x1a8   : > { %2612 = vmatprep.mubr.bf16.mxu0 %v6157_v25 }
 0x1af   : > { %2613 = vmatmul.mubr.bf16.gmra.mrb[48].mxu0 %v1566_v19 }
 0x1b0   : > { %2622 = vmatprep.mubr.bf16.mxu0 %v6157_v25 }
 0x1b7   : > { %2623 = vmatmul.mubr.bf16.gmra.mrb[52].mxu0 %v1571_v24 }
 0x1b8   : > { %2632 = vmatprep.mubr.bf16.mxu0 %v6157_v25 }
 0x1bf   : > { %2633 = vmatmul.mubr.bf16.gmra.mrb[56].mxu0 %v1576_v30 }
 0x1c0   : > { %2642 = vmatprep.mubr.bf16.mxu0 %v6157_v25 }
 0x1c7   : > { %2643 = vmatmul.mubr.bf16.gmra.mrb[60].mxu0 %v1581_v35 }
 0x222   : > { %v2494_v48 = vpop.f32.mrb[0].mxu0 }
 0x223   : > { %v5382_v49 = vadd.f32 %v2494_v48, %v6991_v46  ;;  %v2496_v50 = vpop.f32.mrb[1].mxu0 }
 0x224   : > { %v5383_v51 = vadd.f32 %v2496_v50, %v6995_v47  ;;  %v2498_v52 = vpop.f32.mrb[2].mxu0 }
 0x225   : > { %v2653_v53 = vmax.f32 %v5382_v49, 0.0  ;;  %v5384_v54 = vadd.f32 %v2498_v52, %v6991_v46  ;;  %v2500_v55 = vpop.f32.mrb[3].mxu0 }
 0x226   : > { %v2654_v56 = vmax.f32 %v5383_v51, 0.0  ;;  %v5385_v57 = vadd.f32 %v2500_v55, %v6995_v47 }
 0x227   : > { %v2655_v58 = vmax.f32 %v5384_v54, 0.0 }
 0x228   : > { %v2717_v59 = vmax.f32 %v2653_v53, %v2654_v56  ;;  %v2656_v60 = vmax.f32 %v5385_v57, 0.0 }
 0x22a   : > { %2749 = vst [vmem:[#allocation3] sm:$0xff] %v2717_v59  ;;  %v2718_v61 = vmax.f32 %v2655_v58, %v2656_v60  ;;  %v2504_v62 = vpop.f32.mrb[4].mxu0 }
 0x22b   : > { %v5386_v63 = vadd.f32 %v2504_v62, %v6991_v46  ;;  %v2506_v0 = vpop.f32.mrb[5].mxu0 }
 0x22c   : > { %2750 = vst [vmem:[#allocation3 + $0x8] sm:$0xff] %v2718_v61  ;;  %v5387_v1 = vadd.f32 %v2506_v0, %v6995_v47  ;;  %v2508_v2 = vpop.f32.mrb[6].mxu0 }
 0x22d   : > { %v2657_v3 = vmax.f32 %v5386_v63, 0.0  ;;  %v5388_v4 = vadd.f32 %v2508_v2, %v6991_v46  ;;  %v2510_v5 = vpop.f32.mrb[7].mxu0 }
 0x22e   : > { %v2658_v6 = vmax.f32 %v5387_v1, 0.0  ;;  %v5389_v7 = vadd.f32 %v2510_v5, %v6995_v47 }
 0x22f   : > { %v2659_v8 = vmax.f32 %v5388_v4, 0.0 }
 0x230   : > { %v2719_v9 = vmax.f32 %v2657_v3, %v2658_v6  ;;  %v2660_v10 = vmax.f32 %v5389_v7, 0.0 }
 0x232   : > { %2751 = vst [vmem:[#allocation3 + $0x10] sm:$0xff] %v2719_v9  ;;  %v2720_v11 = vmax.f32 %v2659_v8, %v2660_v10  ;;  %v2514_v12 = vpop.f32.mrb[8].mxu0 }
 0x233   : > { %v5390_v13 = vadd.f32 %v2514_v12, %v6991_v46  ;;  %v2516_v14 = vpop.f32.mrb[9].mxu0  ;;  %v2781_v26 = vld [vmem:[#allocation3] ss:$2 sm:$0xff]  ;;  %v2813_v27 = vld [vmem:[#allocation3 + $0x1] ss:$2 sm:$0xff] }
 0x234   : > { %2752 = vst [vmem:[#allocation3 + $0x18] sm:$0xff] %v2720_v11  ;;  %v5391_v15 = vadd.f32 %v2516_v14, %v6995_v47  ;;  %v2518_v16 = vpop.f32.mrb[10].mxu0  ;;  %v2844_v34 = vmax.f32 %v2781_v26, %v2813_v27 }
 0x235   : > { %v2661_v17 = vmax.f32 %v5390_v13, 0.0  ;;  %v5392_v18 = vadd.f32 %v2518_v16, %v6991_v46  ;;  %v2520_v19 = vpop.f32.mrb[11].mxu0 }
 0x236   : > { %v2662_v20 = vmax.f32 %v5391_v15, 0.0  ;;  %v5393_v21 = vadd.f32 %v2520_v19, %v6995_v47 }
 0x237   : > { %v2663_v22 = vmax.f32 %v5392_v18, 0.0 }
 0x238   : > { %v2721_v23 = vmax.f32 %v2661_v17, %v2662_v20  ;;  %v2664_v24 = vmax.f32 %v5393_v21, 0.0 }
 0x23a   : > { %2753 = vst [vmem:[#allocation3 + $0x20] sm:$0xff] %v2721_v23  ;;  %v2722_v28 = vmax.f32 %v2663_v22, %v2664_v24  ;;  %v2524_v29 = vpop.f32.mrb[12].mxu0  ;;  %v5960_v23 = vld [vmem:[%s7545_s3 + $0x100] ss:$8 sps:$4 sm:$0xff]  }
 0x23b   : > { %v2783_v30 = vld [vmem:[#allocation3 + $0x10] ss:$2 sm:$0xff]  ;;  %v2815_v31 = vld [vmem:[#allocation3 + $0x11] ss:$2 sm:$0xff]  ;;  %v5394_v32 = vadd.f32 %v2524_v29, %v6991_v46  ;;  %v2526_v33 = vpop.f32.mrb[13].mxu0 }
 0x23c   : > { %v2845_v35 = vmax.f32 %v2783_v30, %v2815_v31  ;;  %2754 = vst [vmem:[#allocation3 + $0x28] sm:$0xff] %v2722_v28  ;;  %v5395_v36 = vadd.f32 %v2526_v33, %v6995_v47  ;;  %v2528_v37 = vpop.f32.mrb[14].mxu0  ;;  %v5965_v29 = vld [vmem:[%s7545_s3 + $0x114] ss:$8 sps:$4 sm:$0xff]  }
 0x23d   : > { %v2665_v38 = vmax.f32 %v5394_v32, 0.0  ;;  %v5396_v39 = vadd.f32 %v2528_v37, %v6991_v46  ;;  %v2530_v40 = vpop.f32.mrb[15].mxu0 }
 0x23e   : > { %v2860_v41 = vpack.c.bf16 %v2845_v35, %v2844_v34  ;;  %v2666_v44 = vmax.f32 %v5395_v36, 0.0  ;;  %v5397_v48 = vadd.f32 %v2530_v40, %v6995_v47  ;;  %v5968_v40 = vld [vmem:[%s7545_s3 + $0x124] ss:$8 sps:$4 sm:$0xff]  }
 0x23f   : > { %v2667_v49 = vmax.f32 %v5396_v39, 0.0  ;;  %v5963_v39 = vld [vmem:[%s7545_s3 + $0x110] ss:$8 sps:$4 sm:$0xff]  }
 0x240   : > { %2868 = vst [vmem:[#allocation4] sm:$0x1f] %v2860_v41  ;;  %v2723_v50 = vmax.f32 %v2665_v38, %v2666_v44  ;;  %v2668_v51 = vmax.f32 %v5397_v48, 0.0  ;;  %v2877_v52 = vshrl.u32 %v2860_v41, 16  ;;  %v2879_v53 = vshll.u32 %v2860_v41, 16 }
 0x241   : > { %v2956_v54 = vrot.slane %v2860_v41, 1  ;;  %v3020_v55 = vrot.slane %v2860_v41, 2 }
 0x242   : > { %2755 = vst [vmem:[#allocation3 + $0x30] sm:$0xff] %v2723_v50  ;;  %v2724_v56 = vmax.f32 %v2667_v49, %v2668_v51  ;;  %v2534_v57 = vpop.f32.mrb[16].mxu0  ;;  %v2881_v58 = vrot.slane %v2879_v53, 1  ;;  %v2980_v59 = vrot.slane %v2877_v52, 1  ;;  %v2981_v60 = vrot.slane %v2879_v53, 2 }
 0x243   : > { %v5398_v61 = vadd.f32 %v2534_v57, %v6991_v46  ;;  %v2536_v62 = vpop.f32.mrb[17].mxu0  ;;  %2972 = vst [vmem:[#allocation4 + $0x10] sm:$0x1f] %v2956_v54  ;;  %3036 = vst [vmem:[#allocation4 + $0x20] sm:$0x1f] %v3020_v55 }
 0x244   : > { %2756 = vst [vmem:[#allocation3 + $0x38] sm:$0xff] %v2724_v56  ;;  %v5399_v63 = vadd.f32 %v2536_v62, %v6995_v47  ;;  %v2538_v0 = vpop.f32.mrb[18].mxu0  ;;  %v2882_v1 = vor.u32 %v2881_v58, %v2877_v52  ;;  %v2982_v2 = vor.u32 %v2981_v60, %v2980_v59  ;;  %v2785_v11 = vld [vmem:[#allocation3 + $0x20] ss:$2 sm:$0xff]  ;;  %v2817_v12 = vld [vmem:[#allocation3 + $0x21] ss:$2 sm:$0xff] }
 0x245   : > { %v2669_v3 = vmax.f32 %v5398_v61, 0.0  ;;  %v5400_v4 = vadd.f32 %v2538_v0, %v6991_v46  ;;  %v2540_v5 = vpop.f32.mrb[19].mxu0  ;;  %v2846_v19 = vmax.f32 %v2785_v11, %v2817_v12  ;;  %v5966_v58 = vld [vmem:[%s7545_s3 + $0x120] ss:$8 sps:$4 sm:$0xff]  }
 0x246   : > { %v2670_v6 = vmax.f32 %v5399_v63, 0.0  ;;  %v5401_v7 = vadd.f32 %v2540_v5, %v6995_v47  ;;  %2940 = vst [vmem:[#allocation4 + $0x8] sm:$0x1f] %v2882_v1  ;;  %3012 = vst [vmem:[#allocation4 + $0x18] sm:$0x1f] %v2982_v2 }
 0x247   : > { %v2671_v8 = vmax.f32 %v5400_v4, 0.0  ;;  %v3044_v33 = vld [vmem:[#allocation4] sm:$0xff]  ;;  %v5971_v63 = vld [vmem:[%s7545_s3 + $0x134] ss:$8 sps:$4 sm:$0xff]   ;;  %v5969_v5 = vld [vmem:[%s7545_s3 + $0x130] ss:$8 sps:$4 sm:$0xff]  }
 0x248   : > { %v2725_v9 = vmax.f32 %v2669_v3, %v2670_v6  ;;  %v2672_v10 = vmax.f32 %v5401_v7, 0.0 }
 0x24a   : > { %2757 = vst [vmem:[#allocation3 + $0x40] sm:$0xff] %v2725_v9  ;;  %v2726_v13 = vmax.f32 %v2671_v8, %v2672_v10  ;;  %v2544_v14 = vpop.f32.mrb[20].mxu0  ;;  %v5974_v8 = vld [vmem:[%s7545_s3 + $0x144] ss:$8 sps:$4 sm:$0xff]  }
 0x24b   : > { %v2787_v15 = vld [vmem:[#allocation3 + $0x30] ss:$2 sm:$0xff]  ;;  %v2819_v16 = vld [vmem:[#allocation3 + $0x31] ss:$2 sm:$0xff]  ;;  %v5402_v17 = vadd.f32 %v2544_v14, %v6991_v46  ;;  %v2546_v18 = vpop.f32.mrb[21].mxu0 }
 0x24c   : > { %v2847_v20 = vmax.f32 %v2787_v15, %v2819_v16  ;;  %2758 = vst [vmem:[#allocation3 + $0x48] sm:$0xff] %v2726_v13  ;;  %v5403_v21 = vadd.f32 %v2546_v18, %v6995_v47  ;;  %v2548_v22 = vpop.f32.mrb[22].mxu0 }
 0x24d   : > { %v2673_v24 = vmax.f32 %v5402_v17, 0.0  ;;  %v5404_v26 = vadd.f32 %v2548_v22, %v6991_v46  ;;  %v2550_v27 = vpop.f32.mrb[23].mxu0  ;;  %v3045_v28 = vld [vmem:[#allocation4 + $0x8] sm:$0xff] }
 0x24e   : > { %v2861_v30 = vpack.c.bf16 %v2847_v20, %v2846_v19  ;;  %v2674_v31 = vmax.f32 %v5403_v21, 0.0  ;;  %v5405_v32 = vadd.f32 %v2550_v27, %v6995_v47  ;;  %3608 = vmatprep.mubr.bf16.mxu1 %v3045_v28  ;;  %v5972_v19 = vld [vmem:[%s7545_s3 + $0x140] ss:$8 sps:$4 sm:$0xff]  }
 0x24f   : > { %v2675_v34 = vmax.f32 %v5404_v26, 0.0  ;;  %3609 = vmatmul.mubr.bf16.vlgmr.msra.gmra.mrb[0].mxu1 %v3044_v33 }
 0x250   : > { %2869 = vst [vmem:[#allocation4 + $0x28] sm:$0x1f] %v2861_v30  ;;  %v2727_v35 = vmax.f32 %v2673_v24, %v2674_v31  ;;  %v2676_v36 = vmax.f32 %v5405_v32, 0.0  ;;  %v2884_v37 = vshrl.u32 %v2861_v30, 16  ;;  %v2886_v38 = vshll.u32 %v2861_v30, 16  ;;  %3690 = vmatpush1.bf16.msra.mxu1 %v5960_v23 }
 0x251   : > { %3691 = vmatprep.subr.bf16.mxu1 %v5965_v29  ;;  %v2957_v41 = vrot.slane %v2861_v30, 1  ;;  %v3021_v44 = vrot.slane %v2861_v30, 2  ;;  %v5977_v24 = vld [vmem:[%s7545_s3 + $0x154] ss:$8 sps:$4 sm:$0xff]  }
 0x252   : > { %2759 = vst [vmem:[#allocation3 + $0x50] sm:$0xff] %v2727_v35  ;;  %v2728_v48 = vmax.f32 %v2675_v34, %v2676_v36  ;;  %v2554_v49 = vpop.f32.mrb[24].mxu0  ;;  %v2888_v50 = vrot.slane %v2886_v38, 1  ;;  %v2983_v51 = vrot.slane %v2884_v37, 1  ;;  %v2984_v52 = vrot.slane %v2886_v38, 2 }
 0x253   : > { %v5406_v53 = vadd.f32 %v2554_v49, %v6991_v46  ;;  %v2556_v54 = vpop.f32.mrb[25].mxu0  ;;  %2973 = vst [vmem:[#allocation4 + $0x38] sm:$0x1f] %v2957_v41  ;;  %3037 = vst [vmem:[#allocation4 + $0x48] sm:$0x1f] %v3021_v44 }
 0x254   : > { %2760 = vst [vmem:[#allocation3 + $0x58] sm:$0xff] %v2728_v48  ;;  %v5407_v55 = vadd.f32 %v2556_v54, %v6995_v47  ;;  %v2558_v56 = vpop.f32.mrb[26].mxu0  ;;  %v2889_v57 = vor.u32 %v2888_v50, %v2884_v37  ;;  %3692 = vmatpush1.bf16.msra.mxu1 %v5963_v39  ;;  %v2985_v59 = vor.u32 %v2984_v52, %v2983_v51  ;;  %v2789_v6 = vld [vmem:[#allocation3 + $0x40] ss:$2 sm:$0xff]  ;;  %v2821_v7 = vld [vmem:[#allocation3 + $0x41] ss:$2 sm:$0xff] }
 0x255   : > { %v2677_v60 = vmax.f32 %v5406_v53, 0.0  ;;  %v5408_v61 = vadd.f32 %v2558_v56, %v6991_v46  ;;  %v2560_v62 = vpop.f32.mrb[27].mxu0  ;;  %3693 = vmatprep.subr.bf16.mxu1 %v5968_v40  ;;  %v2848_v15 = vmax.f32 %v2789_v6, %v2821_v7  ;;  %v5975_v35 = vld [vmem:[%s7545_s3 + $0x150] ss:$8 sps:$4 sm:$0xff]   ;;  %v5980_v36 = vld [vmem:[%s7545_s3 + $0x164] ss:$8 sps:$4 sm:$0xff]  }
 0x256   : > { %v2678_v0 = vmax.f32 %v5407_v55, 0.0  ;;  %v5409_v1 = vadd.f32 %v2560_v62, %v6995_v47  ;;  %2941 = vst [vmem:[#allocation4 + $0x30] sm:$0x1f] %v2889_v57  ;;  %3013 = vst [vmem:[#allocation4 + $0x40] sm:$0x1f] %v2985_v59 }
 0x257   : > { %v2679_v2 = vmax.f32 %v5408_v61, 0.0  ;;  %v3049_v29 = vld [vmem:[#allocation4 + $0x28] sm:$0xff]  ;;  %v5983_v59 = vld [vmem:[%s7545_s3 + $0x174] ss:$8 sps:$4 sm:$0xff]  }
 0x258   : > { %v2729_v3 = vmax.f32 %v2677_v60, %v2678_v0  ;;  %v2680_v4 = vmax.f32 %v5409_v1, 0.0  ;;  %3694 = vmatpush1.bf16.msra.mxu1 %v5966_v58  ;;  %v5978_v54 = vld [vmem:[%s7545_s3 + $0x160] ss:$8 sps:$4 sm:$0xff]   ;;  %v5981_v1 = vld [vmem:[%s7545_s3 + $0x170] ss:$8 sps:$4 sm:$0xff]  }
 0x259   : > { %3695 = vmatprep.subr.bf16.mxu1 %v5971_v63 }
 0x25a   : > { %2761 = vst [vmem:[#allocation3 + $0x60] sm:$0xff] %v2729_v3  ;;  %v2730_v9 = vmax.f32 %v2679_v2, %v2680_v4  ;;  %v2564_v10 = vpop.f32.mrb[28].mxu0  ;;  %v5986_v4 = vld [vmem:[%s7545_s3 + $0x184] ss:$8 sps:$4 sm:$0xff]  }
 0x25b   : > { %v2791_v11 = vld [vmem:[#allocation3 + $0x50] ss:$2 sm:$0xff]  ;;  %v2823_v12 = vld [vmem:[#allocation3 + $0x51] ss:$2 sm:$0xff]  ;;  %v5410_v13 = vadd.f32 %v2564_v10, %v6991_v46  ;;  %v2566_v14 = vpop.f32.mrb[29].mxu0 }
 0x25c   : > { %v2849_v16 = vmax.f32 %v2791_v11, %v2823_v12  ;;  %2762 = vst [vmem:[#allocation3 + $0x68] sm:$0xff] %v2730_v9  ;;  %v5411_v17 = vadd.f32 %v2566_v14, %v6995_v47  ;;  %v2568_v18 = vpop.f32.mrb[30].mxu0  ;;  %3696 = vmatpush1.bf16.msra.mxu1 %v5969_v5 }
 0x25d   : > { %v2681_v20 = vmax.f32 %v5410_v13, 0.0  ;;  %v5412_v21 = vadd.f32 %v2568_v18, %v6991_v46  ;;  %v2570_v22 = vpop.f32.mrb[31].mxu0  ;;  %v3050_v23 = vld [vmem:[#allocation4 + $0x30] sm:$0xff]  ;;  %3697 = vmatprep.subr.bf16.mxu1 %v5974_v8 }
 0x25e   : > { %v2862_v26 = vpack.c.bf16 %v2849_v16, %v2848_v15  ;;  %v2682_v27 = vmax.f32 %v5411_v17, 0.0  ;;  %v5413_v28 = vadd.f32 %v2570_v22, %v6995_v47  ;;  %3618 = vmatprep.mubr.bf16.mxu1 %v3050_v23  ;;  %v5984_v15 = vld [vmem:[%s7545_s3 + $0x180] ss:$8 sps:$4 sm:$0xff]  }
 0x25f   : > { %v2683_v30 = vmax.f32 %v5412_v21, 0.0  ;;  %3619 = vmatmul.mubr.bf16.gmra.mrb[4].mxu1 %v3049_v29 }
 0x260   : > { %2870 = vst [vmem:[#allocation4 + $0x50] sm:$0x1f] %v2862_v26  ;;  %v2731_v31 = vmax.f32 %v2681_v20, %v2682_v27  ;;  %v2684_v32 = vmax.f32 %v5413_v28, 0.0  ;;  %v2891_v33 = vshrl.u32 %v2862_v26, 16  ;;  %v2893_v34 = vshll.u32 %v2862_v26, 16  ;;  %3698 = vmatpush1.bf16.msra.mxu1 %v5972_v19 }
 0x261   : > { %3699 = vmatprep.subr.bf16.mxu1 %v5977_v24  ;;  %v2958_v37 = vrot.slane %v2862_v26, 1  ;;  %v3022_v38 = vrot.slane %v2862_v26, 2  ;;  %v5989_v20 = vld [vmem:[%s7545_s3 + $0x194] ss:$8 sps:$4 sm:$0xff]  }
 0x262   : > { %2763 = vst [vmem:[#allocation3 + $0x70] sm:$0xff] %v2731_v31  ;;  %v2732_v39 = vmax.f32 %v2683_v30, %v2684_v32  ;;  %v2574_v40 = vpop.f32.mrb[32].mxu0  ;;  %v2895_v41 = vrot.slane %v2893_v34, 1  ;;  %v2986_v44 = vrot.slane %v2891_v33, 1  ;;  %v2987_v48 = vrot.slane %v2893_v34, 2 }
 0x263   : > { %v5414_v49 = vadd.f32 %v2574_v40, %v6991_v46  ;;  %v2576_v50 = vpop.f32.mrb[33].mxu0  ;;  %2974 = vst [vmem:[#allocation4 + $0x60] sm:$0x1f] %v2958_v37  ;;  %3038 = vst [vmem:[#allocation4 + $0x70] sm:$0x1f] %v3022_v38 }
 0x264   : > { %2764 = vst [vmem:[#allocation3 + $0x78] sm:$0xff] %v2732_v39  ;;  %v5415_v51 = vadd.f32 %v2576_v50, %v6995_v47  ;;  %v2578_v52 = vpop.f32.mrb[34].mxu0  ;;  %v2896_v53 = vor.u32 %v2895_v41, %v2891_v33  ;;  %3700 = vmatpush1.bf16.msra.mxu1 %v5975_v35  ;;  %v2988_v55 = vor.u32 %v2987_v48, %v2986_v44  ;;  %v2793_v2 = vld [vmem:[#allocation3 + $0x60] ss:$2 sm:$0xff]  ;;  %v2825_v3 = vld [vmem:[#allocation3 + $0x61] ss:$2 sm:$0xff] }
 0x265   : > { %v2685_v56 = vmax.f32 %v5414_v49, 0.0  ;;  %v5416_v57 = vadd.f32 %v2578_v52, %v6991_v46  ;;  %v2580_v58 = vpop.f32.mrb[35].mxu0  ;;  %3701 = vmatprep.subr.bf16.mxu1 %v5980_v36  ;;  %v2850_v11 = vmax.f32 %v2793_v2, %v2825_v3  ;;  %v5987_v31 = vld [vmem:[%s7545_s3 + $0x190] ss:$8 sps:$4 sm:$0xff]   ;;  %v5992_v32 = vld [vmem:[%s7545_s3 + $0x1a4] ss:$8 sps:$4 sm:$0xff]  }
 0x266   : > { %v2686_v60 = vmax.f32 %v5415_v51, 0.0  ;;  %v5417_v61 = vadd.f32 %v2580_v58, %v6995_v47  ;;  %2942 = vst [vmem:[#allocation4 + $0x58] sm:$0x1f] %v2896_v53  ;;  %3014 = vst [vmem:[#allocation4 + $0x68] sm:$0x1f] %v2988_v55 }
 0x267   : > { %v2687_v62 = vmax.f32 %v5416_v57, 0.0  ;;  %v3054_v24 = vld [vmem:[#allocation4 + $0x50] sm:$0xff]  ;;  %v5990_v50 = vld [vmem:[%s7545_s3 + $0x1a0] ss:$8 sps:$4 sm:$0xff]  }
 0x268   : > { %v2733_v63 = vmax.f32 %v2685_v56, %v2686_v60  ;;  %v2688_v0 = vmax.f32 %v5417_v61, 0.0  ;;  %3702 = vmatpush1.bf16.msra.mxu1 %v5978_v54  ;;  %v5995_v55 = vld [vmem:[%s7545_s3 + $0x1b4] ss:$8 sps:$4 sm:$0xff]   ;;  %v5993_v61 = vld [vmem:[%s7545_s3 + $0x1b0] ss:$8 sps:$4 sm:$0xff]  }
 0x269   : > { %3703 = vmatprep.subr.bf16.mxu1 %v5983_v59 }
 0x26a   : > { %2765 = vst [vmem:[#allocation3 + $0x80] sm:$0xff] %v2733_v63  ;;  %v2734_v5 = vmax.f32 %v2687_v62, %v2688_v0  ;;  %v2584_v6 = vpop.f32.mrb[36].mxu0  ;;  %v5998_v0 = vld [vmem:[%s7545_s3 + $0x1c4] ss:$8 sps:$4 sm:$0xff]  }
 0x26b   : > { %v2795_v7 = vld [vmem:[#allocation3 + $0x70] ss:$2 sm:$0xff]  ;;  %v2827_v8 = vld [vmem:[#allocation3 + $0x71] ss:$2 sm:$0xff]  ;;  %v5418_v9 = vadd.f32 %v2584_v6, %v6991_v46  ;;  %v2586_v10 = vpop.f32.mrb[37].mxu0 }
 0x26c   : > { %v2851_v12 = vmax.f32 %v2795_v7, %v2827_v8  ;;  %2766 = vst [vmem:[#allocation3 + $0x88] sm:$0xff] %v2734_v5  ;;  %v5419_v13 = vadd.f32 %v2586_v10, %v6995_v47  ;;  %v2588_v14 = vpop.f32.mrb[38].mxu0  ;;  %3704 = vmatpush1.bf16.msra.mxu1 %v5981_v1 }
 0x26d   : > { %v2689_v16 = vmax.f32 %v5418_v9, 0.0  ;;  %v5420_v17 = vadd.f32 %v2588_v14, %v6991_v46  ;;  %v2590_v18 = vpop.f32.mrb[39].mxu0  ;;  %v3055_v19 = vld [vmem:[#allocation4 + $0x58] sm:$0xff]  ;;  %3705 = vmatprep.subr.bf16.mxu1 %v5986_v4 }
 0x26e   : > { %v2863_v21 = vpack.c.bf16 %v2851_v12, %v2850_v11  ;;  %v2690_v22 = vmax.f32 %v5419_v13, 0.0  ;;  %v5421_v23 = vadd.f32 %v2590_v18, %v6995_v47  ;;  %3628 = vmatprep.mubr.bf16.mxu1 %v3055_v19  ;;  %v5996_v11 = vld [vmem:[%s7545_s3 + $0x1c0] ss:$8 sps:$4 sm:$0xff]  }
 0x26f   : > { %v2691_v26 = vmax.f32 %v5420_v17, 0.0  ;;  %3629 = vmatmul.mubr.bf16.gmra.mrb[8].mxu1 %v3054_v24 }
 0x270   : > { %2871 = vst [vmem:[#allocation4 + $0x78] sm:$0x1f] %v2863_v21  ;;  %v2735_v27 = vmax.f32 %v2689_v16, %v2690_v22  ;;  %v2692_v28 = vmax.f32 %v5421_v23, 0.0  ;;  %v2898_v29 = vshrl.u32 %v2863_v21, 16  ;;  %v2900_v30 = vshll.u32 %v2863_v21, 16  ;;  %3706 = vmatpush1.bf16.msra.mxu1 %v5984_v15 }
 0x271   : > { %3707 = vmatprep.subr.bf16.mxu1 %v5989_v20  ;;  %v2959_v33 = vrot.slane %v2863_v21, 1  ;;  %v3023_v34 = vrot.slane %v2863_v21, 2  ;;  %v6001_v16 = vld [vmem:[%s7545_s3 + $0x1d4] ss:$8 sps:$4 sm:$0xff]  }
 0x272   : > { %2767 = vst [vmem:[#allocation3 + $0x90] sm:$0xff] %v2735_v27  ;;  %v2736_v35 = vmax.f32 %v2691_v26, %v2692_v28  ;;  %v2594_v36 = vpop.f32.mrb[40].mxu0  ;;  %v2902_v37 = vrot.slane %v2900_v30, 1  ;;  %v2989_v38 = vrot.slane %v2898_v29, 1  ;;  %v2990_v39 = vrot.slane %v2900_v30, 2 }
 0x273   : > { %v5422_v40 = vadd.f32 %v2594_v36, %v6991_v46  ;;  %v2596_v41 = vpop.f32.mrb[41].mxu0  ;;  %2975 = vst [vmem:[#allocation4 + $0x88] sm:$0x1f] %v2959_v33  ;;  %3039 = vst [vmem:[#allocation4 + $0x98] sm:$0x1f] %v3023_v34 }
 0x274   : > { %2768 = vst [vmem:[#allocation3 + $0x98] sm:$0xff] %v2736_v35  ;;  %v5423_v44 = vadd.f32 %v2596_v41, %v6995_v47  ;;  %v2598_v48 = vpop.f32.mrb[42].mxu0  ;;  %v2903_v49 = vor.u32 %v2902_v37, %v2898_v29  ;;  %3708 = vmatpush1.bf16.msra.mxu1 %v5987_v31  ;;  %v2991_v51 = vor.u32 %v2990_v39, %v2989_v38  ;;  %v2797_v62 = vld [vmem:[#allocation3 + $0x80] ss:$2 sm:$0xff]  ;;  %v2829_v63 = vld [vmem:[#allocation3 + $0x81] ss:$2 sm:$0xff] }
 0x275   : > { %v2693_v52 = vmax.f32 %v5422_v40, 0.0  ;;  %v5424_v53 = vadd.f32 %v2598_v48, %v6991_v46  ;;  %v2600_v54 = vpop.f32.mrb[43].mxu0  ;;  %3709 = vmatprep.subr.bf16.mxu1 %v5992_v32  ;;  %v2852_v7 = vmax.f32 %v2797_v62, %v2829_v63  ;;  %v5999_v27 = vld [vmem:[%s7545_s3 + $0x1d0] ss:$8 sps:$4 sm:$0xff]   ;;  %v6004_v28 = vld [vmem:[%s7545_s3 + $0x1e4] ss:$8 sps:$4 sm:$0xff]  }
 0x276   : > { %v2694_v56 = vmax.f32 %v5423_v44, 0.0  ;;  %v5425_v57 = vadd.f32 %v2600_v54, %v6995_v47  ;;  %2943 = vst [vmem:[#allocation4 + $0x80] sm:$0x1f] %v2903_v49  ;;  %3015 = vst [vmem:[#allocation4 + $0x90] sm:$0x1f] %v2991_v51 }
 0x277   : > { %v2695_v58 = vmax.f32 %v5424_v53, 0.0  ;;  %v3059_v20 = vld [vmem:[#allocation4 + $0x78] sm:$0xff]  ;;  %v6002_v41 = vld [vmem:[%s7545_s3 + $0x1e0] ss:$8 sps:$4 sm:$0xff]  }
 0x278   : > { %v2737_v59 = vmax.f32 %v2693_v52, %v2694_v56  ;;  %v2696_v60 = vmax.f32 %v5425_v57, 0.0  ;;  %3710 = vmatpush1.bf16.msra.mxu1 %v5990_v50  ;;  %v6007_v51 = vld [vmem:[%s7545_s3 + $0x1f4] ss:$8 sps:$4 sm:$0xff]   ;;  %v6005_v57 = vld [vmem:[%s7545_s3 + $0x1f0] ss:$8 sps:$4 sm:$0xff]  }
 0x279   : > { %3711 = vmatprep.subr.bf16.mxu1 %v5995_v55 }
 0x27a   : > { %2769 = vst [vmem:[#allocation3 + $0xa0] sm:$0xff] %v2737_v59  ;;  %v2738_v1 = vmax.f32 %v2695_v58, %v2696_v60  ;;  %v2604_v2 = vpop.f32.mrb[44].mxu0  ;;  %v6010_v60 = vld [vmem:[%s7545_s3 + $0x204] ss:$8 sps:$4 sm:$0xff]  }
 0x27b   : > { %v2799_v3 = vld [vmem:[#allocation3 + $0x90] ss:$2 sm:$0xff]  ;;  %v2831_v4 = vld [vmem:[#allocation3 + $0x91] ss:$2 sm:$0xff]  ;;  %v5426_v5 = vadd.f32 %v2604_v2, %v6991_v46  ;;  %v2606_v6 = vpop.f32.mrb[45].mxu0 }
 0x27c   : > { %v2853_v8 = vmax.f32 %v2799_v3, %v2831_v4  ;;  %2770 = vst [vmem:[#allocation3 + $0xa8] sm:$0xff] %v2738_v1  ;;  %v5427_v9 = vadd.f32 %v2606_v6, %v6995_v47  ;;  %v2608_v10 = vpop.f32.mrb[46].mxu0  ;;  %3712 = vmatpush1.bf16.msra.mxu1 %v5993_v61 }
 0x27d   : > { %v2697_v12 = vmax.f32 %v5426_v5, 0.0  ;;  %v5428_v13 = vadd.f32 %v2608_v10, %v6991_v46  ;;  %v2610_v14 = vpop.f32.mrb[47].mxu0  ;;  %v3060_v15 = vld [vmem:[#allocation4 + $0x80] sm:$0xff]  ;;  %3713 = vmatprep.subr.bf16.mxu1 %v5998_v0 }
 0x27e   : > { %v2864_v17 = vpack.c.bf16 %v2853_v8, %v2852_v7  ;;  %v2698_v18 = vmax.f32 %v5427_v9, 0.0  ;;  %v5429_v19 = vadd.f32 %v2610_v14, %v6995_v47  ;;  %3638 = vmatprep.mubr.bf16.mxu1 %v3060_v15 }
 0x27f   : > { %v2699_v21 = vmax.f32 %v5428_v13, 0.0  ;;  %3639 = vmatmul.mubr.bf16.gmra.mrb[12].mxu1 %v3059_v20 }
 0x280   : > { %2872 = vst [vmem:[#allocation4 + $0xa0] sm:$0x1f] %v2864_v17  ;;  %v2739_v22 = vmax.f32 %v2697_v12, %v2698_v18  ;;  %v2700_v23 = vmax.f32 %v5429_v19, 0.0  ;;  %v2905_v24 = vshrl.u32 %v2864_v17, 16  ;;  %v2907_v26 = vshll.u32 %v2864_v17, 16  ;;  %3714 = vmatpush1.bf16.msra.mxu1 %v5996_v11 }
 0x281   : > { %3715 = vmatprep.subr.bf16.mxu1 %v6001_v16  ;;  %v2960_v29 = vrot.slane %v2864_v17, 1  ;;  %v3024_v30 = vrot.slane %v2864_v17, 2 }
 0x282   : > { %2771 = vst [vmem:[#allocation3 + $0xb0] sm:$0xff] %v2739_v22  ;;  %v2740_v31 = vmax.f32 %v2699_v21, %v2700_v23  ;;  %v2614_v32 = vpop.f32.mrb[48].mxu0  ;;  %v2909_v33 = vrot.slane %v2907_v26, 1  ;;  %v2992_v34 = vrot.slane %v2905_v24, 1  ;;  %v2993_v35 = vrot.slane %v2907_v26, 2 }
 0x283   : > { %v5430_v36 = vadd.f32 %v2614_v32, %v6991_v46  ;;  %v2616_v37 = vpop.f32.mrb[49].mxu0  ;;  %2976 = vst [vmem:[#allocation4 + $0xb0] sm:$0x1f] %v2960_v29  ;;  %3040 = vst [vmem:[#allocation4 + $0xc0] sm:$0x1f] %v3024_v30 }
 0x284   : > { %2772 = vst [vmem:[#allocation3 + $0xb8] sm:$0xff] %v2740_v31  ;;  %v5431_v38 = vadd.f32 %v2616_v37, %v6995_v47  ;;  %v2618_v39 = vpop.f32.mrb[50].mxu0  ;;  %v2910_v40 = vor.u32 %v2909_v33, %v2905_v24  ;;  %3716 = vmatpush1.bf16.msra.mxu1 %v5999_v27  ;;  %v2994_v44 = vor.u32 %v2993_v35, %v2992_v34  ;;  %v2801_v58 = vld [vmem:[#allocation3 + $0xa0] ss:$2 sm:$0xff]  ;;  %v2833_v59 = vld [vmem:[#allocation3 + $0xa1] ss:$2 sm:$0xff] }
 0x285   : > { %v2701_v48 = vmax.f32 %v5430_v36, 0.0  ;;  %v5432_v49 = vadd.f32 %v2618_v39, %v6991_v46  ;;  %v2620_v50 = vpop.f32.mrb[51].mxu0  ;;  %3717 = vmatprep.subr.bf16.mxu1 %v6004_v28  ;;  %v2854_v3 = vmax.f32 %v2801_v58, %v2833_v59 }
 0x286   : > { %v2702_v52 = vmax.f32 %v5431_v38, 0.0  ;;  %v5433_v53 = vadd.f32 %v2620_v50, %v6995_v47  ;;  %2944 = vst [vmem:[#allocation4 + $0xa8] sm:$0x1f] %v2910_v40  ;;  %3016 = vst [vmem:[#allocation4 + $0xb8] sm:$0x1f] %v2994_v44 }
 0x287   : > { %v2703_v54 = vmax.f32 %v5432_v49, 0.0  ;;  %v3064_v14 = vld [vmem:[#allocation4 + $0xa0] sm:$0xff] }
 0x288   : > { %v2741_v55 = vmax.f32 %v2701_v48, %v2702_v52  ;;  %v2704_v56 = vmax.f32 %v5433_v53, 0.0  ;;  %3718 = vmatpush1.bf16.msra.mxu1 %v6002_v41 }
 0x289   : > { %3719 = vmatprep.subr.bf16.mxu1 %v6007_v51 }
 0x28a   : > { %2773 = vst [vmem:[#allocation3 + $0xc0] sm:$0xff] %v2741_v55  ;;  %v2742_v61 = vmax.f32 %v2703_v54, %v2704_v56  ;;  %v2624_v62 = vpop.f32.mrb[52].mxu0 }
 0x28b   : > { %v2803_v63 = vld [vmem:[#allocation3 + $0xb0] ss:$2 sm:$0xff]  ;;  %v2835_v0 = vld [vmem:[#allocation3 + $0xb1] ss:$2 sm:$0xff]  ;;  %v5434_v1 = vadd.f32 %v2624_v62, %v6991_v46  ;;  %v2626_v2 = vpop.f32.mrb[53].mxu0 }
 0x28c   : > { %v2855_v4 = vmax.f32 %v2803_v63, %v2835_v0  ;;  %2774 = vst [vmem:[#allocation3 + $0xc8] sm:$0xff] %v2742_v61  ;;  %v5435_v5 = vadd.f32 %v2626_v2, %v6995_v47  ;;  %v2628_v6 = vpop.f32.mrb[54].mxu0  ;;  %3720 = vmatpush1.bf16.msra.mxu1 %v6005_v57 }
 0x28d   : > { %v2705_v7 = vmax.f32 %v5434_v1, 0.0  ;;  %v5436_v8 = vadd.f32 %v2628_v6, %v6991_v46  ;;  %v2630_v9 = vpop.f32.mrb[55].mxu0  ;;  %v3065_v10 = vld [vmem:[#allocation4 + $0xa8] sm:$0xff]  ;;  %3802 = vmatprep.subr.bf16.mxu1 %v6010_v60 }
 0x28e   : > { %v2865_v11 = vpack.c.bf16 %v2855_v4, %v2854_v3  ;;  %v2706_v12 = vmax.f32 %v5435_v5, 0.0  ;;  %v5437_v13 = vadd.f32 %v2630_v9, %v6995_v47  ;;  %3648 = vmatprep.mubr.bf16.mxu1 %v3065_v10 }
 0x28f   : > { %v2707_v15 = vmax.f32 %v5436_v8, 0.0  ;;  %3649 = vmatmul.mubr.bf16.gmra.mrb[16].mxu1 %v3064_v14 }
 0x290   : > { %2873 = vst [vmem:[#allocation4 + $0xc8] sm:$0x1f] %v2865_v11  ;;  %v2743_v16 = vmax.f32 %v2705_v7, %v2706_v12  ;;  %v2708_v17 = vmax.f32 %v5437_v13, 0.0  ;;  %v2912_v18 = vshrl.u32 %v2865_v11, 16  ;;  %v2914_v19 = vshll.u32 %v2865_v11, 16 }
 0x291   : > { %v2961_v20 = vrot.slane %v2865_v11, 1  ;;  %v3025_v21 = vrot.slane %v2865_v11, 2 }
 0x292   : > { %2775 = vst [vmem:[#allocation3 + $0xd0] sm:$0xff] %v2743_v16  ;;  %v2744_v22 = vmax.f32 %v2707_v15, %v2708_v17  ;;  %v2634_v23 = vpop.f32.mrb[56].mxu0  ;;  %v2916_v24 = vrot.slane %v2914_v19, 1  ;;  %v2995_v26 = vrot.slane %v2912_v18, 1  ;;  %v2996_v27 = vrot.slane %v2914_v19, 2 }
 0x293   : > { %v5438_v28 = vadd.f32 %v2634_v23, %v6991_v46  ;;  %v2636_v29 = vpop.f32.mrb[57].mxu0  ;;  %2977 = vst [vmem:[#allocation4 + $0xd8] sm:$0x1f] %v2961_v20  ;;  %3041 = vst [vmem:[#allocation4 + $0xe8] sm:$0x1f] %v3025_v21 }
 0x294   : > { %2776 = vst [vmem:[#allocation3 + $0xd8] sm:$0xff] %v2744_v22  ;;  %v5439_v30 = vadd.f32 %v2636_v29, %v6995_v47  ;;  %v2638_v31 = vpop.f32.mrb[58].mxu0  ;;  %v2917_v32 = vor.u32 %v2916_v24, %v2912_v18  ;;  %v2997_v33 = vor.u32 %v2996_v27, %v2995_v26  ;;  %v2805_v44 = vld [vmem:[#allocation3 + $0xc0] ss:$2 sm:$0xff]  ;;  %v2837_v48 = vld [vmem:[#allocation3 + $0xc1] ss:$2 sm:$0xff] }
 0x295   : > { %v2709_v34 = vmax.f32 %v5438_v28, 0.0  ;;  %v5440_v35 = vadd.f32 %v2638_v31, %v6991_v46  ;;  %v2640_v36 = vpop.f32.mrb[59].mxu0  ;;  %v2856_v55 = vmax.f32 %v2805_v44, %v2837_v48  ;;  %v6014_v44 = vld [vmem:[%s7545_s3 + $0x220] ss:$8 sps:$4 sm:$0xff]   ;;  %v6019_v48 = vld [vmem:[%s7545_s3 + $0x234] ss:$8 sps:$4 sm:$0xff]  }
 0x296   : > { %v2710_v37 = vmax.f32 %v5439_v30, 0.0  ;;  %v5441_v38 = vadd.f32 %v2640_v36, %v6995_v47  ;;  %2945 = vst [vmem:[#allocation4 + $0xd0] sm:$0x1f] %v2917_v32  ;;  %3017 = vst [vmem:[#allocation4 + $0xe0] sm:$0x1f] %v2997_v33 }
 0x297   : > { %v2711_v39 = vmax.f32 %v5440_v35, 0.0  ;;  %v3069_v2 = vld [vmem:[#allocation4 + $0xc8] sm:$0xff]  ;;  %v3047_v35 = vld [vmem:[#allocation4 + $0x18] sm:$0xff] }
 0x298   : > { %v2745_v40 = vmax.f32 %v2709_v34, %v2710_v37  ;;  %v2712_v41 = vmax.f32 %v5441_v38, 0.0  ;;  %v6008_v36 = vld [vmem:[%s7545_s3 + $0x200] ss:$8 sps:$4 sm:$0xff]   ;;  %v6013_v37 = vld [vmem:[%s7545_s3 + $0x214] ss:$8 sps:$4 sm:$0xff]  }
 0x299   : > { %v3046_v38 = vld [vmem:[#allocation4 + $0x10] sm:$0xff] }
 0x29a   : > { %2777 = vst [vmem:[#allocation3 + $0xe0] sm:$0xff] %v2745_v40  ;;  %v2746_v49 = vmax.f32 %v2711_v39, %v2712_v41  ;;  %v2644_v50 = vpop.f32.mrb[60].mxu0  ;;  %v3052_v39 = vld [vmem:[#allocation4 + $0x40] sm:$0xff]  ;;  %v6011_v40 = vld [vmem:[%s7545_s3 + $0x210] ss:$8 sps:$4 sm:$0xff]  }
 0x29b   : > { %v2807_v51 = vld [vmem:[#allocation3 + $0xd0] ss:$2 sm:$0xff]  ;;  %v2839_v52 = vld [vmem:[#allocation3 + $0xd1] ss:$2 sm:$0xff]  ;;  %v5442_v53 = vadd.f32 %v2644_v50, %v6991_v46  ;;  %v2646_v54 = vpop.f32.mrb[61].mxu0  ;;  %v3057_v50 = vld [vmem:[#allocation4 + $0x68] sm:$0xff] }
 0x29c   : > { %v2857_v56 = vmax.f32 %v2807_v51, %v2839_v52  ;;  %2778 = vst [vmem:[#allocation3 + $0xe8] sm:$0xff] %v2746_v49  ;;  %v5443_v57 = vadd.f32 %v2646_v54, %v6995_v47  ;;  %v2648_v58 = vpop.f32.mrb[62].mxu0  ;;  %v6016_v41 = vld [vmem:[%s7545_s3 + $0x224] ss:$8 sps:$4 sm:$0xff]   ;;  %v3051_v49 = vld [vmem:[#allocation4 + $0x38] sm:$0xff] }
 0x29d   : > { %v2713_v59 = vmax.f32 %v5442_v53, 0.0  ;;  %v5444_v60 = vadd.f32 %v2648_v58, %v6991_v46  ;;  %v2650_v61 = vpop.f32.mrb[63].mxu0  ;;  %v3070_v62 = vld [vmem:[#allocation4 + $0xd0] sm:$0xff]  ;;  %v6022_v52 = vld [vmem:[%s7545_s3 + $0x244] ss:$8 sps:$4 sm:$0xff]  }
 0x29e   : > { %v2866_v63 = vpack.c.bf16 %v2857_v56, %v2856_v55  ;;  %v2714_v0 = vmax.f32 %v5443_v57, 0.0  ;;  %v5445_v1 = vadd.f32 %v2650_v61, %v6995_v47  ;;  %3658 = vmatprep.mubr.bf16.mxu1 %v3070_v62  ;;  %v6017_v51 = vld [vmem:[%s7545_s3 + $0x230] ss:$8 sps:$4 sm:$0xff]   ;;  %v6020_v53 = vld [vmem:[%s7545_s3 + $0x240] ss:$8 sps:$4 sm:$0xff]  }
 0x29f   : > { %v2715_v3 = vmax.f32 %v5444_v60, 0.0  ;;  %3659 = vmatmul.mubr.bf16.gmra.mrb[20].mxu1 %v3069_v2  ;;  %v6025_v54 = vld [vmem:[%s7545_s3 + $0x254] ss:$8 sps:$4 sm:$0xff]   ;;  %v3056_v55 = vld [vmem:[#allocation4 + $0x60] sm:$0xff]  ;;  %v6023_v57 = vld [vmem:[%s7545_s3 + $0x250] ss:$8 sps:$4 sm:$0xff]  }
 0x2a0   : > { %2874 = vst [vmem:[#allocation4 + $0xf0] sm:$0x1f] %v2866_v63  ;;  %v2747_v4 = vmax.f32 %v2713_v59, %v2714_v0  ;;  %v2716_v5 = vmax.f32 %v5445_v1, 0.0  ;;  %v2919_v6 = vshrl.u32 %v2866_v63, 16  ;;  %v2921_v7 = vshll.u32 %v2866_v63, 16  ;;  %v3062_v56 = vld [vmem:[#allocation4 + $0x90] sm:$0xff] }
 0x2a1   : > { %v2962_v8 = vrot.slane %v2866_v63, 1  ;;  %v3026_v9 = vrot.slane %v2866_v63, 2  ;;  %v6028_v58 = vld [vmem:[%s7545_s3 + $0x264] ss:$8 sps:$4 sm:$0xff]   ;;  %v6026_v59 = vld [vmem:[%s7545_s3 + $0x260] ss:$8 sps:$4 sm:$0xff]  }
 0x2a2   : > { %2779 = vst [vmem:[#allocation3 + $0xf0] sm:$0xff] %v2747_v4  ;;  %v2748_v10 = vmax.f32 %v2715_v3, %v2716_v5  ;;  %v2923_v46 = vrot.slane %v2921_v7, 1  ;;  %v2998_v11 = vrot.slane %v2919_v6, 1  ;;  %v2999_v12 = vrot.slane %v2921_v7, 2  ;;  %v6031_v60 = vld [vmem:[%s7545_s3 + $0x274] ss:$8 sps:$4 sm:$0xff]  }
 0x2a3   : > { %2978 = vst [vmem:[#allocation4 + $0x100] sm:$0x1f] %v2962_v8  ;;  %3042 = vst [vmem:[#allocation4 + $0x110] sm:$0x1f] %v3026_v9  ;;  %v2809_v14 = vld [vmem:[#allocation3 + $0xe0] ss:$2 sm:$0xff] }
 0x2a4   : > { %2780 = vst [vmem:[#allocation3 + $0xf8] sm:$0xff] %v2748_v10  ;;  %v2924_v47 = vor.u32 %v2923_v46, %v2919_v6  ;;  %v3000_v13 = vor.u32 %v2999_v12, %v2998_v11  ;;  %v2841_v15 = vld [vmem:[#allocation3 + $0xe1] ss:$2 sm:$0xff]  ;;  %v3067_v62 = vld [vmem:[#allocation4 + $0xb8] sm:$0xff]  ;;  %v3066_v0 = vld [vmem:[#allocation4 + $0xb0] sm:$0xff] }
 0x2a5   : > { %v2858_v18 = vmax.f32 %v2809_v14, %v2841_v15  ;;  %v3061_v61 = vld [vmem:[#allocation4 + $0x88] sm:$0xff]  ;;  %v6029_v63 = vld [vmem:[%s7545_s3 + $0x270] ss:$8 sps:$4 sm:$0xff]   ;;  %v3072_v1 = vld [vmem:[#allocation4 + $0xe0] sm:$0xff] }
 0x2a6   : > { %2946 = vst [vmem:[#allocation4 + $0xf8] sm:$0x1f] %v2924_v47  ;;  %3018 = vst [vmem:[#allocation4 + $0x108] sm:$0x1f] %v3000_v13  ;;  %v3071_v2 = vld [vmem:[#allocation4 + $0xd8] sm:$0xff]  ;;  %v3048_v7 = vld [vmem:[#allocation4 + $0x20] sm:$0xff] }
 0x2a7   : > { %v3074_v22 = vld [vmem:[#allocation4 + $0xf0] sm:$0xff]  ;;  %v3053_v8 = vld [vmem:[#allocation4 + $0x48] sm:$0xff]  ;;  %v3063_v10 = vld [vmem:[#allocation4 + $0x98] sm:$0xff] }
 0x2a8   : > { %v3058_v9 = vld [vmem:[#allocation4 + $0x70] sm:$0xff]  ;;  %v3068_v46 = vld [vmem:[#allocation4 + $0xc0] sm:$0xff]  ;;  %v3073_v11 = vld [vmem:[#allocation4 + $0xe8] sm:$0xff] }
 0x2a9   : > { %v6032_v13 = vld [vmem:[%s7547_s5 + $0x40] sm:$0xff]   ;;  %v6034_v15 = vld [vmem:[%s7547_s5 + $0x48] sm:$0xff]  }
 0x2aa   : > { %v3076_v4 = vld [vmem:[#allocation4 + $0x100] sm:$0xff]  ;;  %v3078_v12 = vld [vmem:[#allocation4 + $0x110] sm:$0xff] }
 0x2ab   : > { %v2811_v16 = vld [vmem:[#allocation3 + $0xf0] ss:$2 sm:$0xff]  ;;  %v2843_v17 = vld [vmem:[#allocation3 + $0xf1] ss:$2 sm:$0xff]  ;;  %v6033_v14 = vld [vmem:[%s7547_s5] sm:$0xff]  }
 0x2ac   : > { %v2859_v19 = vmax.f32 %v2811_v16, %v2843_v17  ;;  %v6036_v16 = vld [vmem:[%s7547_s5 + $0x50] sm:$0xff]  }
 0x2ad   : > { %v3075_v20 = vld [vmem:[#allocation4 + $0xf8] sm:$0xff]  ;;  %v3077_v3 = vld [vmem:[#allocation4 + $0x108] sm:$0xff]  ;;  %v6037_v17 = vld [vmem:[%s7547_s5 + $0x10] sm:$0xff]  }
 0x2ae   : > { %v2867_v21 = vpack.c.bf16 %v2859_v19, %v2858_v18  ;;  %3668 = vmatprep.mubr.bf16.mxu1 %v3075_v20  ;;  %v6038_v18 = vld [vmem:[%s7547_s5 + $0x58] sm:$0xff]   ;;  %v6040_v20 = vld [vmem:[%s7547_s5 + $0x60] sm:$0xff]  }
 0x2af   : > { %3669 = vmatmul.mubr.bf16.gmra.mrb[24].mxu1 %v3074_v22  ;;  %v6039_v19 = vld [vmem:[%s7547_s5 + $0x18] sm:$0xff]   ;;  %v6042_v22 = vld [vmem:[%s7547_s5 + $0x68] sm:$0xff]  }
 0x2b0   : > { %2875 = vst [vmem:[#allocation4 + $0x118] sm:$0x1f] %v2867_v21  ;;  %v2926_v23 = vshrl.u32 %v2867_v21, 16  ;;  %v2928_v24 = vshll.u32 %v2867_v21, 16  ;;  %v2963_v26 = vrot.slane %v2867_v21, 1  ;;  %v3027_v27 = vrot.slane %v2867_v21, 2 }
 0x2b1   : > { %v6041_v21 = vld [vmem:[%s7547_s5 + $0x20] sm:$0xff]  }
 0x2b2   : > { %v2930_v28 = vrot.slane %v2928_v24, 1  ;;  %v3001_v29 = vrot.slane %v2926_v23, 1  ;;  %v3002_v30 = vrot.slane %v2928_v24, 2  ;;  %2979 = vst [vmem:[#allocation4 + $0x128] sm:$0x1f] %v2963_v26  ;;  %v6044_v24 = vld [vmem:[%s7547_s5 + $0x70] sm:$0xff]  }
 0x2b3   : > { %3043 = vst [vmem:[#allocation4 + $0x138] sm:$0x1f] %v3027_v27  ;;  %v6045_v26 = vld [vmem:[%s7547_s5 + $0x30] sm:$0xff]   ;;  %v6046_v27 = vld [vmem:[%s7547_s5 + $0x78] sm:$0xff]  }
 0x2b4   : > { %v2931_v31 = vor.u32 %v2930_v28, %v2926_v23  ;;  %v3003_v32 = vor.u32 %v3002_v30, %v3001_v29  ;;  %v6043_v23 = vld [vmem:[%s7547_s5 + $0x28] sm:$0xff]   ;;  %v6047_v28 = vld [vmem:[%s7547_s5 + $0x38] sm:$0xff]   ;;  %v6050_v29 = vld [vmem:[%s7547_s5 + $0xc0] sm:$0xff]  }
 0x2b5   : > { %v3164_v30 = vld [vmem:[%s7546_s4] sm:$0x3] }
 0x2b6   : > { %2947 = vst [vmem:[#allocation4 + $0x120] sm:$0x1f] %v2931_v31  ;;  %3019 = vst [vmem:[#allocation4 + $0x130] sm:$0x1f] %v3003_v32  ;;  %v7266_v31 = vrot.slane %v3164_v30, %v1666_v43  ;;  %v7270_v32 = vrot.slane %v3164_v30, %v1670_v45 }
 0x2b7   : > { %v3079_v34 = vld [vmem:[#allocation4 + $0x118] sm:$0xff] }
 0x2b9   : > { %v3081_v6 = vld [vmem:[#allocation4 + $0x128] sm:$0xff] }
 0x2ba   : > { %v3083_v47 = vld [vmem:[#allocation4 + $0x138] sm:$0xff] }
 0x2bd   : > { %v3080_v33 = vld [vmem:[#allocation4 + $0x120] sm:$0xff]  ;;  %v3082_v5 = vld [vmem:[#allocation4 + $0x130] sm:$0xff] }
 0x2be   : > { %3678 = vmatprep.mubr.bf16.mxu1 %v3080_v33 }
 0x2bf   : > { %3679 = vmatmul.mubr.bf16.gmra.mrb[28].mxu1 %v3079_v34 }
 0x2c0   : > { %3721 = vmatprep.mubr.bf16.mxu1 %v3047_v35 }
 0x2c7   : > { %3722 = vmatmul.mubr.bf16.vlgmr.msra.gmra.mrb[0].mxu1 %v3046_v38 }
 0x2c8   : > { %3731 = vmatprep.mubr.bf16.mxu1 %v3052_v39  ;;  %3803 = vmatpush1.bf16.msra.mxu1 %v6008_v36 }
 0x2c9   : > { %3804 = vmatprep.subr.bf16.mxu1 %v6013_v37 }
 0x2cc   : > { %3805 = vmatpush1.bf16.msra.mxu1 %v6011_v40 }
 0x2cd   : > { %3806 = vmatprep.subr.bf16.mxu1 %v6016_v41 }
 0x2cf   : > { %3732 = vmatmul.mubr.bf16.gmra.mrb[4].mxu1 %v3051_v49 }
 0x2d0   : > { %3741 = vmatprep.mubr.bf16.mxu1 %v3057_v50  ;;  %3807 = vmatpush1.bf16.msra.mxu1 %v6014_v44 }
 0x2d1   : > { %3808 = vmatprep.subr.bf16.mxu1 %v6019_v48 }
 0x2d4   : > { %3809 = vmatpush1.bf16.msra.mxu1 %v6017_v51 }
 0x2d5   : > { %3810 = vmatprep.subr.bf16.mxu1 %v6022_v52 }
 0x2d7   : > { %3742 = vmatmul.mubr.bf16.gmra.mrb[8].mxu1 %v3056_v55 }
 0x2d8   : > { %3751 = vmatprep.mubr.bf16.mxu1 %v3062_v56  ;;  %3811 = vmatpush1.bf16.msra.mxu1 %v6020_v53 }
 0x2d9   : > { %3812 = vmatprep.subr.bf16.mxu1 %v6025_v54 }
 0x2dc   : > { %3813 = vmatpush1.bf16.msra.mxu1 %v6023_v57 }
 0x2dd   : > { %3814 = vmatprep.subr.bf16.mxu1 %v6028_v58 }
 0x2df   : > { %3752 = vmatmul.mubr.bf16.gmra.mrb[12].mxu1 %v3061_v61 }
 0x2e0   : > { %3761 = vmatprep.mubr.bf16.mxu1 %v3067_v62  ;;  %3815 = vmatpush1.bf16.msra.mxu1 %v6026_v59 }
 0x2e1   : > { %3816 = vmatprep.subr.bf16.mxu1 %v6031_v60 }
 0x2e4   : > { %3817 = vmatpush1.bf16.msra.mxu1 %v6029_v63 }
 0x2e5   : > { %5251 = vmatprep.subr.bf16.mxu1 %v6032_v13 }
 0x2e7   : > { %3762 = vmatmul.mubr.bf16.gmra.mrb[16].mxu1 %v3066_v0 }
 0x2e8   : > { %3771 = vmatprep.mubr.bf16.mxu1 %v3072_v1 }
 0x2ef   : > { %3772 = vmatmul.mubr.bf16.gmra.mrb[20].mxu1 %v3071_v2 }
 0x2f0   : > { %3781 = vmatprep.mubr.bf16.mxu1 %v3077_v3 }
 0x2f7   : > { %3782 = vmatmul.mubr.bf16.gmra.mrb[24].mxu1 %v3076_v4 }
 0x2f8   : > { %3791 = vmatprep.mubr.bf16.mxu1 %v3082_v5 }
 0x2ff   : > { %3792 = vmatmul.mubr.bf16.gmra.mrb[28].mxu1 %v3081_v6 }
 0x300   : > { %3834 = vmatprep.mubr.bf16.mxu1 %v6157_v25 }
 0x307   : > { %3835 = vmatmul.mubr.bf16.vlgmr.msra.gmra.mrb[0].mxu1 %v3048_v7 }
 0x308   : > { %3844 = vmatprep.mubr.bf16.mxu1 %v6157_v25  ;;  %5252 = vmatpush3.bf16.msra.mxu1 %v6033_v14 }
 0x309   : > { %5253 = vmatprep.subr.bf16.mxu1 %v6034_v15 }
 0x30f   : > { %3845 = vmatmul.mubr.bf16.gmra.mrb[4].mxu1 %v3053_v8 }
 0x310   : > { %3854 = vmatprep.mubr.bf16.mxu1 %v6157_v25 }
 0x317   : > { %3855 = vmatmul.mubr.bf16.gmra.mrb[8].mxu1 %v3058_v9 }
 0x318   : > { %3864 = vmatprep.mubr.bf16.mxu1 %v6157_v25 }
 0x31f   : > { %3865 = vmatmul.mubr.bf16.gmra.mrb[12].mxu1 %v3063_v10 }
 0x320   : > { %3874 = vmatprep.mubr.bf16.mxu1 %v6157_v25 }
 0x327   : > { %3875 = vmatmul.mubr.bf16.gmra.mrb[16].mxu1 %v3068_v46 }
 0x328   : > { %3884 = vmatprep.mubr.bf16.mxu1 %v6157_v25 }
 0x32f   : > { %3885 = vmatmul.mubr.bf16.gmra.mrb[20].mxu1 %v3073_v11 }
 0x330   : > { %3894 = vmatprep.mubr.bf16.mxu1 %v6157_v25 }
 0x337   : > { %3895 = vmatmul.mubr.bf16.gmra.mrb[24].mxu1 %v3078_v12 }
 0x338   : > { %3904 = vmatprep.mubr.bf16.mxu1 %v6157_v25  ;;  %v6035_v25 = vld [vmem:[%s7547_s5 + $0x8] sm:$0xff]  }
 0x339   : > { %5254 = vmatpush3.bf16.msra.mxu1 %v6035_v25 }
 0x33a   : > { %5255 = vmatprep.subr.bf16.mxu1 %v6036_v16 }
 0x33d   : > { %5256 = vmatpush3.bf16.msra.mxu1 %v6037_v17 }
 0x33e   : > { %5257 = vmatprep.subr.bf16.mxu1 %v6038_v18 }
 0x33f   : > { %3905 = vmatmul.mubr.bf16.gmra.mrb[28].mxu1 %v3083_v47 }
 0x341   : > { %5258 = vmatpush3.bf16.msra.mxu1 %v6039_v19 }
 0x342   : > { %5259 = vmatprep.subr.bf16.mxu1 %v6040_v20 }
 0x345   : > { %5260 = vmatpush3.bf16.msra.mxu1 %v6041_v21 }
 0x346   : > { %5261 = vmatprep.subr.bf16.mxu1 %v6042_v22 }
 0x349   : > { %5262 = vmatpush3.bf16.msra.mxu1 %v6043_v23 }
 0x34a   : > { %5263 = vmatprep.subr.bf16.mxu1 %v6044_v24 }
 0x34d   : > { %5264 = vmatpush3.bf16.msra.mxu1 %v6045_v26 }
 0x34e   : > { %5265 = vmatprep.subr.bf16.mxu1 %v6046_v27 }
 0x351   : > { %5266 = vmatpush3.bf16.msra.mxu1 %v6047_v28 }
 0x352   : > { %5273 = vmatprep.subr.bf16.mxu1 %v6050_v29 }
 0x3da   : > { %v3836_v33 = vpop.f32.mrb[0].mxu1 }
 0x3db   : > { %v5446_v34 = vadd.f32 %v3836_v33, %v7266_v31  ;;  %v3838_v35 = vpop.f32.mrb[1].mxu1 }
 0x3dc   : > { %v5447_v36 = vadd.f32 %v3838_v35, %v7270_v32  ;;  %v3840_v37 = vpop.f32.mrb[2].mxu1 }
 0x3dd   : > { %v3915_v38 = vmax.f32 %v5446_v34, 0.0  ;;  %v5448_v39 = vadd.f32 %v3840_v37, %v7266_v31  ;;  %v3842_v40 = vpop.f32.mrb[3].mxu1 }
 0x3de   : > { %v3916_v41 = vmax.f32 %v5447_v36, 0.0  ;;  %v5449_v44 = vadd.f32 %v3842_v40, %v7270_v32 }
 0x3df   : > { %v3917_v43 = vmax.f32 %v5448_v39, 0.0 }
 0x3e0   : > { %v3947_v48 = vmax.f32 %v3915_v38, %v3916_v41  ;;  %v3918_v49 = vmax.f32 %v5449_v44, 0.0 }
 0x3e2   : > { %3963 = vst [vmem:[#allocation5] sm:$0xff] %v3947_v48  ;;  %v3948_v42 = vmax.f32 %v3917_v43, %v3918_v49  ;;  %v3846_v45 = vpop.f32.mrb[4].mxu1 }
 0x3e3   : > { %v5450_v50 = vadd.f32 %v3846_v45, %v7266_v31  ;;  %v3848_v51 = vpop.f32.mrb[5].mxu1 }
 0x3e4   : > { %3964 = vst [vmem:[#allocation5 + $0x8] sm:$0xff] %v3948_v42  ;;  %v5451_v52 = vadd.f32 %v3848_v51, %v7270_v32  ;;  %v3850_v53 = vpop.f32.mrb[6].mxu1 }
 0x3e5   : > { %v3919_v54 = vmax.f32 %v5450_v50, 0.0  ;;  %v5452_v55 = vadd.f32 %v3850_v53, %v7266_v31  ;;  %v3852_v56 = vpop.f32.mrb[7].mxu1 }
 0x3e6   : > { %v3920_v57 = vmax.f32 %v5451_v52, 0.0  ;;  %v5453_v58 = vadd.f32 %v3852_v56, %v7270_v32 }
 0x3e7   : > { %v3921_v59 = vmax.f32 %v5452_v55, 0.0 }
 0x3e8   : > { %v3949_v60 = vmax.f32 %v3919_v54, %v3920_v57  ;;  %v3922_v61 = vmax.f32 %v5453_v58, 0.0 }
 0x3ea   : > { %3965 = vst [vmem:[#allocation5 + $0x10] sm:$0xff] %v3949_v60  ;;  %v3950_v62 = vmax.f32 %v3921_v59, %v3922_v61  ;;  %v3856_v63 = vpop.f32.mrb[8].mxu1 }
 0x3eb   : > { %v5454_v0 = vadd.f32 %v3856_v63, %v7266_v31  ;;  %v3858_v1 = vpop.f32.mrb[9].mxu1  ;;  %v3979_v58 = vld [vmem:[#allocation5] ss:$2 sm:$0xff]  ;;  %v3995_v59 = vld [vmem:[#allocation5 + $0x1] ss:$2 sm:$0xff] }
 0x3ec   : > { %3966 = vst [vmem:[#allocation5 + $0x18] sm:$0xff] %v3950_v62  ;;  %v5455_v2 = vadd.f32 %v3858_v1, %v7270_v32  ;;  %v3860_v3 = vpop.f32.mrb[10].mxu1 }
 0x3ed   : > { %v3923_v4 = vmax.f32 %v5454_v0, 0.0  ;;  %v5456_v5 = vadd.f32 %v3860_v3, %v7266_v31  ;;  %v3862_v6 = vpop.f32.mrb[11].mxu1  ;;  %v4010_v3 = vmax.f32 %v3979_v58, %v3995_v59 }
 0x3ee   : > { %v3924_v7 = vmax.f32 %v5455_v2, 0.0  ;;  %v5457_v8 = vadd.f32 %v3862_v6, %v7270_v32 }
 0x3ef   : > { %v3925_v9 = vmax.f32 %v5456_v5, 0.0 }
 0x3f0   : > { %v3951_v10 = vmax.f32 %v3923_v4, %v3924_v7  ;;  %v3926_v46 = vmax.f32 %v5457_v8, 0.0 }
 0x3f2   : > { %3967 = vst [vmem:[#allocation5 + $0x20] sm:$0xff] %v3951_v10  ;;  %v3866_v11 = vpop.f32.mrb[12].mxu1  ;;  %v3952_v12 = vmax.f32 %v3925_v9, %v3926_v46 }
 0x3f3   : > { %v5458_v47 = vadd.f32 %v3866_v11, %v7266_v31  ;;  %v3868_v13 = vpop.f32.mrb[13].mxu1  ;;  %v3981_v56 = vld [vmem:[#allocation5 + $0x10] ss:$2 sm:$0xff]  ;;  %v3997_v57 = vld [vmem:[#allocation5 + $0x11] ss:$2 sm:$0xff] }
 0x3f4   : > { %v5459_v14 = vadd.f32 %v3868_v13, %v7270_v32  ;;  %v3870_v15 = vpop.f32.mrb[14].mxu1  ;;  %3968 = vst [vmem:[#allocation5 + $0x28] sm:$0xff] %v3952_v12  ;;  %v4011_v62 = vmax.f32 %v3981_v56, %v3997_v57 }
 0x3f5   : > { %v3927_v25 = vmax.f32 %v5458_v47, 0.0  ;;  %v5460_v16 = vadd.f32 %v3870_v15, %v7266_v31  ;;  %v3872_v17 = vpop.f32.mrb[15].mxu1 }
 0x3f6   : > { %v3928_v18 = vmax.f32 %v5459_v14, 0.0  ;;  %v5461_v19 = vadd.f32 %v3872_v17, %v7270_v32  ;;  %v5244_v47 = vpack.c.bf16 %v4011_v62, %v4011_v62  ;;  %v5243_v14 = vpack.c.bf16 %v4010_v3, %v4010_v3 }
 0x3f7   : > { %v3929_v20 = vmax.f32 %v5460_v16, 0.0 }
 0x3f8   : > { %v3953_v21 = vmax.f32 %v3927_v25, %v3928_v18  ;;  %v3930_v22 = vmax.f32 %v5461_v19, 0.0 }
 0x3fa   : > { %3969 = vst [vmem:[#allocation5 + $0x30] sm:$0xff] %v3953_v21  ;;  %v3876_v23 = vpop.f32.mrb[16].mxu1  ;;  %v3954_v24 = vmax.f32 %v3929_v20, %v3930_v22 }
 0x3fb   : > { %v5462_v26 = vadd.f32 %v3876_v23, %v7266_v31  ;;  %v3878_v27 = vpop.f32.mrb[17].mxu1  ;;  %v3983_v63 = vld [vmem:[#allocation5 + $0x20] ss:$2 sm:$0xff]  ;;  %v3999_v0 = vld [vmem:[#allocation5 + $0x21] ss:$2 sm:$0xff] }
 0x3fc   : > { %v5463_v28 = vadd.f32 %v3878_v27, %v7270_v32  ;;  %v3880_v29 = vpop.f32.mrb[18].mxu1  ;;  %3970 = vst [vmem:[#allocation5 + $0x38] sm:$0xff] %v3954_v24  ;;  %v4012_v46 = vmax.f32 %v3983_v63, %v3999_v0  ;;  %v4051_v24 = vunpack.c.l.b16 %v5244_v47 }
 0x3fd   : > { %v3931_v30 = vmax.f32 %v5462_v26, 0.0  ;;  %v5464_v33 = vadd.f32 %v3880_v29, %v7266_v31  ;;  %v3882_v34 = vpop.f32.mrb[19].mxu1 }
 0x3fe   : > { %v3932_v35 = vmax.f32 %v5463_v28, 0.0  ;;  %v5465_v36 = vadd.f32 %v3882_v34, %v7270_v32  ;;  %v5245_v18 = vpack.c.bf16 %v4012_v46, %v4012_v46  ;;  %v4050_v28 = vunpack.c.l.b16 %v5243_v14 }
 0x3ff   : > { %v3933_v37 = vmax.f32 %v5464_v33, 0.0 }
 0x400   : > { %v3955_v38 = vmax.f32 %v3931_v30, %v3932_v35  ;;  %v3934_v39 = vmax.f32 %v5465_v36, 0.0 }
 0x402   : > { %3971 = vst [vmem:[#allocation5 + $0x40] sm:$0xff] %v3955_v38  ;;  %v3956_v40 = vmax.f32 %v3933_v37, %v3934_v39  ;;  %v3886_v41 = vpop.f32.mrb[20].mxu1 }
 0x403   : > { %v3888_v44 = vpop.f32.mrb[21].mxu1  ;;  %v5466_v43 = vadd.f32 %v3886_v41, %v7266_v31  ;;  %v3985_v6 = vld [vmem:[#allocation5 + $0x30] ss:$2 sm:$0xff]  ;;  %v4001_v7 = vld [vmem:[#allocation5 + $0x31] ss:$2 sm:$0xff] }
 0x404   : > { %3972 = vst [vmem:[#allocation5 + $0x48] sm:$0xff] %v3956_v40  ;;  %v5467_v48 = vadd.f32 %v3888_v44, %v7270_v32  ;;  %v3890_v49 = vpop.f32.mrb[22].mxu1  ;;  %v4013_v15 = vmax.f32 %v3985_v6, %v4001_v7  ;;  %v4052_v40 = vunpack.c.l.b16 %v5245_v18  ;;  %v4058_v44 = vrot.slane %v4051_v24, 7 }
 0x405   : > { %v5468_v42 = vadd.f32 %v3890_v49, %v7266_v31  ;;  %v3892_v45 = vpop.f32.mrb[23].mxu1  ;;  %v3935_v50 = vmax.f32 %v5466_v43, 0.0 }
 0x406   : > { %v3936_v51 = vmax.f32 %v5467_v48, 0.0  ;;  %v5469_v52 = vadd.f32 %v3892_v45, %v7270_v32  ;;  %v5246_v29 = vpack.c.bf16 %v4013_v15, %v4013_v15  ;;  %v4099_v45 = vrot.slane %v4050_v28, 2 }
 0x407   : > { %v3937_v53 = vmax.f32 %v5468_v42, 0.0  ;;  %v4082_v42 = vrot.slane %v4050_v28, 1  ;;  %v4061_v57 = vrot.slane %v4052_v40, 6  ;;  %v4084_v58 = vrot.slane %v4052_v40, 7 }
 0x408   : > { %v3957_v54 = vmax.f32 %v3935_v50, %v3936_v51  ;;  %v3938_v55 = vmax.f32 %v5469_v52, 0.0  ;;  %v4100_v50 = vrot.slane %v4051_v24, 1  ;;  %v4053_v51 = vunpack.c.l.b16 %v5246_v29 }
 0x409   : > { %v4134_v52 = vrot.slane %v4051_v24, 3  ;;  %v4083_v56 = vsel %vm4059_vm7, %v4051_v24, %v4082_v42  ;;  %v4119_v59 = vrot.slane %v4052_v40, 1  ;;  %v4060_v63 = vsel %vm4059_vm7, %v4058_v44, %v4050_v28 }
 0x40a   : > { %3973 = vst [vmem:[#allocation5 + $0x50] sm:$0xff] %v3957_v54  ;;  %v3958_v60 = vmax.f32 %v3937_v53, %v3938_v55  ;;  %v3896_v61 = vpop.f32.mrb[24].mxu1  ;;  %v4116_v55 = vrot.slane %v4050_v28, 3  ;;  %v4136_v0 = vrot.slane %v4052_v40, 2  ;;  %v4101_v3 = vsel %vm4059_vm7, %v4100_v50, %v4099_v45 }
 0x40b   : > { %v5470_v1 = vadd.f32 %v3896_v61, %v7266_v31  ;;  %v3898_v2 = vpop.f32.mrb[25].mxu1  ;;  %v3987_v19 = vld [vmem:[#allocation5 + $0x40] ss:$2 sm:$0xff]  ;;  %v4003_v20 = vld [vmem:[#allocation5 + $0x41] ss:$2 sm:$0xff]  ;;  %v4102_v46 = vsel %vm4062_vm8, %v4052_v40, %v4101_v3  ;;  %v4085_v47 = vsel %vm4062_vm8, %v4084_v58, %v4083_v56 }
 0x40c   : > { %3974 = vst [vmem:[#allocation5 + $0x58] sm:$0xff] %v3958_v60  ;;  %v5471_v4 = vadd.f32 %v3898_v2, %v7270_v32  ;;  %v3900_v5 = vpop.f32.mrb[26].mxu1  ;;  %v4014_v37 = vmax.f32 %v3987_v19, %v4003_v20 }
 0x40d   : > { %v3939_v8 = vmax.f32 %v5470_v1, 0.0  ;;  %v5472_v9 = vadd.f32 %v3900_v5, %v7266_v31  ;;  %v3902_v10 = vpop.f32.mrb[27].mxu1  ;;  %v4064_v1 = vrot.slane %v4053_v51, 5 }
 0x40e   : > { %v3940_v11 = vmax.f32 %v5471_v4, 0.0  ;;  %v5473_v12 = vadd.f32 %v3902_v10, %v7270_v32  ;;  %v5247_v53 = vpack.c.bf16 %v4014_v37, %v4014_v37  ;;  %v4138_v4 = vrot.slane %v4053_v51, 1 }
 0x40f   : > { %v3941_v13 = vmax.f32 %v5472_v9, 0.0  ;;  %v4103_v9 = vrot.slane %v4053_v51, 7 }
 0x410   : > { %v3959_v25 = vmax.f32 %v3939_v8, %v3940_v11  ;;  %v3942_v16 = vmax.f32 %v5473_v12, 0.0  ;;  %v4054_v5 = vunpack.c.l.b16 %v5247_v53  ;;  %v4086_v8 = vrot.slane %v4053_v51, 6 }
 0x411   : > { %v4063_v12 = vsel %vm4062_vm8, %v4061_v57, %v4060_v63 }
 0x412   : > { %v3906_v17 = vpop.f32.mrb[28].mxu1  ;;  %3975 = vst [vmem:[#allocation5 + $0x60] sm:$0xff] %v3959_v25  ;;  %v3960_v21 = vmax.f32 %v3941_v13, %v3942_v16  ;;  %v4066_v15 = vsel %vm4065_vm9, %v4064_v1, %v4063_v12  ;;  %v4088_v18 = vrot.slane %v4054_v5, 5  ;;  %v4105_v19 = vrot.slane %v4054_v5, 6  ;;  %v6054_v12 = vld [vmem:[%s7547_s5 + $0xc8] sm:$0xff]  }
 0x413   : > { %v5474_v22 = vadd.f32 %v3906_v17, %v7266_v31  ;;  %v3908_v23 = vpop.f32.mrb[29].mxu1  ;;  %v3989_v30 = vld [vmem:[#allocation5 + $0x50] ss:$2 sm:$0xff]  ;;  %v4005_v33 = vld [vmem:[#allocation5 + $0x51] ss:$2 sm:$0xff]  ;;  %v4067_v17 = vrot.slane %v4054_v5, 4 }
 0x414   : > { %v5475_v26 = vadd.f32 %v3908_v23, %v7270_v32  ;;  %v3910_v27 = vpop.f32.mrb[30].mxu1  ;;  %3976 = vst [vmem:[#allocation5 + $0x68] sm:$0xff] %v3960_v21  ;;  %v4015_v43 = vmax.f32 %v3989_v30, %v4005_v33  ;;  %v4087_v23 = vsel %vm4065_vm9, %v4086_v8, %v4085_v47 }
 0x415   : > { %v3943_v34 = vmax.f32 %v5474_v22, 0.0  ;;  %v5476_v35 = vadd.f32 %v3910_v27, %v7266_v31  ;;  %v3912_v36 = vpop.f32.mrb[31].mxu1  ;;  %v4117_v31 = vrot.slane %v4051_v24, 2  ;;  %v4104_v24 = vsel %vm4065_vm9, %v4103_v9, %v4102_v46 }
 0x416   : > { %v3944_v38 = vmax.f32 %v5475_v26, 0.0  ;;  %v5477_v39 = vadd.f32 %v3912_v36, %v7270_v32  ;;  %v4133_v32 = vrot.slane %v4050_v28, 4  ;;  %v5248_v60 = vpack.c.bf16 %v4015_v43, %v4015_v43 }
 0x417   : > { %v3945_v41 = vmax.f32 %v5476_v35, 0.0  ;;  %v4118_v6 = vsel %vm4059_vm7, %v4117_v31, %v4116_v55  ;;  %v4122_v26 = vrot.slane %v4054_v5, 7  ;;  %v4089_v40 = vsel %vm4068_vm10, %v4088_v18, %v4087_v23  ;;  %v6061_v18 = vld [vmem:[%s7547_s5 + $0xa0] sm:$0xff]   ;;  %v6066_v23 = vld [vmem:[%s7547_s5 + $0xf8] sm:$0xff]  }
 0x418   : > { %v3961_v48 = vmax.f32 %v3943_v34, %v3944_v38  ;;  %v3946_v49 = vmax.f32 %v5477_v39, 0.0  ;;  %v4135_v7 = vsel %vm4059_vm7, %v4134_v52, %v4133_v32  ;;  %v4055_v11 = vunpack.c.l.b16 %v5248_v60 }
 0x419   : > { %v4120_v13 = vsel %vm4062_vm8, %v4119_v59, %v4118_v6  ;;  %v4137_v16 = vsel %vm4062_vm8, %v4136_v0, %v4135_v7  ;;  %v4069_v39 = vsel %vm4068_vm10, %v4067_v17, %v4066_v15  ;;  %v6057_v15 = vld [vmem:[%s7547_s5 + $0x90] sm:$0xff]   ;;  %v6060_v17 = vld [vmem:[%s7547_s5 + $0xe0] sm:$0xff]  }
 0x41a   : > { %3977 = vst [vmem:[#allocation5 + $0x70] sm:$0xff] %v3961_v48  ;;  %v3962_v54 = vmax.f32 %v3945_v41, %v3946_v49  ;;  %v4121_v25 = vsel %vm4065_vm9, %v4053_v51, %v4120_v13  ;;  %v4139_v20 = vsel %vm4065_vm9, %v4138_v4, %v4137_v16  ;;  %v4070_v29 = vrot.slane %v4055_v11, 3  ;;  %v6055_v13 = vld [vmem:[%s7547_s5 + $0x88] sm:$0xff]   ;;  %v6059_v16 = vld [vmem:[%s7547_s5 + $0x98] sm:$0xff]  }
 0x41b   : > { %v3991_v61 = vld [vmem:[#allocation5 + $0x60] ss:$2 sm:$0xff]  ;;  %v4007_v62 = vld [vmem:[#allocation5 + $0x61] ss:$2 sm:$0xff]  ;;  %v4140_v27 = vsel %vm4068_vm10, %v4054_v5, %v4139_v20  ;;  %v4090_v30 = vrot.slane %v4055_v11, 4  ;;  %v4107_v33 = vrot.slane %v4055_v11, 5  ;;  %v4106_v41 = vsel %vm4068_vm10, %v4105_v19, %v4104_v24 }
 0x41c   : > { %3978 = vst [vmem:[#allocation5 + $0x78] sm:$0xff] %v3962_v54  ;;  %v4016_v2 = vmax.f32 %v3991_v61, %v4007_v62  ;;  %v4124_v36 = vrot.slane %v4055_v11, 6  ;;  %v4141_v37 = vrot.slane %v4055_v11, 7  ;;  %v4123_v43 = vsel %vm4068_vm10, %v4122_v26, %v4121_v25  ;;  %v6051_v11 = vld [vmem:[%s7547_s5 + $0x80] sm:$0xff]   ;;  %v6058_v25 = vld [vmem:[%s7547_s5 + $0xd8] sm:$0xff]   ;;  %v6062_v19 = vld [vmem:[%s7547_s5 + $0xe8] sm:$0xff]  }
 0x41d   : > { %v4072_v45 = vsel %vm4071_vm11, %v4070_v29, %v4069_v39  ;;  %v4091_v50 = vsel %vm4071_vm11, %v4090_v30, %v4089_v40  ;;  %v4108_v51 = vsel %vm4071_vm11, %v4107_v33, %v4106_v41  ;;  %v6063_v20 = vld [vmem:[%s7547_s5 + $0xa8] sm:$0xff]   ;;  %v6067_v24 = vld [vmem:[%s7547_s5 + $0xb8] sm:$0xff]   ;;  %v6068_v26 = vld [vmem:[%s7547_s5 + $0x100] sm:$0xff]  }
 0x41e   : > { %v5249_v10 = vpack.c.bf16 %v4016_v2, %v4016_v2  ;;  %v4125_v53 = vsel %vm4071_vm11, %v4124_v36, %v4123_v43  ;;  %v4142_v54 = vsel %vm4071_vm11, %v4141_v37, %v4140_v27  ;;  %v6069_v29 = vld [vmem:[%s7547_s5 + $0x108] sm:$0xff]   ;;  %v6070_v30 = vld [vmem:[%s7547_s5 + $0x110] sm:$0xff]   ;;  %v6071_v33 = vld [vmem:[%s7547_s5 + $0x118] sm:$0xff]  }
 0x41f   : > { %v6074_v36 = vld [vmem:[%s7547_s5 + $0x130] sm:$0xff]   ;;  %v6075_v37 = vld [vmem:[%s7547_s5 + $0x138] sm:$0xff]   ;;  %v6077_v39 = vld [vmem:[%s7549_s7] sm:$0xff]  }
 0x420   : > { %v4056_v14 = vunpack.c.l.b16 %v5249_v10  ;;  %v6078_v40 = vld [vmem:[%s7549_s7 + $0x8] sm:$0xff]   ;;  %v6079_v41 = vld [vmem:[%s7549_s7 + $0x10] sm:$0xff]   ;;  %v6081_v43 = vld [vmem:[%s7549_s7 + $0x20] sm:$0xff]  }
 0x422   : > { %v4073_v34 = vrot.slane %v4056_v14, 2  ;;  %v4092_v35 = vrot.slane %v4056_v14, 3  ;;  %v4109_v44 = vrot.slane %v4056_v14, 4  ;;  %v4126_v48 = vrot.slane %v4056_v14, 5 }
 0x423   : > { %v3993_v21 = vld [vmem:[#allocation5 + $0x70] ss:$2 sm:$0xff]  ;;  %v4009_v22 = vld [vmem:[#allocation5 + $0x71] ss:$2 sm:$0xff]  ;;  %v4143_v49 = vrot.slane %v4056_v14, 6 }
 0x424   : > { %v4017_v28 = vmax.f32 %v3993_v21, %v4009_v22  ;;  %v4075_v31 = vsel %vm4074_vm12, %v4073_v34, %v4072_v45  ;;  %v4093_v52 = vsel %vm4074_vm12, %v4092_v35, %v4091_v50  ;;  %v4110_v58 = vsel %vm4074_vm12, %v4109_v44, %v4108_v51  ;;  %v6056_v14 = vld [vmem:[%s7547_s5 + $0xd0] sm:$0xff]   ;;  %v6072_v34 = vld [vmem:[%s7547_s5 + $0x120] sm:$0xff]   ;;  %v6073_v35 = vld [vmem:[%s7547_s5 + $0x128] sm:$0xff]  }
 0x425   : > { %v4127_v59 = vsel %vm4074_vm12, %v4126_v48, %v4125_v53  ;;  %v4144_v60 = vsel %vm4074_vm12, %v4143_v49, %v4142_v54  ;;  %v6064_v21 = vld [vmem:[%s7547_s5 + $0xf0] sm:$0xff]   ;;  %v6080_v44 = vld [vmem:[%s7549_s7 + $0x18] sm:$0xff]   ;;  %v6082_v48 = vld [vmem:[%s7549_s7 + $0x28] sm:$0xff]  }
 0x426   : > { %v5250_v38 = vpack.c.bf16 %v4017_v28, %v4017_v28  ;;  %v6065_v22 = vld [vmem:[%s7547_s5 + $0xb0] sm:$0xff]   ;;  %v6158_v28 = vmov 0.0   ;;  %v5174_v53 = vld [vmem:[%s7548_s6] ss:$0 sm:$0xff] }
 0x427   : > { %v6083_v49 = vld [vmem:[%s7549_s7 + $0x30] sm:$0xff]  }
 0x428   : > { %v4057_v42 = vunpack.c.l.b16 %v5250_v38 }
 0x42a   : > { %v4076_v55 = vrot.slane %v4057_v42, 1  ;;  %v4094_v32 = vrot.slane %v4057_v42, 2  ;;  %v4111_v56 = vrot.slane %v4057_v42, 3  ;;  %v4128_v57 = vrot.slane %v4057_v42, 4 }
 0x42b   : > { %v4145_v61 = vrot.slane %v4057_v42, 5  ;;  %v6084_v42 = vld [vmem:[%s7549_s7 + $0x38] sm:$0xff]  }
 0x42c   : > { %v4078_v62 = vsel %vm4077_vm13, %v4076_v55, %v4075_v31  ;;  %v4095_v63 = vsel %vm4077_vm13, %v4094_v32, %v4093_v52  ;;  %v4112_v0 = vsel %vm4077_vm13, %v4111_v56, %v4110_v58  ;;  %v4129_v1 = vsel %vm4077_vm13, %v4128_v57, %v4127_v59 }
 0x42d   : > { %v4079_v2 = vpack.c.b16 %v4078_v62, %v4078_v62  ;;  %v4096_v3 = vpack.c.b16 %v4095_v63, %v4095_v63  ;;  %v4113_v4 = vpack.c.b16 %v4112_v0, %v4112_v0  ;;  %v4130_v5 = vpack.c.b16 %v4129_v1, %v4129_v1 }
 0x42e   : > { %v4146_v6 = vsel %vm4077_vm13, %v4145_v61, %v4144_v60 }
 0x42f   : > { %4081 = vst [vmem:[#allocation6] sm:$0xf] %v4079_v2  ;;  %4098 = vst [vmem:[#allocation6 + $0x4] sm:$0xf] %v4096_v3  ;;  %v4147_v7 = vpack.c.b16 %v4146_v6, %v4146_v6  ;;  %v6085_v2 = vld [vmem:[%s7551_s9] sm:$0xff]   ;;  %v6088_v6 = vld [vmem:[%s7551_s9 + $0x18] sm:$0xff]  }
 0x430   : > { %4115 = vst [vmem:[#allocation6 + $0x8] sm:$0xf] %v4113_v4  ;;  %4132 = vst [vmem:[#allocation6 + $0xc] sm:$0xf] %v4130_v5  ;;  %v6086_v4 = vld [vmem:[%s7551_s9 + $0x8] sm:$0xff]   ;;  %v6087_v5 = vld [vmem:[%s7551_s9 + $0x10] sm:$0xff]  }
 0x431   : > { %4149 = vst [vmem:[#allocation6 + $0x10] sm:$0xf] %v4147_v7  ;;  %v6089_v7 = vld [vmem:[%s7551_s9 + $0x20] sm:$0xff]  }
 0x436   : > { %v4150_v8 = vld [vmem:[#allocation6] sm:$0xff] }
 0x437   : > { %v4151_v9 = vld [vmem:[#allocation6 + $0x8] sm:$0xff]  ;;  %v5175_v10 = vcombine.low %v4150_v8, %v4150_v8  ;;  %v5176_v46 = vcombine.high %v4150_v8, %v4150_v8 }
 0x438   : > { %v5178_v47 = vcombine.high %v4151_v9, %v4151_v9  ;;  %v5177_v27 = vcombine.low %v4151_v9, %v4151_v9  ;;  %v6076_v38 = vld [vmem:[#allocation6 + $0x10] ss:$0 sps:$4 sm:$0xff]   ;;  %v6090_v8 = vld [vmem:[%s7551_s9 + $0x28] sm:$0xff]  }
 0x439   : > { %4530 = vmatprep.mubr.bf16.mxu1 %v5176_v46  ;;  %v6091_v9 = vld [vmem:[%s7551_s9 + $0x30] sm:$0xff]   ;;  %v5220_v46 = vld [vmem:[%s7550_s8] ss:$0 sm:$0xff] }
 0x43a   : > { %4531 = vmatmul.mubr.bf16.vlgmr.msra.gmra.mrb[32].mxu1 %v5175_v10  ;;  %v6092_v10 = vld [vmem:[%s7551_s9 + $0x38] sm:$0xff]  }
 0x43b   : > { %5274 = vmatpush3.bf16.msra.mxu1 %v6051_v11  ;;  %4570 = vmatprep.mubr.bf16.mxu1 %v5178_v47 }
 0x43c   : > { %5275 = vmatprep.subr.bf16.mxu1 %v6054_v12 }
 0x43f   : > { %5276 = vmatpush3.bf16.msra.mxu1 %v6055_v13 }
 0x440   : > { %5277 = vmatprep.subr.bf16.mxu1 %v6056_v14 }
 0x443   : > { %5278 = vmatpush3.bf16.msra.mxu1 %v6057_v15 }
 0x444   : > { %5279 = vmatprep.subr.bf16.mxu1 %v6058_v25 }
 0x447   : > { %5280 = vmatpush3.bf16.msra.mxu1 %v6059_v16  ;;  %v5229_v16 = vld [vmem:[%s7552_s10] ss:$0 sm:$0xff] }
 0x448   : > { %5281 = vmatprep.subr.bf16.mxu1 %v6060_v17 }
 0x44b   : > { %5282 = vmatpush3.bf16.msra.mxu1 %v6061_v18 }
 0x44c   : > { %5283 = vmatprep.subr.bf16.mxu1 %v6062_v19 }
 0x44f   : > { %5284 = vmatpush3.bf16.msra.mxu1 %v6063_v20 }
 0x450   : > { %5285 = vmatprep.subr.bf16.mxu1 %v6064_v21 }
 0x453   : > { %5286 = vmatpush3.bf16.msra.mxu1 %v6065_v22 }
 0x454   : > { %5287 = vmatprep.subr.bf16.mxu1 %v6066_v23 }
 0x457   : > { %5288 = vmatpush3.bf16.msra.mxu1 %v6067_v24 }
 0x458   : > { %5322 = vmatprep.subr.bf16.mxu1 %v6158_v28 }
 0x45a   : > { %4571 = vmatmul.mubr.bf16.vlgmr.msra.gmra.mrb[36].mxu1 %v5177_v27 }
 0x45b   : > { %5323 = vmatpush3.bf16.msra.mxu1 %v6068_v26  ;;  %5338 = vmatprep.mubr.msk.bf16.mxu1 %vm6159_vm14, %v6158_v28 }
 0x45c   : > { %5324 = vmatprep.subr.bf16.mxu1 %v6158_v28 }
 0x45f   : > { %5325 = vmatpush3.bf16.msra.mxu1 %v6069_v29 }
 0x460   : > { %5326 = vmatprep.subr.bf16.mxu1 %v6158_v28 }
 0x463   : > { %5327 = vmatpush3.bf16.msra.mxu1 %v6070_v30 }
 0x464   : > { %5328 = vmatprep.subr.bf16.mxu1 %v6158_v28 }
 0x467   : > { %5329 = vmatpush3.bf16.msra.mxu1 %v6071_v33 }
 0x468   : > { %5330 = vmatprep.subr.bf16.mxu1 %v6158_v28 }
 0x46b   : > { %5331 = vmatpush3.bf16.msra.mxu1 %v6072_v34 }
 0x46c   : > { %5332 = vmatprep.subr.bf16.mxu1 %v6158_v28 }
 0x46f   : > { %5333 = vmatpush3.bf16.msra.mxu1 %v6073_v35 }
 0x470   : > { %5334 = vmatprep.subr.bf16.mxu1 %v6158_v28 }
 0x473   : > { %5335 = vmatpush3.bf16.msra.mxu1 %v6074_v36 }
 0x474   : > { %5336 = vmatprep.subr.bf16.mxu1 %v6158_v28 }
 0x477   : > { %5337 = vmatpush3.bf16.msra.mxu1 %v6075_v37 }
 0x478   : > { %5342 = vmatprep.subr.bf16.mxu1 %v6158_v28 }
 0x47a   : > { %5339 = vmatmul.mubr.bf16.vlgmr.msra.gmra.mrb[40].mxu1 %v6076_v38 }
 0x47b   : > { %5358 = vmatprep.mubr.msk.bf16.mxu1 %vm6159_vm14, %v6158_v28  ;;  %5343 = vmatpush3.bf16.msra.mxu1 %v6077_v39 }
 0x47c   : > { %5344 = vmatprep.subr.bf16.mxu1 %v6158_v28 }
 0x47f   : > { %5345 = vmatpush3.bf16.msra.mxu1 %v6078_v40 }
 0x480   : > { %5346 = vmatprep.subr.bf16.mxu1 %v6158_v28 }
 0x483   : > { %5347 = vmatpush3.bf16.msra.mxu1 %v6079_v41 }
 0x484   : > { %5348 = vmatprep.subr.bf16.mxu1 %v6158_v28 }
 0x487   : > { %5349 = vmatpush3.bf16.msra.mxu1 %v6080_v44 }
 0x488   : > { %5350 = vmatprep.subr.bf16.mxu1 %v6158_v28 }
 0x48b   : > { %5351 = vmatpush3.bf16.msra.mxu1 %v6081_v43 }
 0x48c   : > { %5352 = vmatprep.subr.bf16.mxu1 %v6158_v28 }
 0x48f   : > { %5353 = vmatpush3.bf16.msra.mxu1 %v6082_v48 }
 0x490   : > { %5354 = vmatprep.subr.bf16.mxu1 %v6158_v28 }
 0x493   : > { %5355 = vmatpush3.bf16.msra.mxu1 %v6083_v49 }
 0x494   : > { %5356 = vmatprep.subr.bf16.mxu1 %v6158_v28 }
 0x497   : > { %5357 = vmatpush3.bf16.msra.mxu1 %v6084_v42 }
 0x498   : > { %5362 = vmatprep.subr.bf16.mxu1 %v6158_v28 }
 0x50d   : > { %v5267_v45 = vpop.f32.mrb[32].mxu1 }
 0x50e   : > { %v5268_v50 = vpop.f32.mrb[33].mxu1 }
 0x50f   : > { %v5269_v51 = vadd.f32 %v5268_v50, %v5267_v45  ;;  %v5270_v31 = vpop.f32.mrb[34].mxu1 }
 0x510   : > { %v5271_v52 = vpop.f32.mrb[35].mxu1 }
 0x511   : > { %v4533_v32 = vadd.f32 %v5269_v51, %v5174_v53 }
 0x52d   : > { %v5289_v54 = vpop.f32.mrb[36].mxu1 }
 0x52e   : > { %v5290_v55 = vpop.f32.mrb[37].mxu1 }
 0x52f   : > { %v5291_v56 = vadd.f32 %v5290_v55, %v5289_v54  ;;  %v5292_v57 = vpop.f32.mrb[38].mxu1 }
 0x530   : > { %v5293_v58 = vpop.f32.mrb[39].mxu1 }
 0x531   : > { %v4573_v59 = vadd.f32 %v5291_v56, %v4533_v32 }
 0x54d   : > { %v4612_v60 = vpop.f32.mrb[40].mxu1 }
 0x54e   : > { %v4613_v61 = vadd.f32 %v4612_v60, %v4573_v59  ;;  %v5340_v62 = vpop.f32.mrb[41].mxu1 }
 0x54f   : > { %v4615_v63 = vpop.f32.mrb[42].mxu1 }
 0x550   : > { %v4618_v0 = vmax.f32 %v4613_v61, 0.0  ;;  %v5341_v1 = vpop.f32.mrb[43].mxu1 }
 0x552   : > { %v4619_v3 = vpack.c.bf16 %v4618_v0, %v4618_v0 }
 0x554   : > { %5359 = vmatmul.mubr.bf16.vlgmr.msra.gmra.mrb[44].mxu1 %v4619_v3 }
 0x555   : > { %5363 = vmatpush3.bf16.msra.mxu1 %v6085_v2  ;;  %5378 = vmatprep.mubr.msk.bf16.mxu1 %vm6159_vm14, %v6158_v28 }
 0x556   : > { %5364 = vmatprep.subr.bf16.mxu1 %v6158_v28 }
 0x559   : > { %5365 = vmatpush3.bf16.msra.mxu1 %v6086_v4 }
 0x55a   : > { %5366 = vmatprep.subr.bf16.mxu1 %v6158_v28 }
 0x55d   : > { %5367 = vmatpush3.bf16.msra.mxu1 %v6087_v5 }
 0x55e   : > { %5368 = vmatprep.subr.bf16.mxu1 %v6158_v28 }
 0x561   : > { %5369 = vmatpush3.bf16.msra.mxu1 %v6088_v6 }
 0x562   : > { %5370 = vmatprep.subr.bf16.mxu1 %v6158_v28 }
 0x565   : > { %5371 = vmatpush3.bf16.msra.mxu1 %v6089_v7 }
 0x566   : > { %5372 = vmatprep.subr.bf16.mxu1 %v6158_v28 }
 0x569   : > { %5373 = vmatpush3.bf16.msra.mxu1 %v6090_v8 }
 0x56a   : > { %5374 = vmatprep.subr.bf16.mxu1 %v6158_v28 }
 0x56d   : > { %5375 = vmatpush3.bf16.msra.mxu1 %v6091_v9 }
 0x56e   : > { %5376 = vmatprep.subr.bf16.mxu1 %v6158_v28 }
 0x571   : > { %5377 = vmatpush3.bf16.msra.mxu1 %v6092_v10 }
 0x627   : > { %v4725_v11 = vpop.f32.mrb[44].mxu1 }
 0x628   : > { %v4726_v12 = vadd.f32 %v5220_v46, %v4725_v11  ;;  %v5360_v47 = vpop.f32.mrb[45].mxu1 }
 0x629   : > { %v4728_v13 = vpop.f32.mrb[46].mxu1 }
 0x62a   : > { %v4731_v14 = vmax.f32 %v4726_v12, 0.0  ;;  %v5361_v15 = vpop.f32.mrb[47].mxu1 }
 0x62c   : > { %v4732_v25 = vpack.c.bf16 %v4731_v14, %v4731_v14 }
 0x62e   : > { %5379 = vmatmul.mubr.bf16.vlgmr.msra.gmra.mrb[48].mxu1 %v4732_v25 }
 0x701   : > { %v4838_v17 = vpop.f32.mrb[48].mxu1 }
 0x702   : > { %v4839_v18 = vadd.f32 %v5229_v16, %v4838_v17  ;;  %v5380_v19 = vpop.f32.mrb[49].mxu1 }
 0x703   : > { %v4841_v20 = vpop.f32.mrb[50].mxu1 }
 0x704   : > { %4844 = vst [vmem:[%s382_s15] sm:$0xff] %v4839_v18  ;;  %v5381_v21 = vpop.f32.mrb[51].mxu1 }
 0x705   : > { %6106 = shalt.err (!%p6103_p3)
}
 0x706   : > { %s6107_s25 = scalar_lea.hbm %s7500_s16, 128  ;;  %s6111_s26 = scalar_lea.hbm %s7553_s11, 256 }
 0x707   : > { %p6108_p4 = scmp.ne.s32.totalorder %s7500_s16, %s6107_s25  ;;  %p6112_p9 = scmp.lt.u32.totalorder %s7500_s16, %s7553_s11 }
 0x708   : > { %p6113_p10 = scmp.lt.u32.totalorder %s6111_s26, %s6107_s25  ;;  %p6115_p12 = scmp.lt.u32.totalorder %s6107_s25, %s7500_s16 }
 0x709   : > { %p6109_p7 = pnand %p6108_p4, %p6259_p5 }
 0x70a   : > { %p6114_p11 = por %p6113_p10, %p6112_p9 }
 0x70b   : > { %p6110_p8 = pneg %p6109_p7 }
 0x70c   : > { %p6116_p13 = por %p6115_p12, %p6114_p11 }
 0x70e   : > { %p6117_p0 = pnand %p6116_p13, %p6110_p8 }
 0x710   : > { %6120 = shalt.err (!%p6117_p0)
}
 0x711   : > { %5670 = dma.vmem_to_hbm [thread:$0]  (%p6259_p5), %s7502_s24, 128, %s7500_s16, %s4846_s22  }
 0x712 PF: > { %p5676_p1 = scmp.ge.s32.totalorder %s6155_s20, 2  ;;  %s4871_s21 = sand.u32 1, %s6143_s17  }
 0x713   : > { %s4872_s29 = scalar_lea.sflag [#allocation8], %s4871_s21 }
 0x714   : > { %p5673_p2 = pnand %p5676_p1, %p6263_p6 }
 0x716   : > { %6138 = dma.done.wait (!%p5673_p2), %s4872_s29, 128  }
 0x717   : > { %6140 = vsyncadd (!%p5673_p2), %s4872_s29, 4294967168  ;;  %s7557_s12 = sld [smem:[#allocation10_spill]]  ;;  %p21_p3 = scmp.ge.s32.totalorder %s6246_s23, 4  }
 0x718   : > { %s7558_s17 = smov %s6147_s18  ;;  %s7559_s18 = smov %s6151_s19 }
 0x719   : > { %s7561_s20 = smov %s6246_s23  ;;  %23 = sbr.rel (!%p21_p3) target bundleno = 3 (0x3), region = 145 }
 0x71d   : > { %s7560_s19 = smov %s7557_s12 }
 0x720   :  { %4877 = vsyncpa [#allocation8], 1 }
 0x721   :  { %4879 = vsyncpa [#allocation8 + $0x1], 1 }

</bundles_post_ra>
